<compile_context>
chip_gen: v7x
topology: tpu7x:2x2x1
jax: 0.10.0
libtpu: 0.0.40
codegen_flags: <defaults>
</compile_context>

<pallas_src>
import jax
import jax.numpy as jnp
from jax.experimental import pallas as pl
from jax.experimental.pallas import tpu as pltpu


def _mlp_kernel(x_ref, w1_ref, b1_ref, w2_hbm, b2_ref, w3_hbm, b3_ref,
                w4_hbm, b4_ref, o_ref, w2_buf, w3_buf, w4_buf, sem):
    """Fused relu(relu(relu(x@W1+b1)@W2+b2)@W3+b3)@W4 + b4 for one batch tile.

    x / W1 / biases / out are auto-pipelined by BlockSpec.  W2/W3/W4 (the bulk
    of the weight bytes) are streamed from HBM into persistent VMEM scratch
    with manual DMAs started before any compute, so layer-1..3 compute overlaps
    the weight loads.  Scratch persists across batch tiles, so the streamed
    weights are read from HBM exactly once per call.
    """
    first = pl.program_id(0) == 0

    @pl.when(first)
    def _start_weight_streams():
        pltpu.make_async_copy(w2_hbm, w2_buf, sem.at[0]).start()
        pltpu.make_async_copy(w3_hbm, w3_buf, sem.at[1]).start()
        pltpu.make_async_copy(w4_hbm, w4_buf, sem.at[2]).start()

    # Layer 1: W1 is already VMEM-resident (BlockSpec); overlaps W2/W3/W4 DMA.
    h = x_ref[...].astype(jnp.bfloat16)
    h = jnp.dot(h, w1_ref[...], preferred_element_type=jnp.float32) + b1_ref[...]
    h = jnp.maximum(h, 0.0).astype(jnp.bfloat16)

    # Layer 2.
    @pl.when(first)
    def _wait_w2():
        pltpu.make_async_copy(w2_hbm, w2_buf, sem.at[0]).wait()
    h = jnp.dot(h, w2_buf[...], preferred_element_type=jnp.float32) + b2_ref[...]
    h = jnp.maximum(h, 0.0).astype(jnp.bfloat16)

    # Layer 3.
    @pl.when(first)
    def _wait_w3():
        pltpu.make_async_copy(w3_hbm, w3_buf, sem.at[1]).wait()
    h = jnp.dot(h, w3_buf[...], preferred_element_type=jnp.float32) + b3_ref[...]
    h = jnp.maximum(h, 0.0).astype(jnp.bfloat16)

    # Layer 4 (no ReLU).
    @pl.when(first)
    def _wait_w4():
        pltpu.make_async_copy(w4_hbm, w4_buf, sem.at[2]).wait()
    h = jnp.dot(h, w4_buf[...], preferred_element_type=jnp.float32) + b4_ref[...]
    o_ref[...] = h.astype(o_ref.dtype)


def feature_to_latent(params, x, *, block_m=256):
    """x: (M, input_dim) f32; params: [(w (in,out), b (1,out) or (out,))] * 4."""
    M, input_dim = x.shape
    (w1, b1), (w2, b2), (w3, b3), (w4, b4) = params
    hidden = w1.shape[1]
    latent_dim = w4.shape[1]

    # Dtype guards: no-ops when params are already stored in the kernel dtypes
    # (as init_params does), so the hot path never adds an extra full-HBM pass
    # over the dominant weight bytes.
    def _w(w):
        return w if w.dtype == jnp.bfloat16 else w.astype(jnp.bfloat16)

    def _b(b):
        b = b if b.dtype == jnp.float32 else b.astype(jnp.float32)
        return b.reshape(1, -1)

    w1, w2, w3, w4 = _w(w1), _w(w2), _w(w3), _w(w4)
    b1, b2, b3, b4 = _b(b1), _b(b2), _b(b3), _b(b4)

    tm = M if M <= block_m else block_m
    grid = (pl.cdiv(M, tm),)

    flops = 2 * M * (input_dim * hidden + 2 * hidden * hidden
                     + hidden * latent_dim)
    bytes_accessed = int(
        x.size * x.dtype.itemsize
        + sum(w.size * w.dtype.itemsize for w in (w1, w2, w3, w4))
        + sum(b.size * b.dtype.itemsize for b in (b1, b2, b3, b4))
        + M * latent_dim * 4)

    return pl.pallas_call(
        _mlp_kernel,
        out_shape=jax.ShapeDtypeStruct((M, latent_dim), jnp.float32),
        grid_spec=pltpu.PrefetchScalarGridSpec(
            num_scalar_prefetch=0,
            grid=grid,
            in_specs=[
                pl.BlockSpec((tm, input_dim), lambda i: (i, 0)),      # x tile
                pl.BlockSpec((input_dim, hidden), lambda i: (0, 0)),  # W1 resident
                pl.BlockSpec((1, hidden), lambda i: (0, 0)),          # b1
                pl.BlockSpec(memory_space=pl.ANY),                    # W2 (streamed)
                pl.BlockSpec((1, hidden), lambda i: (0, 0)),          # b2
                pl.BlockSpec(memory_space=pl.ANY),                    # W3 (streamed)
                pl.BlockSpec((1, hidden), lambda i: (0, 0)),          # b3
                pl.BlockSpec(memory_space=pl.ANY),                    # W4 (streamed)
                pl.BlockSpec((1, latent_dim), lambda i: (0, 0)),      # b4
            ],
            out_specs=pl.BlockSpec((tm, latent_dim), lambda i: (i, 0)),
            scratch_shapes=[
                pltpu.VMEM((hidden, hidden), jnp.bfloat16),       # W2 buffer
                pltpu.VMEM((hidden, hidden), jnp.bfloat16),       # W3 buffer
                pltpu.VMEM((hidden, latent_dim), jnp.bfloat16),   # W4 buffer
                pltpu.SemaphoreType.DMA((3,)),
            ]),
        # "arbitrary": batch tiles run sequentially on one TC and reuse the
        # weight scratch filled at step 0; a parallel split would re-read the
        # weights per core (2x HBM traffic) -- only worth it at much larger M.
        compiler_params=pltpu.CompilerParams(
            dimension_semantics=("arbitrary",)),
        cost_estimate=pl.CostEstimate(
            flops=flops, transcendentals=0, bytes_accessed=bytes_accessed),
    )(x, w1, b1, w2, b2, w3, b3, w4, b4)


def init_params(key, input_dim, latent_dim):
    """Deterministic synthetic params. Weights (in,out) bf16, biases (1,out) f32."""
    dims = [(input_dim, 1024), (1024, 1024), (1024, 1024), (1024, latent_dim)]
    params = []
    for i, (d_in, d_out) in enumerate(dims):
        kw, kb = jax.random.split(jax.random.fold_in(key, i))
        bound = 1.0 / jnp.sqrt(d_in)  # matches nn.Linear default init scale
        w = jax.random.uniform(kw, (d_in, d_out), jnp.float32, -bound, bound)
        b = jax.random.uniform(kb, (1, d_out), jnp.float32, -bound, bound)
        params.append((w.astype(jnp.bfloat16), b))
    return params


if __name__ == "__main__":
    key = jax.random.PRNGKey(0)
    batch, input_dim, latent_dim = 8, 256, 128

    kx, kp = jax.random.split(key)
    x = jax.random.normal(kx, (batch, input_dim), jnp.float32)
    params = init_params(kp, input_dim, latent_dim)

    out = jax.block_until_ready(feature_to_latent(params, x))
    assert out.shape == (batch, latent_dim), out.shape

    # Tight check: plain-JAX reference matching the kernel's bf16-matmul /
    # f32-accumulate path exactly.
    h = x
    for i, (w, b) in enumerate(params):
        h = jnp.dot(h.astype(jnp.bfloat16), w,
                    preferred_element_type=jnp.float32) + b
        if i < 3:
            h = jnp.maximum(h, 0.0)
    assert jnp.allclose(out, h, atol=1e-3, rtol=1e-3), \
        float(jnp.max(jnp.abs(out - h)))

    # Loose check: full-f32 math with the same (bf16-stored) weights; only the
    # kernel's bf16 activation rounding differs.
    h32 = x
    for i, (w, b) in enumerate(params):
        h32 = h32 @ w.astype(jnp.float32) + b
        if i < 3:
            h32 = jnp.maximum(h32, 0.0)
    assert jnp.allclose(out, h32, atol=1e-2, rtol=2e-2), \
        float(jnp.max(jnp.abs(out - h32)))

    print("KERNEL_OK")
</pallas_src>

<mosaic_0001>
module attributes {stable_mosaic.version = 11 : i64} {
  func.func @_mlp_kernel(%arg0: i32, %arg1: memref<8x256xf32, #tpu.memory_space<vmem>>, %arg2: memref<256x1024xbf16, #tpu.memory_space<vmem>>, %arg3: memref<1x1024xf32, #tpu.memory_space<vmem>>, %arg4: memref<1024x1024xbf16, #tpu.memory_space<any>>, %arg5: memref<1x1024xf32, #tpu.memory_space<vmem>>, %arg6: memref<1024x1024xbf16, #tpu.memory_space<any>>, %arg7: memref<1x1024xf32, #tpu.memory_space<vmem>>, %arg8: memref<1024x128xbf16, #tpu.memory_space<any>>, %arg9: memref<1x128xf32, #tpu.memory_space<vmem>>, %arg10: memref<8x128xf32, #tpu.memory_space<vmem>>, %arg11: memref<1024x1024xbf16, #tpu.memory_space<vmem>>, %arg12: memref<1024x1024xbf16, #tpu.memory_space<vmem>>, %arg13: memref<1024x128xbf16, #tpu.memory_space<vmem>>, %arg14: memref<3x!tpu.dma_semaphore, #tpu.memory_space<semaphore_mem>>) attributes {dimension_semantics = [#tpu.dimension_semantics<arbitrary>], iteration_bounds = array<i64: 1>, scalar_prefetch = 0 : i64, scratch_operands = 4 : i64, tpu.core_type = #tpu.core_type<tc>, window_params = [{transform_indices = @transform_0, window_bounds = array<i64: 8, 256>}, {pipeline_mode = #tpu.pipeline_mode<synchronous>, transform_indices = @transform_1, window_bounds = array<i64: 256, 1024>}, {pipeline_mode = #tpu.pipeline_mode<synchronous>, transform_indices = @transform_2, window_bounds = array<i64: 1, 1024>}, {}, {pipeline_mode = #tpu.pipeline_mode<synchronous>, transform_indices = @transform_4, window_bounds = array<i64: 1, 1024>}, {}, {pipeline_mode = #tpu.pipeline_mode<synchronous>, transform_indices = @transform_6, window_bounds = array<i64: 1, 1024>}, {}, {pipeline_mode = #tpu.pipeline_mode<synchronous>, transform_indices = @transform_8, window_bounds = array<i64: 1, 128>}, {transform_indices = @transform_9, window_bounds = array<i64: 8, 128>}]} {
    %c0_i32 = arith.constant 0 : i32
    %0 = arith.cmpi eq, %arg0, %c0_i32 : i32
    %1 = arith.extui %0 : i1 to i32
    %c0_i32_0 = arith.constant 0 : i32
    %2 = arith.cmpi ne, %1, %c0_i32_0 : i32
    scf.if %2 {
      %c0_i32_29 = arith.constant 0 : i32
      %41 = tpu.memref_slice %arg14[%c0_i32_29] : memref<3x!tpu.dma_semaphore, #tpu.memory_space<semaphore_mem>> -> memref<1x!tpu.dma_semaphore, #tpu.memory_space<semaphore_mem>>
      %42 = tpu.memref_squeeze %41 : memref<1x!tpu.dma_semaphore, #tpu.memory_space<semaphore_mem>> -> memref<!tpu.dma_semaphore, #tpu.memory_space<semaphore_mem>>
      tpu.enqueue_dma source(%arg4 : memref<1024x1024xbf16, #tpu.memory_space<any>>) target(%arg11 : memref<1024x1024xbf16, #tpu.memory_space<vmem>>) target_semaphore(%42 : memref<!tpu.dma_semaphore, #tpu.memory_space<semaphore_mem>>)
      %c1_i32 = arith.constant 1 : i32
      %43 = tpu.memref_slice %arg14[%c1_i32] : memref<3x!tpu.dma_semaphore, #tpu.memory_space<semaphore_mem>> -> memref<1x!tpu.dma_semaphore, #tpu.memory_space<semaphore_mem>>
      %44 = tpu.memref_squeeze %43 : memref<1x!tpu.dma_semaphore, #tpu.memory_space<semaphore_mem>> -> memref<!tpu.dma_semaphore, #tpu.memory_space<semaphore_mem>>
      tpu.enqueue_dma source(%arg6 : memref<1024x1024xbf16, #tpu.memory_space<any>>) target(%arg12 : memref<1024x1024xbf16, #tpu.memory_space<vmem>>) target_semaphore(%44 : memref<!tpu.dma_semaphore, #tpu.memory_space<semaphore_mem>>)
      %c2_i32 = arith.constant 2 : i32
      %45 = tpu.memref_slice %arg14[%c2_i32] : memref<3x!tpu.dma_semaphore, #tpu.memory_space<semaphore_mem>> -> memref<1x!tpu.dma_semaphore, #tpu.memory_space<semaphore_mem>>
      %46 = tpu.memref_squeeze %45 : memref<1x!tpu.dma_semaphore, #tpu.memory_space<semaphore_mem>> -> memref<!tpu.dma_semaphore, #tpu.memory_space<semaphore_mem>>
      tpu.enqueue_dma source(%arg8 : memref<1024x128xbf16, #tpu.memory_space<any>>) target(%arg13 : memref<1024x128xbf16, #tpu.memory_space<vmem>>) target_semaphore(%46 : memref<!tpu.dma_semaphore, #tpu.memory_space<semaphore_mem>>)
    } else {
    }
    %c0 = arith.constant 0 : index
    %c0_1 = arith.constant 0 : index
    %3 = vector.load %arg1[%c0, %c0_1] : memref<8x256xf32, #tpu.memory_space<vmem>>, vector<8x256xf32>
    %4 = arith.truncf %3 : vector<8x256xf32> to vector<8x256xbf16>
    %c0_2 = arith.constant 0 : index
    %c0_3 = arith.constant 0 : index
    %5 = vector.load %arg2[%c0_2, %c0_3] : memref<256x1024xbf16, #tpu.memory_space<vmem>>, vector<256x1024xbf16>
    %cst = arith.constant dense<0.000000e+00> : vector<8x1024xf32>
    %6 = tpu.matmul %4, %5, %cst {dimension_numbers = #tpu.dot_dimension_numbers<[1], [0], [0], [1], [0, 0, 1, 1], [], []>} : vector<8x256xbf16>, vector<256x1024xbf16>, vector<8x1024xf32> -> vector<8x1024xf32>
    %c0_4 = arith.constant 0 : index
    %c0_5 = arith.constant 0 : index
    %7 = vector.load %arg3[%c0_4, %c0_5] : memref<1x1024xf32, #tpu.memory_space<vmem>>, vector<1x1024xf32>
    %8 = vector.broadcast %7 : vector<1x1024xf32> to vector<8x1024xf32>
    %9 = arith.addf %6, %8 : vector<8x1024xf32>
    %cst_6 = arith.constant 0.000000e+00 : f32
    %10 = vector.broadcast %cst_6 : f32 to vector<8x1024xf32>
    %11 = arith.maximumf %9, %10 : vector<8x1024xf32>
    %12 = arith.truncf %11 : vector<8x1024xf32> to vector<8x1024xbf16>
    %13 = arith.extui %0 : i1 to i32
    %c0_i32_7 = arith.constant 0 : i32
    %14 = arith.cmpi ne, %13, %c0_i32_7 : i32
    scf.if %14 {
      %c0_i32_29 = arith.constant 0 : i32
      %41 = tpu.memref_slice %arg14[%c0_i32_29] : memref<3x!tpu.dma_semaphore, #tpu.memory_space<semaphore_mem>> -> memref<1x!tpu.dma_semaphore, #tpu.memory_space<semaphore_mem>>
      %42 = tpu.memref_squeeze %41 : memref<1x!tpu.dma_semaphore, #tpu.memory_space<semaphore_mem>> -> memref<!tpu.dma_semaphore, #tpu.memory_space<semaphore_mem>>
      tpu.wait_dma2 semaphore(%42 : memref<!tpu.dma_semaphore, #tpu.memory_space<semaphore_mem>>) src(%arg4 : memref<1024x1024xbf16, #tpu.memory_space<any>>) dst(%arg11 : memref<1024x1024xbf16, #tpu.memory_space<vmem>>)
    } else {
    }
    %c0_8 = arith.constant 0 : index
    %c0_9 = arith.constant 0 : index
    %15 = vector.load %arg11[%c0_8, %c0_9] : memref<1024x1024xbf16, #tpu.memory_space<vmem>>, vector<1024x1024xbf16>
    %cst_10 = arith.constant dense<0.000000e+00> : vector<8x1024xf32>
    %16 = tpu.matmul %12, %15, %cst_10 {dimension_numbers = #tpu.dot_dimension_numbers<[1], [0], [0], [1], [0, 0, 1, 1], [], []>} : vector<8x1024xbf16>, vector<1024x1024xbf16>, vector<8x1024xf32> -> vector<8x1024xf32>
    %c0_11 = arith.constant 0 : index
    %c0_12 = arith.constant 0 : index
    %17 = vector.load %arg5[%c0_11, %c0_12] : memref<1x1024xf32, #tpu.memory_space<vmem>>, vector<1x1024xf32>
    %18 = vector.broadcast %17 : vector<1x1024xf32> to vector<8x1024xf32>
    %19 = arith.addf %16, %18 : vector<8x1024xf32>
    %cst_13 = arith.constant 0.000000e+00 : f32
    %20 = vector.broadcast %cst_13 : f32 to vector<8x1024xf32>
    %21 = arith.maximumf %19, %20 : vector<8x1024xf32>
    %22 = arith.truncf %21 : vector<8x1024xf32> to vector<8x1024xbf16>
    %23 = arith.extui %0 : i1 to i32
    %c0_i32_14 = arith.constant 0 : i32
    %24 = arith.cmpi ne, %23, %c0_i32_14 : i32
    scf.if %24 {
      %c1_i32 = arith.constant 1 : i32
      %41 = tpu.memref_slice %arg14[%c1_i32] : memref<3x!tpu.dma_semaphore, #tpu.memory_space<semaphore_mem>> -> memref<1x!tpu.dma_semaphore, #tpu.memory_space<semaphore_mem>>
      %42 = tpu.memref_squeeze %41 : memref<1x!tpu.dma_semaphore, #tpu.memory_space<semaphore_mem>> -> memref<!tpu.dma_semaphore, #tpu.memory_space<semaphore_mem>>
      tpu.wait_dma2 semaphore(%42 : memref<!tpu.dma_semaphore, #tpu.memory_space<semaphore_mem>>) src(%arg6 : memref<1024x1024xbf16, #tpu.memory_space<any>>) dst(%arg12 : memref<1024x1024xbf16, #tpu.memory_space<vmem>>)
    } else {
    }
    %c0_15 = arith.constant 0 : index
    %c0_16 = arith.constant 0 : index
    %25 = vector.load %arg12[%c0_15, %c0_16] : memref<1024x1024xbf16, #tpu.memory_space<vmem>>, vector<1024x1024xbf16>
    %cst_17 = arith.constant dense<0.000000e+00> : vector<8x1024xf32>
    %26 = tpu.matmul %22, %25, %cst_17 {dimension_numbers = #tpu.dot_dimension_numbers<[1], [0], [0], [1], [0, 0, 1, 1], [], []>} : vector<8x1024xbf16>, vector<1024x1024xbf16>, vector<8x1024xf32> -> vector<8x1024xf32>
    %c0_18 = arith.constant 0 : index
    %c0_19 = arith.constant 0 : index
    %27 = vector.load %arg7[%c0_18, %c0_19] : memref<1x1024xf32, #tpu.memory_space<vmem>>, vector<1x1024xf32>
    %28 = vector.broadcast %27 : vector<1x1024xf32> to vector<8x1024xf32>
    %29 = arith.addf %26, %28 : vector<8x1024xf32>
    %cst_20 = arith.constant 0.000000e+00 : f32
    %30 = vector.broadcast %cst_20 : f32 to vector<8x1024xf32>
    %31 = arith.maximumf %29, %30 : vector<8x1024xf32>
    %32 = arith.truncf %31 : vector<8x1024xf32> to vector<8x1024xbf16>
    %33 = arith.extui %0 : i1 to i32
    %c0_i32_21 = arith.constant 0 : i32
    %34 = arith.cmpi ne, %33, %c0_i32_21 : i32
    scf.if %34 {
      %c2_i32 = arith.constant 2 : i32
      %41 = tpu.memref_slice %arg14[%c2_i32] : memref<3x!tpu.dma_semaphore, #tpu.memory_space<semaphore_mem>> -> memref<1x!tpu.dma_semaphore, #tpu.memory_space<semaphore_mem>>
      %42 = tpu.memref_squeeze %41 : memref<1x!tpu.dma_semaphore, #tpu.memory_space<semaphore_mem>> -> memref<!tpu.dma_semaphore, #tpu.memory_space<semaphore_mem>>
      tpu.wait_dma2 semaphore(%42 : memref<!tpu.dma_semaphore, #tpu.memory_space<semaphore_mem>>) src(%arg8 : memref<1024x128xbf16, #tpu.memory_space<any>>) dst(%arg13 : memref<1024x128xbf16, #tpu.memory_space<vmem>>)
    } else {
    }
    %c0_22 = arith.constant 0 : index
    %c0_23 = arith.constant 0 : index
    %35 = vector.load %arg13[%c0_22, %c0_23] : memref<1024x128xbf16, #tpu.memory_space<vmem>>, vector<1024x128xbf16>
    %cst_24 = arith.constant dense<0.000000e+00> : vector<8x128xf32>
    %36 = tpu.matmul %32, %35, %cst_24 {dimension_numbers = #tpu.dot_dimension_numbers<[1], [0], [0], [1], [0, 0, 1, 1], [], []>} : vector<8x1024xbf16>, vector<1024x128xbf16>, vector<8x128xf32> -> vector<8x128xf32>
    %c0_25 = arith.constant 0 : index
    %c0_26 = arith.constant 0 : index
    %37 = vector.load %arg9[%c0_25, %c0_26] : memref<1x128xf32, #tpu.memory_space<vmem>>, vector<1x128xf32>
    %38 = vector.broadcast %37 : vector<1x128xf32> to vector<8x128xf32>
    %39 = arith.addf %36, %38 : vector<8x128xf32>
    %c0_27 = arith.constant 0 : index
    %c0_28 = arith.constant 0 : index
    %40 = vector.load %arg10[%c0_27, %c0_28] : memref<8x128xf32, #tpu.memory_space<vmem>>, vector<8x128xf32>
    tpu.vector_store %arg10[%c0_27, %c0_28], %39 {strides = array<i32>} : memref<8x128xf32, #tpu.memory_space<vmem>>, vector<8x128xf32>,
    return
  }
  func.func @transform_0(%arg0: i32) -> (i32, i32) {
    %c0_i32 = arith.constant 0 : i32
    %c0_i32_0 = arith.constant 0 : i32
    return %arg0, %c0_i32 : i32, i32
  }
  func.func @transform_1(%arg0: i32) -> (i32, i32) {
    %c0_i32 = arith.constant 0 : i32
    %c0_i32_0 = arith.constant 0 : i32
    %c0_i32_1 = arith.constant 0 : i32
    return %c0_i32, %c0_i32_0 : i32, i32
  }
  func.func @transform_2(%arg0: i32) -> (i32, i32) {
    %c0_i32 = arith.constant 0 : i32
    %c0_i32_0 = arith.constant 0 : i32
    %c0_i32_1 = arith.constant 0 : i32
    return %c0_i32, %c0_i32_0 : i32, i32
  }
  func.func @transform_4(%arg0: i32) -> (i32, i32) {
    %c0_i32 = arith.constant 0 : i32
    %c0_i32_0 = arith.constant 0 : i32
    %c0_i32_1 = arith.constant 0 : i32
    return %c0_i32, %c0_i32_0 : i32, i32
  }
  func.func @transform_6(%arg0: i32) -> (i32, i32) {
    %c0_i32 = arith.constant 0 : i32
    %c0_i32_0 = arith.constant 0 : i32
    %c0_i32_1 = arith.constant 0 : i32
    return %c0_i32, %c0_i32_0 : i32, i32
  }
  func.func @transform_8(%arg0: i32) -> (i32, i32) {
    %c0_i32 = arith.constant 0 : i32
    %c0_i32_0 = arith.constant 0 : i32
    %c0_i32_1 = arith.constant 0 : i32
    return %c0_i32, %c0_i32_0 : i32, i32
  }
  func.func @transform_9(%arg0: i32) -> (i32, i32) {
    %c0_i32 = arith.constant 0 : i32
    %c0_i32_0 = arith.constant 0 : i32
    return %arg0, %c0_i32 : i32, i32
  }
}

</mosaic_0001>

<bundles_post_ra>
// kernel: tpu_custom_call.1
= control target key start
LH: loop header
LB: loop body
LE: loop exit
PB: predicated region body
PF: predicated region fallthrough
CT: control target
= control target key end

     0   :  { %14 = vsyncpa [#allocation7], 0  ;;  %s4847_s0 = inlined_call_operand.hbm [shape: f32[8,256], index: 0, kind: input, shape index: {}]   ;;  %s4848_s1 = inlined_call_operand.hbm [shape: bf16[256,1024], index: 1, kind: input, shape index: {}]   ;;  %s4849_s2 = inlined_call_operand.hbm [shape: f32[1,1024], index: 2, kind: input, shape index: {}]   ;;  %s4850_s3 = inlined_call_operand.hbm [shape: bf16[1024,1024], index: 3, kind: input, shape index: {}]   ;;  %s4851_s4 = inlined_call_operand.hbm [shape: f32[1,1024], index: 4, kind: input, shape index: {}]   ;;  %s4852_s5 = inlined_call_operand.hbm [shape: bf16[1024,1024], index: 5, kind: input, shape index: {}]   ;;  %s4853_s6 = inlined_call_operand.hbm [shape: f32[1,1024], index: 6, kind: input, shape index: {}]   ;;  %s4854_s7 = inlined_call_operand.hbm [shape: bf16[1024,128], index: 7, kind: input, shape index: {}]   ;;  %s4855_s8 = inlined_call_operand.hbm [shape: f32[1,128], index: 8, kind: input, shape index: {}]   ;;  %s4856_s9 = inlined_call_operand.hbm [shape: f32[8,128], index: 9, kind: output, shape index: {}]  }
   0x1   :  { %15 = vsyncpa [#allocation10], 0 }
   0x2   :  { %16 = vsyncpa [#allocation13], 0 }
   0x3   :  { %17 = vsyncpa [#allocation16], 0 }
   0x4   :  { %18 = vsyncpa [#allocation8], 0  ;;  %s4476_s30 = smov [#allocation9]   ;;  %s4284_s13 = scalar_lea.hbm %s4848_s1, 16384 }
   0x5   :  { %s34_s10 = sshll.u32 %s4476_s30, 4  ;;  %p4285_p0 = scmp.ne.s32.totalorder %s4848_s1, %s4284_s13  ;;  %s35_s10 = int_to_ptr.vmem [resolvable:$true] %s34_s10 }
   0x6   :  { %p4288_p1 = scmp.lt.u32.totalorder %s4284_s13, %s4848_s1 }
   0x8   :  { %p4290_p2 = pnand %p4288_p1, %p4285_p0 }
   0xa   :  { %4293 = shalt.err (!%p4290_p2)
}
   0xb   :  { %s4294_s18 = scalar_lea.vmem %s35_s10, 16384  ;;  %p4299_p4 = scmp.lt.s32.totalorder %s35_s10, %s35_s10 }
   0xc   :  { %p4295_p3 = scmp.ne.s32.totalorder %s35_s10, %s4294_s18  ;;  %p4300_p5 = scmp.lt.s32.totalorder %s4294_s18, %s4294_s18 }
   0xe   :  { %p4301_p6 = por %p4300_p5, %p4299_p4 }
  0x10   :  { %p4302_p7 = pnand %p4301_p6, %p4295_p3 }
  0x12   :  { %4305 = shalt.err (!%p4302_p7)
}
  0x13   :  { %s4477_s19 = smov 512   ;;  %s4478_s20 = smov 32  }
  0x14   :  { %40 = dma.hbm_to_vmem [thread:$0]  %s4848_s1, 16384, %s35_s10, [#allocation10], %s4477_s19, %s4477_s19, %s4478_s20  }
  0x15   :  { %s4479_s23 = smov [#allocation12]   ;;  %s4480_s25 = smov [#allocation6]  }
  0x16   :  { %s57_s24 = sshll.u32 %s4479_s23, 4  ;;  %s25_s26 = sshll.u32 %s4480_s25, 4  ;;  %s58_s24 = int_to_ptr.vmem [resolvable:$true] %s57_s24  ;;  %s26_s26 = int_to_ptr.vmem [resolvable:$true] %s25_s26 }
  0x17   :  { %s4306_s29 = scalar_lea.hbm %s4851_s4, 128 }
  0x18   :  { %p4307_p8 = scmp.ne.s32.totalorder %s4851_s4, %s4306_s29  ;;  %p4310_p9 = scmp.lt.u32.totalorder %s4306_s29, %s4851_s4 }
  0x1a   :  { %p4312_p10 = pnand %p4310_p9, %p4307_p8 }
  0x1c   :  { %4315 = shalt.err (!%p4312_p10)
}
  0x1d   :  { %s4316_s1 = scalar_lea.vmem %s58_s24, 128  ;;  %p4321_p12 = scmp.lt.s32.totalorder %s58_s24, %s58_s24 }
  0x1e   :  { %p4317_p11 = scmp.ne.s32.totalorder %s58_s24, %s4316_s1  ;;  %p4322_p13 = scmp.lt.s32.totalorder %s4316_s1, %s4316_s1 }
  0x20   :  { %p4323_p0 = por %p4322_p13, %p4321_p12 }
  0x22   :  { %p4324_p1 = pnand %p4323_p0, %p4317_p11 }
  0x24   :  { %4327 = shalt.err (!%p4324_p1)
}
  0x25   :  { %60 = dma.hbm_to_vmem [thread:$0]  %s4851_s4, 128, %s58_s24, [#allocation13]  }
  0x26   :  { %s4328_s17 = scalar_lea.hbm %s4847_s0, 256 }
  0x27   :  { %p4329_p2 = scmp.ne.s32.totalorder %s4847_s0, %s4328_s17  ;;  %p4332_p3 = scmp.lt.u32.totalorder %s4328_s17, %s4847_s0 }
  0x29   :  { %p4334_p4 = pnand %p4332_p3, %p4329_p2 }
  0x2b   :  { %4337 = shalt.err (!%p4334_p4)
}
  0x2c   :  { %s4338_s22 = scalar_lea.vmem %s26_s26, 256  ;;  %p4343_p6 = scmp.lt.s32.totalorder %s26_s26, %s26_s26 }
  0x2d   :  { %p4339_p5 = scmp.ne.s32.totalorder %s26_s26, %s4338_s22  ;;  %p4344_p7 = scmp.lt.s32.totalorder %s4338_s22, %s4338_s22 }
  0x2f   :  { %p4345_p8 = por %p4344_p7, %p4343_p6 }
  0x31   :  { %p4346_p9 = pnand %p4345_p8, %p4339_p5 }
  0x33   :  { %4349 = shalt.err (!%p4346_p9)
}
  0x34   :  { %28 = dma.hbm_to_vmem [thread:$0]  %s4847_s0, 256, %s26_s26, [#allocation7]  }
  0x35   :  { %s4481_s24 = smov [#allocation11]   ;;  %s4482_s27 = smov [#allocation14]  }
  0x36   :  { %s47_s25 = sshll.u32 %s4481_s24, 4  ;;  %s67_s28 = sshll.u32 %s4482_s27, 4  ;;  %s48_s25 = int_to_ptr.vmem [resolvable:$true] %s47_s25  ;;  %s68_s28 = int_to_ptr.vmem [resolvable:$true] %s67_s28 }
  0x37   :  { %s4350_s11 = scalar_lea.hbm %s4849_s2, 128 }
  0x38   :  { %p4351_p10 = scmp.ne.s32.totalorder %s4849_s2, %s4350_s11  ;;  %p4354_p11 = scmp.lt.u32.totalorder %s4350_s11, %s4849_s2 }
  0x3a   :  { %p4356_p12 = pnand %p4354_p11, %p4351_p10 }
  0x3c   :  { %4359 = shalt.err (!%p4356_p12)
}
  0x3d   :  { %s4360_s0 = scalar_lea.vmem %s48_s25, 128  ;;  %p4365_p0 = scmp.lt.s32.totalorder %s48_s25, %s48_s25 }
  0x3e   :  { %p4361_p13 = scmp.ne.s32.totalorder %s48_s25, %s4360_s0  ;;  %p4366_p1 = scmp.lt.s32.totalorder %s4360_s0, %s4360_s0 }
  0x40   :  { %p4367_p2 = por %p4366_p1, %p4365_p0 }
  0x42   :  { %p4368_p3 = pnand %p4367_p2, %p4361_p13 }
  0x44   :  { %4371 = shalt.err (!%p4368_p3)
}
  0x45   :  { %50 = dma.hbm_to_vmem [thread:$0]  %s4849_s2, 128, %s48_s25, [#allocation10]  }
  0x46   :  { %s4372_s17 = scalar_lea.hbm %s4853_s6, 128 }
  0x47   :  { %p4373_p4 = scmp.ne.s32.totalorder %s4853_s6, %s4372_s17  ;;  %p4376_p5 = scmp.lt.u32.totalorder %s4372_s17, %s4853_s6 }
  0x49   :  { %p4378_p6 = pnand %p4376_p5, %p4373_p4 }
  0x4b   :  { %4381 = shalt.err (!%p4378_p6)
}
  0x4c   :  { %s4382_s22 = scalar_lea.vmem %s68_s28, 128  ;;  %p4387_p8 = scmp.lt.s32.totalorder %s68_s28, %s68_s28 }
  0x4d   :  { %p4383_p7 = scmp.ne.s32.totalorder %s68_s28, %s4382_s22  ;;  %p4388_p9 = scmp.lt.s32.totalorder %s4382_s22, %s4382_s22 }
  0x4f   :  { %p4389_p10 = por %p4388_p9, %p4387_p8 }
  0x51   :  { %p4390_p11 = pnand %p4389_p10, %p4383_p7 }
  0x53   :  { %4393 = shalt.err (!%p4390_p11)
}
  0x54   :  { %70 = dma.hbm_to_vmem [thread:$0]  %s4853_s6, 128, %s68_s28, [#allocation13]  }
  0x55   :  { %s4483_s23 = smov [#allocation15]   ;;  %s4394_s29 = scalar_lea.hbm %s4855_s8, 16 }
  0x56   :  { %s77_s24 = sshll.u32 %s4483_s23, 4  ;;  %p4395_p12 = scmp.ne.s32.totalorder %s4855_s8, %s4394_s29  ;;  %s78_s24 = int_to_ptr.vmem [resolvable:$true] %s77_s24 }
  0x57   :  { %p4398_p13 = scmp.lt.u32.totalorder %s4394_s29, %s4855_s8 }
  0x59   :  { %p4400_p0 = pnand %p4398_p13, %p4395_p12 }
  0x5b   :  { %4403 = shalt.err (!%p4400_p0)
}
  0x5c   :  { %s4404_s1 = scalar_lea.vmem %s78_s24, 16  ;;  %s4408_s6 = scalar_lea.vmem %s78_s24, 32 }
  0x5d   :  { %p4405_p1 = scmp.ne.s32.totalorder %s78_s24, %s4404_s1  ;;  %p4409_p2 = scmp.lt.s32.totalorder %s78_s24, %s78_s24 }
  0x5e   :  { %p4410_p3 = scmp.lt.s32.totalorder %s4408_s6, %s4404_s1 }
  0x60   :  { %p4411_p4 = por %p4410_p3, %p4409_p2 }
  0x62   :  { %p4412_p5 = pnand %p4411_p4, %p4405_p1 }
  0x64   :  { %4415 = shalt.err (!%p4412_p5)
}
  0x65   :  { %80 = dma.hbm_to_vmem [thread:$0]  %s4855_s8, 16, %s78_s24, [#allocation16]  }
  0x66   :  { %4460 = dma.done.wait [#allocation7], 256  }
  0x67   :  { %4461 = vsyncadd [#allocation7], 4294967040 }
  0x68   :  { %4462 = dma.done.wait [#allocation10], 16512  }
  0x69   :  { %4463 = vsyncadd [#allocation10], 4294950784 }
  0x6a   :  { %4464 = dma.done.wait [#allocation13], 256  }
  0x6b   :  { %4465 = vsyncadd [#allocation13], 4294967040 }
  0x6c   :  { %4466 = dma.done.wait [#allocation16], 16  }
  0x6d   :  { %4467 = vsyncadd [#allocation16], 4294967280 }
  0x6e   :  { %s108_s0 = sld [smem:[#allocation0]]   ;;  %s4484_s26 = smov [#allocation2]  }
  0x6f   :  { %s116_s14 = sshll.u32 %s4484_s26, 4  ;;  %s4485_s15 = smov 1024   ;;  %s117_s14 = int_to_ptr.vmem [resolvable:$true] %s116_s14 }
  0x70   :  { %120 = sst [smem:[#allocation19]] %s4485_s15  ;;  %s4486_s16 = smov 8  }
  0x71   :  { %122 = sst [smem:[#allocation19 + $0x1]] %s4485_s15  ;;  %s4487_s17 = smov 64  }
  0x72   :  { %124 = sst [smem:[#allocation19 + $0x2]] %s4486_s16  ;;  %s4488_s18 = smov 128  }
  0x73   :  { %126 = sst [smem:[#allocation19 + $0x3]] %s4487_s17  ;;  %s4489_s20 = smov 2  }
  0x74   :  { %s3925_s8 = sshll.u32 %s108_s0, 26  ;;  %128 = sst [smem:[#allocation19 + $0x4]] %s4488_s18 }
  0x75   :  { %s4621_s19 = sadd.s32 134217728, %s3925_s8  ;;  %130 = sst [smem:[#allocation19 + $0x5]] %s4489_s20 }
  0x76   :  { %s4490_s21 = smov 512   ;;  %134 = sst [smem:[#allocation19 + $0x7]] %s4487_s17 }
  0x77   :  { %132 = sst [smem:[#allocation19 + $0x6]] %s4490_s21  ;;  %s4491_s22 = smov 4  }
  0x78   :  { %136 = sst [smem:[#allocation19 + $0x8]] %s4491_s22  ;;  %s4492_s2 = smov [#allocation5]  }
  0x79   :  { %s4493_s4 = smov [#allocation18]   ;;  %s4494_s25 = smov [#allocation3]  }
  0x7a   :  { %138 = dma.general %s4850_s3, 65536, %s117_s14, %s4492_s2, %s4493_s4, [#allocation19], %s4621_s19, 0  }
  0x7b   :  { %155 = sst [smem:[#allocation21]] %s4485_s15  ;;  %s151_s27 = sshll.u32 %s4494_s25, 4  ;;  %s152_s27 = int_to_ptr.vmem [resolvable:$true] %s151_s27 }
  0x7c   :  { %157 = sst [smem:[#allocation21 + $0x1]] %s4485_s15  ;;  %s4495_s29 = smov [#allocation4]  }
  0x7d   :  { %159 = sst [smem:[#allocation21 + $0x2]] %s4486_s16  ;;  %s182_s30 = sshll.u32 %s4495_s29, 4  ;;  %s183_s30 = int_to_ptr.vmem [resolvable:$true] %s182_s30 }
  0x7e   :  { %161 = sst [smem:[#allocation21 + $0x3]] %s4487_s17  ;;  %s4496_s11 = smov [#allocation5 + $0x1]  }
  0x7f   :  { %163 = sst [smem:[#allocation21 + $0x4]] %s4488_s18  ;;  %s4497_s12 = smov [#allocation20]  }
  0x80   :  { %165 = sst [smem:[#allocation21 + $0x5]] %s4489_s20  ;;  %s4416_s28 = scalar_lea.hbm %s4854_s7, 8192 }
  0x81   :  { %167 = sst [smem:[#allocation21 + $0x6]] %s4490_s21  ;;  %p4417_p6 = scmp.ne.s32.totalorder %s4854_s7, %s4416_s28 }
  0x82   :  { %169 = sst [smem:[#allocation21 + $0x7]] %s4487_s17  ;;  %p4420_p7 = scmp.lt.u32.totalorder %s4416_s28, %s4854_s7 }
  0x83   :  { %171 = sst [smem:[#allocation21 + $0x8]] %s4491_s22 }
  0x84   :  { %173 = dma.general %s4852_s5, 65536, %s152_s27, %s4496_s11, %s4497_s12, [#allocation21], %s4621_s19, 0  }
  0x85   :  { %p4422_p8 = pnand %p4420_p7, %p4417_p6 }
  0x87   :  { %4425 = shalt.err (!%p4422_p8)  }
  0x88   :  { %s4426_s15 = scalar_lea.vmem %s183_s30, 8192  ;;  %p4431_p10 = scmp.lt.s32.totalorder %s183_s30, %s183_s30 }
  0x89   :  { %p4427_p9 = scmp.ne.s32.totalorder %s183_s30, %s4426_s15  ;;  %p4432_p11 = scmp.lt.s32.totalorder %s4426_s15, %s4426_s15 }
  0x8b   :  { %p4433_p12 = por %p4432_p11, %p4431_p10 }
  0x8d   :  { %p4434_p13 = pnand %p4433_p12, %p4427_p9 }
  0x8f   :  { %4437 = shalt.err (!%p4434_p13)  }
  0x90   :  { %185 = dma.hbm_to_vmem [thread:$0]  %s4854_s7, 8192, %s183_s30, [#allocation5 + $0x2]  ;;  %v190_v0 = vld [vmem:[#allocation9] sm:$0xff]  ;;  %v191_v2 = vld [vmem:[#allocation9 + $0x8] sm:$0xff]  ;;  %v187_v53 = vld [vmem:[#allocation6 + $0x8] sm:$0xff] }
  0x91   :  { %v194_v1 = vld [vmem:[#allocation9 + $0x20] sm:$0xff]  ;;  %v195_v4 = vld [vmem:[#allocation9 + $0x28] sm:$0xff]  ;;  %v4643_v57 = vpack.c.bf16 %v187_v53, %v187_v53 }
  0x92   :  { %v3930_v3 = vcombine.high %v190_v0, %v194_v1  ;;  %v3929_v5 = vcombine.low %v190_v0, %v194_v1  ;;  %v198_v6 = vld [vmem:[#allocation9 + $0x40] sm:$0xff]  ;;  %v3932_v8 = vcombine.high %v191_v2, %v195_v4  ;;  %v3931_v9 = vcombine.low %v191_v2, %v195_v4  ;;  %v199_v11 = vld [vmem:[#allocation9 + $0x48] sm:$0xff] }
  0x93   :  { %v202_v7 = vld [vmem:[#allocation9 + $0x60] sm:$0xff]  ;;  %v203_v12 = vld [vmem:[#allocation9 + $0x68] sm:$0xff]  ;;  %1032 = vmatprep.mubr.bf16.mxu0 %v4643_v57  ;;  %1073 = vmatprep.mubr.bf16.mxu1 %v4643_v57 }
  0x94   :  { %v3938_v10 = vcombine.high %v198_v6, %v202_v7  ;;  %v206_v13 = vld [vmem:[#allocation9 + $0x80] sm:$0xff]  ;;  %1000 = vmatprep.subr.bf16.mxu0 %v3930_v3  ;;  %v3940_v14 = vcombine.high %v199_v11, %v203_v12  ;;  %v207_v16 = vld [vmem:[#allocation9 + $0x88] sm:$0xff]  ;;  %1041 = vmatprep.subr.bf16.mxu1 %v3932_v8  ;;  %v3937_v18 = vcombine.low %v198_v6, %v202_v7 }
  0x95   :  { %v210_v15 = vld [vmem:[#allocation9 + $0xa0] sm:$0xff]  ;;  %v211_v17 = vld [vmem:[#allocation9 + $0xa8] sm:$0xff]  ;;  %1001 = vmatpush1.bf16.msra.mxu0 %v3929_v5  ;;  %1042 = vmatpush1.bf16.msra.mxu1 %v3931_v9  ;;  %v3939_v19 = vcombine.low %v199_v11, %v203_v12 }
  0x96   :  { %1002 = vmatprep.subr.bf16.mxu0 %v3938_v10  ;;  %v3946_v20 = vcombine.high %v206_v13, %v210_v15  ;;  %1043 = vmatprep.subr.bf16.mxu1 %v3940_v14  ;;  %v3948_v21 = vcombine.high %v207_v16, %v211_v17  ;;  %v214_v22 = vld [vmem:[#allocation9 + $0xc0] sm:$0xff]  ;;  %v215_v24 = vld [vmem:[#allocation9 + $0xc8] sm:$0xff]  ;;  %v3945_v26 = vcombine.low %v206_v13, %v210_v15 }
  0x97   :  { %v218_v23 = vld [vmem:[#allocation9 + $0xe0] sm:$0xff]  ;;  %v219_v25 = vld [vmem:[#allocation9 + $0xe8] sm:$0xff]  ;;  %v3947_v27 = vcombine.low %v207_v16, %v211_v17 }
  0x98   :  { %v3954_v28 = vcombine.high %v214_v22, %v218_v23  ;;  %v3956_v29 = vcombine.high %v215_v24, %v219_v25  ;;  %v222_v30 = vld [vmem:[#allocation9 + $0x100] sm:$0xff]  ;;  %v223_v32 = vld [vmem:[#allocation9 + $0x108] sm:$0xff]  ;;  %v3953_v34 = vcombine.low %v214_v22, %v218_v23  ;;  %v3955_v35 = vcombine.low %v215_v24, %v219_v25 }
  0x99   :  { %1003 = vmatpush1.bf16.msra.mxu0 %v3937_v18  ;;  %1044 = vmatpush1.bf16.msra.mxu1 %v3939_v19  ;;  %v226_v31 = vld [vmem:[#allocation9 + $0x120] sm:$0xff]  ;;  %v227_v33 = vld [vmem:[#allocation9 + $0x128] sm:$0xff] }
  0x9a   :  { %1004 = vmatprep.subr.bf16.mxu0 %v3946_v20  ;;  %1045 = vmatprep.subr.bf16.mxu1 %v3948_v21  ;;  %v3962_v36 = vcombine.high %v222_v30, %v226_v31  ;;  %v3964_v37 = vcombine.high %v223_v32, %v227_v33  ;;  %v230_v38 = vld [vmem:[#allocation9 + $0x140] sm:$0xff]  ;;  %v231_v40 = vld [vmem:[#allocation9 + $0x148] sm:$0xff]  ;;  %v3961_v42 = vcombine.low %v222_v30, %v226_v31 }
  0x9b   :  { %v234_v39 = vld [vmem:[#allocation9 + $0x160] sm:$0xff]  ;;  %v235_v41 = vld [vmem:[#allocation9 + $0x168] sm:$0xff]  ;;  %v3963_v43 = vcombine.low %v223_v32, %v227_v33 }
  0x9c   :  { %v3970_v44 = vcombine.high %v230_v38, %v234_v39  ;;  %v3972_v45 = vcombine.high %v231_v40, %v235_v41  ;;  %v238_v46 = vld [vmem:[#allocation9 + $0x180] sm:$0xff]  ;;  %v239_v48 = vld [vmem:[#allocation9 + $0x188] sm:$0xff]  ;;  %v3969_v50 = vcombine.low %v230_v38, %v234_v39  ;;  %v3971_v51 = vcombine.low %v231_v40, %v235_v41 }
  0x9d   :  { %1005 = vmatpush1.bf16.msra.mxu0 %v3945_v26  ;;  %1046 = vmatpush1.bf16.msra.mxu1 %v3947_v27  ;;  %v242_v47 = vld [vmem:[#allocation9 + $0x1a0] sm:$0xff]  ;;  %v243_v49 = vld [vmem:[#allocation9 + $0x1a8] sm:$0xff] }
  0x9e   :  { %1006 = vmatprep.subr.bf16.mxu0 %v3954_v28  ;;  %1047 = vmatprep.subr.bf16.mxu1 %v3956_v29  ;;  %v3978_v52 = vcombine.high %v238_v46, %v242_v47  ;;  %v3980_v54 = vcombine.high %v239_v48, %v243_v49  ;;  %v246_v55 = vld [vmem:[#allocation9 + $0x1c0] sm:$0xff]  ;;  %v247_v58 = vld [vmem:[#allocation9 + $0x1c8] sm:$0xff]  ;;  %v3977_v60 = vcombine.low %v238_v46, %v242_v47 }
  0x9f   :  { %v250_v56 = vld [vmem:[#allocation9 + $0x1e0] sm:$0xff]  ;;  %v251_v59 = vld [vmem:[#allocation9 + $0x1e8] sm:$0xff]  ;;  %v3979_v61 = vcombine.low %v239_v48, %v243_v49 }
  0xa0   :  { %v3986_v62 = vcombine.high %v246_v55, %v250_v56  ;;  %v3988_v63 = vcombine.high %v247_v58, %v251_v59  ;;  %v254_v0 = vld [vmem:[#allocation9 + $0x200] sm:$0xff]  ;;  %v255_v2 = vld [vmem:[#allocation9 + $0x208] sm:$0xff]  ;;  %v3985_v4 = vcombine.low %v246_v55, %v250_v56  ;;  %v3987_v5 = vcombine.low %v247_v58, %v251_v59 }
  0xa1   :  { %1007 = vmatpush1.bf16.msra.mxu0 %v3953_v34  ;;  %1048 = vmatpush1.bf16.msra.mxu1 %v3955_v35  ;;  %v258_v1 = vld [vmem:[#allocation9 + $0x220] sm:$0xff]  ;;  %v259_v3 = vld [vmem:[#allocation9 + $0x228] sm:$0xff] }
  0xa2   :  { %1008 = vmatprep.subr.bf16.mxu0 %v3962_v36  ;;  %1049 = vmatprep.subr.bf16.mxu1 %v3964_v37  ;;  %v3994_v6 = vcombine.high %v254_v0, %v258_v1  ;;  %v3996_v7 = vcombine.high %v255_v2, %v259_v3  ;;  %v262_v8 = vld [vmem:[#allocation9 + $0x240] sm:$0xff]  ;;  %v263_v10 = vld [vmem:[#allocation9 + $0x248] sm:$0xff]  ;;  %v3993_v12 = vcombine.low %v254_v0, %v258_v1  ;;  %v192_v1 = vld [vmem:[#allocation9 + $0x10] sm:$0xff] }
  0xa3   :  { %v266_v9 = vld [vmem:[#allocation9 + $0x260] sm:$0xff]  ;;  %v267_v11 = vld [vmem:[#allocation9 + $0x268] sm:$0xff]  ;;  %v3995_v13 = vcombine.low %v255_v2, %v259_v3  ;;  %v196_v2 = vld [vmem:[#allocation9 + $0x30] sm:$0xff] }
  0xa4   :  { %v4002_v14 = vcombine.high %v262_v8, %v266_v9  ;;  %v4004_v15 = vcombine.high %v263_v10, %v267_v11  ;;  %v270_v16 = vld [vmem:[#allocation9 + $0x280] sm:$0xff]  ;;  %v271_v18 = vld [vmem:[#allocation9 + $0x288] sm:$0xff]  ;;  %v4001_v20 = vcombine.low %v262_v8, %v266_v9  ;;  %v4003_v21 = vcombine.low %v263_v10, %v267_v11  ;;  %v193_v3 = vld [vmem:[#allocation9 + $0x18] sm:$0xff] }
  0xa5   :  { %1009 = vmatpush1.bf16.msra.mxu0 %v3961_v42  ;;  %1050 = vmatpush1.bf16.msra.mxu1 %v3963_v43  ;;  %v274_v17 = vld [vmem:[#allocation9 + $0x2a0] sm:$0xff]  ;;  %v275_v19 = vld [vmem:[#allocation9 + $0x2a8] sm:$0xff]  ;;  %v3934_v8 = vcombine.high %v192_v1, %v196_v2  ;;  %v200_v10 = vld [vmem:[#allocation9 + $0x50] sm:$0xff] }
  0xa6   :  { %1010 = vmatprep.subr.bf16.mxu0 %v3970_v44  ;;  %1051 = vmatprep.subr.bf16.mxu1 %v3972_v45  ;;  %v4010_v22 = vcombine.high %v270_v16, %v274_v17  ;;  %v4012_v23 = vcombine.high %v271_v18, %v275_v19  ;;  %v278_v24 = vld [vmem:[#allocation9 + $0x2c0] sm:$0xff]  ;;  %v279_v26 = vld [vmem:[#allocation9 + $0x2c8] sm:$0xff]  ;;  %v4009_v28 = vcombine.low %v270_v16, %v274_v17  ;;  %v204_v11 = vld [vmem:[#allocation9 + $0x70] sm:$0xff] }
  0xa7   :  { %v282_v25 = vld [vmem:[#allocation9 + $0x2e0] sm:$0xff]  ;;  %v283_v27 = vld [vmem:[#allocation9 + $0x2e8] sm:$0xff]  ;;  %v4011_v29 = vcombine.low %v271_v18, %v275_v19  ;;  %v3942_v17 = vcombine.high %v200_v10, %v204_v11  ;;  %v208_v19 = vld [vmem:[#allocation9 + $0x90] sm:$0xff] }
  0xa8   :  { %v4018_v30 = vcombine.high %v278_v24, %v282_v25  ;;  %v4020_v31 = vcombine.high %v279_v26, %v283_v27  ;;  %v286_v32 = vld [vmem:[#allocation9 + $0x300] sm:$0xff]  ;;  %v287_v34 = vld [vmem:[#allocation9 + $0x308] sm:$0xff]  ;;  %v4017_v36 = vcombine.low %v278_v24, %v282_v25  ;;  %v4019_v37 = vcombine.low %v279_v26, %v283_v27  ;;  %v216_v27 = vld [vmem:[#allocation9 + $0xd0] sm:$0xff] }
  0xa9   :  { %1011 = vmatpush1.bf16.msra.mxu0 %v3969_v50  ;;  %1052 = vmatpush1.bf16.msra.mxu1 %v3971_v51  ;;  %v290_v33 = vld [vmem:[#allocation9 + $0x320] sm:$0xff]  ;;  %v291_v35 = vld [vmem:[#allocation9 + $0x328] sm:$0xff] }
  0xaa   :  { %1012 = vmatprep.subr.bf16.mxu0 %v3978_v52  ;;  %1053 = vmatprep.subr.bf16.mxu1 %v3980_v54  ;;  %v4026_v38 = vcombine.high %v286_v32, %v290_v33  ;;  %v4028_v39 = vcombine.high %v287_v34, %v291_v35  ;;  %v294_v40 = vld [vmem:[#allocation9 + $0x340] sm:$0xff]  ;;  %v295_v42 = vld [vmem:[#allocation9 + $0x348] sm:$0xff]  ;;  %v4025_v44 = vcombine.low %v286_v32, %v290_v33 }
  0xab   :  { %v298_v41 = vld [vmem:[#allocation9 + $0x360] sm:$0xff]  ;;  %v299_v43 = vld [vmem:[#allocation9 + $0x368] sm:$0xff]  ;;  %v4027_v45 = vcombine.low %v287_v34, %v291_v35  ;;  %v224_v35 = vld [vmem:[#allocation9 + $0x110] sm:$0xff] }
  0xac   :  { %v4034_v46 = vcombine.high %v294_v40, %v298_v41  ;;  %v4036_v47 = vcombine.high %v295_v42, %v299_v43  ;;  %v302_v48 = vld [vmem:[#allocation9 + $0x380] sm:$0xff]  ;;  %v303_v50 = vld [vmem:[#allocation9 + $0x388] sm:$0xff]  ;;  %v4033_v52 = vcombine.low %v294_v40, %v298_v41  ;;  %v4035_v53 = vcombine.low %v295_v42, %v299_v43  ;;  %v232_v42 = vld [vmem:[#allocation9 + $0x150] sm:$0xff] }
  0xad   :  { %1013 = vmatpush1.bf16.msra.mxu0 %v3977_v60  ;;  %1054 = vmatpush1.bf16.msra.mxu1 %v3979_v61  ;;  %v306_v49 = vld [vmem:[#allocation9 + $0x3a0] sm:$0xff]  ;;  %v307_v51 = vld [vmem:[#allocation9 + $0x3a8] sm:$0xff]  ;;  %v236_v43 = vld [vmem:[#allocation9 + $0x170] sm:$0xff] }
  0xae   :  { %1014 = vmatprep.subr.bf16.mxu0 %v3986_v62  ;;  %1055 = vmatprep.subr.bf16.mxu1 %v3988_v63  ;;  %v4042_v54 = vcombine.high %v302_v48, %v306_v49  ;;  %v4044_v55 = vcombine.high %v303_v50, %v307_v51  ;;  %v310_v56 = vld [vmem:[#allocation9 + $0x3c0] sm:$0xff]  ;;  %v311_v59 = vld [vmem:[#allocation9 + $0x3c8] sm:$0xff]  ;;  %v4041_v61 = vcombine.low %v302_v48, %v306_v49 }
  0xaf   :  { %v314_v58 = vld [vmem:[#allocation9 + $0x3e0] sm:$0xff]  ;;  %v315_v60 = vld [vmem:[#allocation9 + $0x3e8] sm:$0xff]  ;;  %v4043_v62 = vcombine.low %v303_v50, %v307_v51  ;;  %v3974_v48 = vcombine.high %v232_v42, %v236_v43  ;;  %v240_v50 = vld [vmem:[#allocation9 + $0x190] sm:$0xff] }
  0xb0   :  { %v4050_v63 = vcombine.high %v310_v56, %v314_v58  ;;  %v4052_v0 = vcombine.high %v311_v59, %v315_v60  ;;  %v244_v51 = vld [vmem:[#allocation9 + $0x1b0] sm:$0xff] }
  0xb1   :  { %1015 = vmatpush1.bf16.msra.mxu0 %v3985_v4  ;;  %1056 = vmatpush1.bf16.msra.mxu1 %v3987_v5  ;;  %v197_v4 = vld [vmem:[#allocation9 + $0x38] sm:$0xff]  ;;  %v4049_v5 = vcombine.low %v310_v56, %v314_v58  ;;  %v3982_v56 = vcombine.high %v240_v50, %v244_v51 }
  0xb2   :  { %1016 = vmatprep.subr.bf16.mxu0 %v3994_v6  ;;  %1057 = vmatprep.subr.bf16.mxu1 %v3996_v7  ;;  %v186_v6 = vld [vmem:[#allocation6] sm:$0xff]  ;;  %v4051_v7 = vcombine.low %v311_v59, %v315_v60  ;;  %v3936_v9 = vcombine.high %v193_v3, %v197_v4  ;;  %v3935_v16 = vcombine.low %v193_v3, %v197_v4 }
  0xb3   :  { %v248_v59 = vld [vmem:[#allocation9 + $0x1d0] sm:$0xff] }
  0xb4   :  { %v252_v60 = vld [vmem:[#allocation9 + $0x1f0] sm:$0xff] }
  0xb5   :  { %1017 = vmatpush1.bf16.msra.mxu0 %v3993_v12  ;;  %1058 = vmatpush1.bf16.msra.mxu1 %v3995_v13  ;;  %v4647_v12 = vpack.c.bf16 %v186_v6, %v186_v6  ;;  %v201_v13 = vld [vmem:[#allocation9 + $0x58] sm:$0xff]  ;;  %v256_v3 = vld [vmem:[#allocation9 + $0x210] sm:$0xff] }
  0xb6   :  { %1018 = vmatprep.subr.bf16.mxu0 %v4002_v14  ;;  %1059 = vmatprep.subr.bf16.mxu1 %v4004_v15  ;;  %v205_v14 = vld [vmem:[#allocation9 + $0x78] sm:$0xff]  ;;  %v3933_v15 = vcombine.low %v192_v1, %v196_v2  ;;  %v3990_v1 = vcombine.high %v248_v59, %v252_v60  ;;  %v260_v4 = vld [vmem:[#allocation9 + $0x230] sm:$0xff] }
  0xb7   :  { %v3944_v18 = vcombine.high %v201_v13, %v205_v14  ;;  %v3943_v24 = vcombine.low %v201_v13, %v205_v14  ;;  %v261_v6 = vld [vmem:[#allocation9 + $0x238] sm:$0xff]  ;;  %v268_v13 = vld [vmem:[#allocation9 + $0x270] sm:$0xff] }
  0xb8   :  { %v265_v14 = vld [vmem:[#allocation9 + $0x258] sm:$0xff] }
  0xb9   :  { %1019 = vmatpush1.bf16.msra.mxu0 %v4001_v20  ;;  %1060 = vmatpush1.bf16.msra.mxu1 %v4003_v21  ;;  %v212_v20 = vld [vmem:[#allocation9 + $0xb0] sm:$0xff]  ;;  %v209_v21 = vld [vmem:[#allocation9 + $0x98] sm:$0xff] }
  0xba   :  { %1020 = vmatprep.subr.bf16.mxu0 %v4010_v22  ;;  %1061 = vmatprep.subr.bf16.mxu1 %v4012_v23  ;;  %v213_v22 = vld [vmem:[#allocation9 + $0xb8] sm:$0xff]  ;;  %v3941_v23 = vcombine.low %v200_v10, %v204_v11  ;;  %v3950_v25 = vcombine.high %v208_v19, %v212_v20  ;;  %v264_v11 = vld [vmem:[#allocation9 + $0x250] sm:$0xff] }
  0xbb   :  { %v3952_v26 = vcombine.high %v209_v21, %v213_v22  ;;  %v3951_v32 = vcombine.low %v209_v21, %v213_v22  ;;  %v276_v21 = vld [vmem:[#allocation9 + $0x2b0] sm:$0xff]  ;;  %v273_v22 = vld [vmem:[#allocation9 + $0x298] sm:$0xff] }
  0xbd   :  { %1021 = vmatpush1.bf16.msra.mxu0 %v4009_v28  ;;  %1062 = vmatpush1.bf16.msra.mxu1 %v4011_v29  ;;  %v220_v28 = vld [vmem:[#allocation9 + $0xf0] sm:$0xff]  ;;  %v217_v29 = vld [vmem:[#allocation9 + $0xd8] sm:$0xff] }
  0xbe   :  { %1022 = vmatprep.subr.bf16.mxu0 %v4018_v30  ;;  %1063 = vmatprep.subr.bf16.mxu1 %v4020_v31  ;;  %v221_v30 = vld [vmem:[#allocation9 + $0xf8] sm:$0xff]  ;;  %v3949_v31 = vcombine.low %v208_v19, %v212_v20  ;;  %v3958_v33 = vcombine.high %v216_v27, %v220_v28  ;;  %v272_v20 = vld [vmem:[#allocation9 + $0x290] sm:$0xff] }
  0xbf   :  { %v3960_v34 = vcombine.high %v217_v29, %v221_v30  ;;  %v3959_v40 = vcombine.low %v217_v29, %v221_v30  ;;  %v284_v29 = vld [vmem:[#allocation9 + $0x2f0] sm:$0xff]  ;;  %v281_v30 = vld [vmem:[#allocation9 + $0x2d8] sm:$0xff] }
  0xc1   :  { %1023 = vmatpush1.bf16.msra.mxu0 %v4017_v36  ;;  %1064 = vmatpush1.bf16.msra.mxu1 %v4019_v37  ;;  %v228_v36 = vld [vmem:[#allocation9 + $0x130] sm:$0xff]  ;;  %v225_v37 = vld [vmem:[#allocation9 + $0x118] sm:$0xff] }
  0xc2   :  { %1024 = vmatprep.subr.bf16.mxu0 %v4026_v38  ;;  %1065 = vmatprep.subr.bf16.mxu1 %v4028_v39  ;;  %v229_v38 = vld [vmem:[#allocation9 + $0x138] sm:$0xff]  ;;  %v3957_v39 = vcombine.low %v216_v27, %v220_v28  ;;  %v3966_v41 = vcombine.high %v224_v35, %v228_v36  ;;  %v280_v28 = vld [vmem:[#allocation9 + $0x2d0] sm:$0xff] }
  0xc5   :  { %1025 = vmatpush1.bf16.msra.mxu0 %v4025_v44  ;;  %1066 = vmatpush1.bf16.msra.mxu1 %v4027_v45  ;;  %v233_v44 = vld [vmem:[#allocation9 + $0x158] sm:$0xff] }
  0xc6   :  { %1026 = vmatprep.subr.bf16.mxu0 %v4034_v46  ;;  %1067 = vmatprep.subr.bf16.mxu1 %v4036_v47  ;;  %v237_v45 = vld [vmem:[#allocation9 + $0x178] sm:$0xff]  ;;  %v3965_v46 = vcombine.low %v224_v35, %v228_v36  ;;  %v3967_v47 = vcombine.low %v225_v37, %v229_v38  ;;  %v288_v36 = vld [vmem:[#allocation9 + $0x310] sm:$0xff] }
  0xc7   :  { %v3976_v49 = vcombine.high %v233_v44, %v237_v45 }
  0xc9   :  { %1027 = vmatpush1.bf16.msra.mxu0 %v4033_v52  ;;  %1068 = vmatpush1.bf16.msra.mxu1 %v4035_v53  ;;  %v241_v52 = vld [vmem:[#allocation9 + $0x198] sm:$0xff] }
  0xca   :  { %1028 = vmatprep.subr.bf16.mxu0 %v4042_v54  ;;  %1069 = vmatprep.subr.bf16.mxu1 %v4044_v55  ;;  %v245_v53 = vld [vmem:[#allocation9 + $0x1b8] sm:$0xff]  ;;  %v3973_v54 = vcombine.low %v232_v42, %v236_v43  ;;  %v3975_v55 = vcombine.low %v233_v44, %v237_v45  ;;  %v296_v43 = vld [vmem:[#allocation9 + $0x350] sm:$0xff] }
  0xcb   :  { %v3984_v58 = vcombine.high %v241_v52, %v245_v53  ;;  %v300_v44 = vld [vmem:[#allocation9 + $0x370] sm:$0xff]  ;;  %v297_v45 = vld [vmem:[#allocation9 + $0x358] sm:$0xff] }
  0xcd   :  { %1029 = vmatpush1.bf16.msra.mxu0 %v4041_v61  ;;  %1070 = vmatpush1.bf16.msra.mxu1 %v4043_v62  ;;  %v249_v61 = vld [vmem:[#allocation9 + $0x1d8] sm:$0xff] }
  0xce   :  { %1030 = vmatprep.subr.bf16.mxu0 %v4050_v63  ;;  %1071 = vmatprep.subr.bf16.mxu1 %v4052_v0  ;;  %v253_v62 = vld [vmem:[#allocation9 + $0x1f8] sm:$0xff]  ;;  %v3981_v63 = vcombine.low %v240_v50, %v244_v51  ;;  %v3983_v0 = vcombine.low %v241_v52, %v245_v53  ;;  %v304_v51 = vld [vmem:[#allocation9 + $0x390] sm:$0xff] }
  0xcf   :  { %v3992_v2 = vcombine.high %v249_v61, %v253_v62  ;;  %v308_v52 = vld [vmem:[#allocation9 + $0x3b0] sm:$0xff]  ;;  %v305_v53 = vld [vmem:[#allocation9 + $0x398] sm:$0xff] }
  0xd1   :  { %1031 = vmatpush1.bf16.msra.mxu0 %v4049_v5  ;;  %1072 = vmatpush1.bf16.msra.mxu1 %v4051_v7  ;;  %v257_v5 = vld [vmem:[#allocation9 + $0x218] sm:$0xff]  ;;  %v3989_v7 = vcombine.low %v248_v59, %v252_v60  ;;  %v312_v60 = vld [vmem:[#allocation9 + $0x3d0] sm:$0xff] }
  0xd2   :  { %1082 = vmatprep.subr.bf16.mxu0 %v3934_v8  ;;  %1123 = vmatprep.subr.bf16.mxu1 %v3936_v9  ;;  %v3991_v8 = vcombine.low %v249_v61, %v253_v62  ;;  %v3998_v9 = vcombine.high %v256_v3, %v260_v4  ;;  %v4000_v10 = vcombine.high %v257_v5, %v261_v6  ;;  %v316_v61 = vld [vmem:[#allocation9 + $0x3f0] sm:$0xff]  ;;  %v313_v62 = vld [vmem:[#allocation9 + $0x3d8] sm:$0xff] }
  0xd4   :  { %1033 = vmatmul.mubr.bf16.vlgmr.msra.gmra.mrb[0].mxu0 %v4647_v12  ;;  %1074 = vmatmul.mubr.bf16.vlgmr.msra.gmra.mrb[0].mxu1 %v4647_v12 }
  0xd5   :  { %1083 = vmatpush1.bf16.msra.mxu0 %v3933_v15  ;;  %1124 = vmatpush1.bf16.msra.mxu1 %v3935_v16  ;;  %v269_v15 = vld [vmem:[#allocation9 + $0x278] sm:$0xff]  ;;  %v3997_v16 = vcombine.low %v256_v3, %v260_v4  ;;  %v4053_v4 = vcombine.low %v312_v60, %v316_v61 }
  0xd6   :  { %1084 = vmatprep.subr.bf16.mxu0 %v3942_v17  ;;  %1125 = vmatprep.subr.bf16.mxu1 %v3944_v18  ;;  %v3999_v17 = vcombine.low %v257_v5, %v261_v6  ;;  %v4006_v18 = vcombine.high %v264_v11, %v268_v13  ;;  %v4008_v19 = vcombine.high %v265_v14, %v269_v15  ;;  %v320_v6 = vlaneseq }
  0xd7   :  { %1114 = vmatprep.mubr.bf16.mxu0 %v4643_v57  ;;  %1155 = vmatprep.mubr.bf16.mxu1 %v4643_v57  ;;  %v3968_v57 = vcombine.high %v225_v37, %v229_v38  ;;  %v292_v37 = vld [vmem:[#allocation9 + $0x330] sm:$0xff]  ;;  %v289_v38 = vld [vmem:[#allocation9 + $0x318] sm:$0xff] }
  0xd9   :  { %1085 = vmatpush1.bf16.msra.mxu0 %v3941_v23  ;;  %1126 = vmatpush1.bf16.msra.mxu1 %v3943_v24  ;;  %v277_v23 = vld [vmem:[#allocation9 + $0x2b8] sm:$0xff]  ;;  %v4005_v24 = vcombine.low %v264_v11, %v268_v13 }
  0xda   :  { %1086 = vmatprep.subr.bf16.mxu0 %v3950_v25  ;;  %1127 = vmatprep.subr.bf16.mxu1 %v3952_v26  ;;  %v4007_v25 = vcombine.low %v265_v14, %v269_v15  ;;  %v4014_v26 = vcombine.high %v272_v20, %v276_v21  ;;  %v4016_v27 = vcombine.high %v273_v22, %v277_v23 }
  0xdd   :  { %1087 = vmatpush1.bf16.msra.mxu0 %v3949_v31  ;;  %1128 = vmatpush1.bf16.msra.mxu1 %v3951_v32  ;;  %v285_v31 = vld [vmem:[#allocation9 + $0x2f8] sm:$0xff]  ;;  %v4013_v32 = vcombine.low %v272_v20, %v276_v21 }
  0xde   :  { %1088 = vmatprep.subr.bf16.mxu0 %v3958_v33  ;;  %1129 = vmatprep.subr.bf16.mxu1 %v3960_v34  ;;  %v4015_v33 = vcombine.low %v273_v22, %v277_v23  ;;  %v4022_v34 = vcombine.high %v280_v28, %v284_v29  ;;  %v4024_v35 = vcombine.high %v281_v30, %v285_v31 }
  0xe1   :  { %1089 = vmatpush1.bf16.msra.mxu0 %v3957_v39  ;;  %1130 = vmatpush1.bf16.msra.mxu1 %v3959_v40  ;;  %v293_v39 = vld [vmem:[#allocation9 + $0x338] sm:$0xff]  ;;  %v4021_v40 = vcombine.low %v280_v28, %v284_v29 }
  0xe2   :  { %1090 = vmatprep.subr.bf16.mxu0 %v3966_v41  ;;  %1131 = vmatprep.subr.bf16.mxu1 %v3968_v57  ;;  %v4023_v41 = vcombine.low %v281_v30, %v285_v31  ;;  %v4030_v57 = vcombine.high %v288_v36, %v292_v37  ;;  %v4032_v42 = vcombine.high %v289_v38, %v293_v39 }
  0xe5   :  { %1091 = vmatpush1.bf16.msra.mxu0 %v3965_v46  ;;  %1132 = vmatpush1.bf16.msra.mxu1 %v3967_v47  ;;  %v301_v46 = vld [vmem:[#allocation9 + $0x378] sm:$0xff]  ;;  %v4029_v47 = vcombine.low %v288_v36, %v292_v37 }
  0xe6   :  { %1092 = vmatprep.subr.bf16.mxu0 %v3974_v48  ;;  %1133 = vmatprep.subr.bf16.mxu1 %v3976_v49  ;;  %v4031_v48 = vcombine.low %v289_v38, %v293_v39  ;;  %v4038_v49 = vcombine.high %v296_v43, %v300_v44  ;;  %v4040_v50 = vcombine.high %v297_v45, %v301_v46 }
  0xe9   :  { %1093 = vmatpush1.bf16.msra.mxu0 %v3973_v54  ;;  %1134 = vmatpush1.bf16.msra.mxu1 %v3975_v55  ;;  %v309_v54 = vld [vmem:[#allocation9 + $0x3b8] sm:$0xff]  ;;  %v4037_v55 = vcombine.low %v296_v43, %v300_v44 }
  0xea   :  { %1094 = vmatprep.subr.bf16.mxu0 %v3982_v56  ;;  %1135 = vmatprep.subr.bf16.mxu1 %v3984_v58  ;;  %v4039_v56 = vcombine.low %v297_v45, %v301_v46  ;;  %v4046_v58 = vcombine.high %v304_v51, %v308_v52  ;;  %v4048_v59 = vcombine.high %v305_v53, %v309_v54 }
  0xed   :  { %1095 = vmatpush1.bf16.msra.mxu0 %v3981_v63  ;;  %1136 = vmatpush1.bf16.msra.mxu1 %v3983_v0  ;;  %v317_v63 = vld [vmem:[#allocation9 + $0x3f8] sm:$0xff]  ;;  %v4045_v0 = vcombine.low %v304_v51, %v308_v52 }
  0xee   :  { %1096 = vmatprep.subr.bf16.mxu0 %v3990_v1  ;;  %1137 = vmatprep.subr.bf16.mxu1 %v3992_v2  ;;  %v4047_v1 = vcombine.low %v305_v53, %v309_v54  ;;  %v4054_v2 = vcombine.high %v312_v60, %v316_v61  ;;  %v4056_v3 = vcombine.high %v313_v62, %v317_v63 }
  0xef   :  { %v4055_v5 = vcombine.low %v313_v62, %v317_v63 }
  0xf1   :  { %1097 = vmatpush1.bf16.msra.mxu0 %v3989_v7  ;;  %1138 = vmatpush1.bf16.msra.mxu1 %v3991_v8  ;;  %v321_v7 = vshrl.u32 %v320_v6, 7 }
  0xf2   :  { %1098 = vmatprep.subr.bf16.mxu0 %v3998_v9  ;;  %1139 = vmatprep.subr.bf16.mxu1 %v4000_v10  ;;  %v318_v9 = vld [vmem:[#allocation11] sm:$0xff] }
  0xf3   :  { %v4655_v8 = vsub.s32 0, %v321_v7  ;;  %v4657_v10 = vsub.s32 2, %v321_v7  ;;  %v4659_v11 = vsub.s32 1, %v321_v7  ;;  %v4661_v13 = vsub.s32 3, %v321_v7 }
  0xf4   :  { %v4675_v37 = vsub.s32 4, %v321_v7  ;;  %v4677_v38 = vsub.s32 6, %v321_v7  ;;  %v4679_v39 = vsub.s32 5, %v321_v7 }
  0xf5   :  { %1099 = vmatpush1.bf16.msra.mxu0 %v3997_v16  ;;  %1140 = vmatpush1.bf16.msra.mxu1 %v3999_v17  ;;  %v323_v14 = vrot.slane %v318_v9, %v4655_v8  ;;  %v331_v15 = vrot.slane %v318_v9, %v4657_v10  ;;  %v327_v16 = vrot.slane %v318_v9, %v4659_v11 }
  0xf6   :  { %1100 = vmatprep.subr.bf16.mxu0 %v4006_v18  ;;  %1141 = vmatprep.subr.bf16.mxu1 %v4008_v19  ;;  %v335_v17 = vrot.slane %v318_v9, %v4661_v13 }
  0xf9   :  { %1101 = vmatpush1.bf16.msra.mxu0 %v4005_v24  ;;  %1142 = vmatpush1.bf16.msra.mxu1 %v4007_v25 }
  0xfa   :  { %1102 = vmatprep.subr.bf16.mxu0 %v4014_v26  ;;  %1143 = vmatprep.subr.bf16.mxu1 %v4016_v27 }
  0xfd   :  { %1103 = vmatpush1.bf16.msra.mxu0 %v4013_v32  ;;  %1144 = vmatpush1.bf16.msra.mxu1 %v4015_v33 }
  0xfe   :  { %1104 = vmatprep.subr.bf16.mxu0 %v4022_v34  ;;  %1145 = vmatprep.subr.bf16.mxu1 %v4024_v35 }
 0x101   :  { %1105 = vmatpush1.bf16.msra.mxu0 %v4021_v40  ;;  %1146 = vmatpush1.bf16.msra.mxu1 %v4023_v41  ;;  %v4681_v40 = vsub.s32 7, %v321_v7  ;;  %v339_v41 = vrot.slane %v318_v9, %v4675_v37 }
 0x102   :  { %1106 = vmatprep.subr.bf16.mxu0 %v4030_v57  ;;  %1147 = vmatprep.subr.bf16.mxu1 %v4032_v42  ;;  %v347_v57 = vrot.slane %v318_v9, %v4677_v38  ;;  %v343_v42 = vrot.slane %v318_v9, %v4679_v39 }
 0x103   :  { %v351_v43 = vrot.slane %v318_v9, %v4681_v40 }
 0x105   :  { %1107 = vmatpush1.bf16.msra.mxu0 %v4029_v47  ;;  %1148 = vmatpush1.bf16.msra.mxu1 %v4031_v48 }
 0x106   :  { %1108 = vmatprep.subr.bf16.mxu0 %v4038_v49  ;;  %1149 = vmatprep.subr.bf16.mxu1 %v4040_v50 }
 0x109   :  { %1109 = vmatpush1.bf16.msra.mxu0 %v4037_v55  ;;  %1150 = vmatpush1.bf16.msra.mxu1 %v4039_v56 }
 0x10a   :  { %1110 = vmatprep.subr.bf16.mxu0 %v4046_v58  ;;  %1151 = vmatprep.subr.bf16.mxu1 %v4048_v59 }
 0x10d   :  { %1111 = vmatpush1.bf16.msra.mxu0 %v4045_v0  ;;  %1152 = vmatpush1.bf16.msra.mxu1 %v4047_v1 }
 0x10e   :  { %1112 = vmatprep.subr.bf16.mxu0 %v4054_v2  ;;  %1153 = vmatprep.subr.bf16.mxu1 %v4056_v3 }
 0x111   :  { %1113 = vmatpush1.bf16.msra.mxu0 %v4053_v4  ;;  %1154 = vmatpush1.bf16.msra.mxu1 %v4055_v5 }
 0x114   :  { %1115 = vmatmul.mubr.bf16.vlgmr.msra.gmra.mrb[4].mxu0 %v4647_v12  ;;  %1156 = vmatmul.mubr.bf16.vlgmr.msra.gmra.mrb[4].mxu1 %v4647_v12 }
 0x1a7   :  { %v1034_v12 = vpop.f32.mrb[0].mxu0  ;;  %v1075_v19 = vpop.f32.mrb[0].mxu1 }
 0x1a8   :  { %v1035_v18 = vadd.f32 %v1034_v12, %v323_v14  ;;  %v1036_v20 = vpop.f32.mrb[1].mxu0  ;;  %v1076_v21 = vadd.f32 %v1075_v19, %v331_v15  ;;  %v1077_v23 = vpop.f32.mrb[1].mxu1 }
 0x1a9   :  { %v1037_v22 = vadd.f32 %v1036_v20, %v327_v16  ;;  %v1038_v24 = vpop.f32.mrb[2].mxu0  ;;  %v1078_v26 = vadd.f32 %v1077_v23, %v335_v17  ;;  %v1079_v27 = vpop.f32.mrb[2].mxu1 }
 0x1aa   :  { %v1164_v25 = vmax.f32 %v1035_v18, 0.0  ;;  %v1039_v28 = vpop.f32.mrb[3].mxu0  ;;  %v1166_v29 = vmax.f32 %v1076_v21, 0.0  ;;  %v1080_v31 = vpop.f32.mrb[3].mxu1 }
 0x1ab   :  { %v1165_v30 = vmax.f32 %v1037_v22, 0.0  ;;  %v1167_v33 = vmax.f32 %v1078_v26, 0.0 }
 0x1ac   :  { %v4667_v32 = vpack.c.bf16 %v1164_v25, %v1164_v25  ;;  %v4669_v34 = vpack.c.bf16 %v1166_v29, %v1166_v29 }
 0x1ad   :  { %v4671_v35 = vpack.c.bf16 %v1165_v30, %v1165_v30  ;;  %v4673_v36 = vpack.c.bf16 %v1167_v33, %v1167_v33 }
 0x1e7   :  { %v1116_v44 = vpop.f32.mrb[4].mxu0  ;;  %v1157_v46 = vpop.f32.mrb[4].mxu1 }
 0x1e8   :  { %v1117_v45 = vadd.f32 %v1116_v44, %v339_v41  ;;  %v1118_v47 = vpop.f32.mrb[5].mxu0  ;;  %v1158_v48 = vadd.f32 %v1157_v46, %v347_v57  ;;  %v1159_v50 = vpop.f32.mrb[5].mxu1 }
 0x1e9   :  { %v1119_v49 = vadd.f32 %v1118_v47, %v343_v42  ;;  %v1120_v51 = vpop.f32.mrb[6].mxu0  ;;  %v1160_v53 = vadd.f32 %v1159_v50, %v351_v43  ;;  %v1161_v54 = vpop.f32.mrb[6].mxu1 }
 0x1ea   :  { %v1168_v52 = vmax.f32 %v1117_v45, 0.0  ;;  %v1121_v55 = vpop.f32.mrb[7].mxu0  ;;  %v1170_v56 = vmax.f32 %v1158_v48, 0.0  ;;  %v1162_v59 = vpop.f32.mrb[7].mxu1 }
 0x1eb   :  { %v1169_v58 = vmax.f32 %v1119_v49, 0.0  ;;  %v1171_v61 = vmax.f32 %v1160_v53, 0.0 }
 0x1ec   :  { %v4687_v60 = vpack.c.bf16 %v1168_v52, %v1168_v52  ;;  %v4689_v62 = vpack.c.bf16 %v1170_v56, %v1170_v56 }
 0x1ed   :  { %v4691_v63 = vpack.c.bf16 %v1169_v58, %v1169_v58  ;;  %v4693_v0 = vpack.c.bf16 %v1171_v61, %v1171_v61 }
 0x1ee   :  { %4468 = dma.done.wait [#allocation5], 65536 }
 0x1ef   :  { %4469 = vsyncadd [#allocation5], 4294901760  ;;  %1773 = vmatprep.mubr.bf16.mxu0 %v4671_v35  ;;  %1937 = vmatprep.mubr.bf16.mxu1 %v4671_v35  ;;  %v1188_v1 = vld [vmem:[#allocation2 + $0x8] sm:$0xff]  ;;  %v1190_v2 = vld [vmem:[#allocation2 + $0x18] sm:$0xff] }
 0x1f0   :  { %v1187_v3 = vld [vmem:[#allocation2] sm:$0xff]  ;;  %1741 = vmatprep.subr.bf16.mxu0 %v1188_v1  ;;  %1905 = vmatprep.subr.bf16.mxu1 %v1190_v2  ;;  %v1189_v4 = vld [vmem:[#allocation2 + $0x10] sm:$0xff]  ;;  %v1196_v5 = vld [vmem:[#allocation2 + $0x48] sm:$0xff] }
 0x1f1   :  { %v1198_v6 = vld [vmem:[#allocation2 + $0x58] sm:$0xff]  ;;  %1742 = vmatpush1.bf16.msra.mxu0 %v1187_v3  ;;  %1906 = vmatpush1.bf16.msra.mxu1 %v1189_v4  ;;  %v1195_v7 = vld [vmem:[#allocation2 + $0x40] sm:$0xff]  ;;  %v1197_v9 = vld [vmem:[#allocation2 + $0x50] sm:$0xff] }
 0x1f2   :  { %1743 = vmatprep.subr.bf16.mxu0 %v1196_v5  ;;  %1907 = vmatprep.subr.bf16.mxu1 %v1198_v6  ;;  %v1204_v14 = vld [vmem:[#allocation2 + $0x88] sm:$0xff]  ;;  %v1206_v15 = vld [vmem:[#allocation2 + $0x98] sm:$0xff]  ;;  %v1203_v16 = vld [vmem:[#allocation2 + $0x80] sm:$0xff] }
 0x1f3   :  { %v1205_v17 = vld [vmem:[#allocation2 + $0x90] sm:$0xff]  ;;  %v1212_v12 = vld [vmem:[#allocation2 + $0xc8] sm:$0xff]  ;;  %v1214_v18 = vld [vmem:[#allocation2 + $0xd8] sm:$0xff] }
 0x1f4   :  { %v1211_v19 = vld [vmem:[#allocation2 + $0xc0] sm:$0xff]  ;;  %v1213_v20 = vld [vmem:[#allocation2 + $0xd0] sm:$0xff]  ;;  %v1220_v21 = vld [vmem:[#allocation2 + $0x108] sm:$0xff] }
 0x1f5   :  { %1744 = vmatpush1.bf16.msra.mxu0 %v1195_v7  ;;  %1908 = vmatpush1.bf16.msra.mxu1 %v1197_v9  ;;  %v1222_v22 = vld [vmem:[#allocation2 + $0x118] sm:$0xff]  ;;  %v1219_v23 = vld [vmem:[#allocation2 + $0x100] sm:$0xff]  ;;  %v1221_v24 = vld [vmem:[#allocation2 + $0x110] sm:$0xff] }
 0x1f6   :  { %1745 = vmatprep.subr.bf16.mxu0 %v1204_v14  ;;  %1909 = vmatprep.subr.bf16.mxu1 %v1206_v15  ;;  %v1228_v25 = vld [vmem:[#allocation2 + $0x148] sm:$0xff]  ;;  %v1230_v26 = vld [vmem:[#allocation2 + $0x158] sm:$0xff]  ;;  %v1227_v27 = vld [vmem:[#allocation2 + $0x140] sm:$0xff] }
 0x1f7   :  { %v1229_v28 = vld [vmem:[#allocation2 + $0x150] sm:$0xff]  ;;  %v1236_v29 = vld [vmem:[#allocation2 + $0x188] sm:$0xff]  ;;  %v1238_v30 = vld [vmem:[#allocation2 + $0x198] sm:$0xff] }
 0x1f8   :  { %v1235_v31 = vld [vmem:[#allocation2 + $0x180] sm:$0xff]  ;;  %v1237_v33 = vld [vmem:[#allocation2 + $0x190] sm:$0xff]  ;;  %v1244_v41 = vld [vmem:[#allocation2 + $0x1c8] sm:$0xff] }
 0x1f9   :  { %1746 = vmatpush1.bf16.msra.mxu0 %v1203_v16  ;;  %1910 = vmatpush1.bf16.msra.mxu1 %v1205_v17  ;;  %v1246_v57 = vld [vmem:[#allocation2 + $0x1d8] sm:$0xff]  ;;  %v1243_v42 = vld [vmem:[#allocation2 + $0x1c0] sm:$0xff]  ;;  %v1245_v43 = vld [vmem:[#allocation2 + $0x1d0] sm:$0xff] }
 0x1fa   :  { %1747 = vmatprep.subr.bf16.mxu0 %v1212_v12  ;;  %1911 = vmatprep.subr.bf16.mxu1 %v1214_v18  ;;  %v1252_v44 = vld [vmem:[#allocation2 + $0x208] sm:$0xff]  ;;  %v1254_v45 = vld [vmem:[#allocation2 + $0x218] sm:$0xff]  ;;  %v1251_v46 = vld [vmem:[#allocation2 + $0x200] sm:$0xff] }
 0x1fb   :  { %v1253_v47 = vld [vmem:[#allocation2 + $0x210] sm:$0xff]  ;;  %v1260_v48 = vld [vmem:[#allocation2 + $0x248] sm:$0xff]  ;;  %v1262_v49 = vld [vmem:[#allocation2 + $0x258] sm:$0xff] }
 0x1fc   :  { %v1259_v50 = vld [vmem:[#allocation2 + $0x240] sm:$0xff]  ;;  %v1261_v51 = vld [vmem:[#allocation2 + $0x250] sm:$0xff]  ;;  %v1268_v52 = vld [vmem:[#allocation2 + $0x288] sm:$0xff] }
 0x1fd   :  { %1748 = vmatpush1.bf16.msra.mxu0 %v1211_v19  ;;  %1912 = vmatpush1.bf16.msra.mxu1 %v1213_v20  ;;  %v1270_v53 = vld [vmem:[#allocation2 + $0x298] sm:$0xff]  ;;  %v1267_v54 = vld [vmem:[#allocation2 + $0x280] sm:$0xff]  ;;  %v1269_v55 = vld [vmem:[#allocation2 + $0x290] sm:$0xff] }
 0x1fe   :  { %1749 = vmatprep.subr.bf16.mxu0 %v1220_v21  ;;  %1913 = vmatprep.subr.bf16.mxu1 %v1222_v22  ;;  %v1276_v56 = vld [vmem:[#allocation2 + $0x2c8] sm:$0xff]  ;;  %v1278_v58 = vld [vmem:[#allocation2 + $0x2d8] sm:$0xff]  ;;  %v1275_v59 = vld [vmem:[#allocation2 + $0x2c0] sm:$0xff] }
 0x1ff   :  { %v1277_v61 = vld [vmem:[#allocation2 + $0x2d0] sm:$0xff]  ;;  %v1284_v1 = vld [vmem:[#allocation2 + $0x308] sm:$0xff]  ;;  %v1286_v2 = vld [vmem:[#allocation2 + $0x318] sm:$0xff] }
 0x200   :  { %v1283_v3 = vld [vmem:[#allocation2 + $0x300] sm:$0xff]  ;;  %v1285_v4 = vld [vmem:[#allocation2 + $0x310] sm:$0xff]  ;;  %v1292_v5 = vld [vmem:[#allocation2 + $0x348] sm:$0xff] }
 0x201   :  { %1750 = vmatpush1.bf16.msra.mxu0 %v1219_v23  ;;  %1914 = vmatpush1.bf16.msra.mxu1 %v1221_v24  ;;  %v1294_v6 = vld [vmem:[#allocation2 + $0x358] sm:$0xff]  ;;  %v1291_v7 = vld [vmem:[#allocation2 + $0x340] sm:$0xff]  ;;  %v1293_v9 = vld [vmem:[#allocation2 + $0x350] sm:$0xff] }
 0x202   :  { %1751 = vmatprep.subr.bf16.mxu0 %v1228_v25  ;;  %1915 = vmatprep.subr.bf16.mxu1 %v1230_v26  ;;  %v1300_v14 = vld [vmem:[#allocation2 + $0x388] sm:$0xff]  ;;  %v1302_v15 = vld [vmem:[#allocation2 + $0x398] sm:$0xff]  ;;  %v1299_v16 = vld [vmem:[#allocation2 + $0x380] sm:$0xff] }
 0x203   :  { %v1301_v17 = vld [vmem:[#allocation2 + $0x390] sm:$0xff]  ;;  %v1308_v12 = vld [vmem:[#allocation2 + $0x3c8] sm:$0xff]  ;;  %v1310_v18 = vld [vmem:[#allocation2 + $0x3d8] sm:$0xff] }
 0x204   :  { %v1307_v19 = vld [vmem:[#allocation2 + $0x3c0] sm:$0xff]  ;;  %v1309_v20 = vld [vmem:[#allocation2 + $0x3d0] sm:$0xff]  ;;  %v1316_v21 = vld [vmem:[#allocation2 + $0x408] sm:$0xff] }
 0x205   :  { %1752 = vmatpush1.bf16.msra.mxu0 %v1227_v27  ;;  %1916 = vmatpush1.bf16.msra.mxu1 %v1229_v28  ;;  %v1318_v22 = vld [vmem:[#allocation2 + $0x418] sm:$0xff]  ;;  %v1315_v23 = vld [vmem:[#allocation2 + $0x400] sm:$0xff]  ;;  %v1317_v24 = vld [vmem:[#allocation2 + $0x410] sm:$0xff] }
 0x206   :  { %1753 = vmatprep.subr.bf16.mxu0 %v1236_v29  ;;  %1917 = vmatprep.subr.bf16.mxu1 %v1238_v30  ;;  %v1324_v25 = vld [vmem:[#allocation2 + $0x448] sm:$0xff]  ;;  %v1326_v26 = vld [vmem:[#allocation2 + $0x458] sm:$0xff]  ;;  %v1323_v27 = vld [vmem:[#allocation2 + $0x440] sm:$0xff] }
 0x207   :  { %v1325_v28 = vld [vmem:[#allocation2 + $0x450] sm:$0xff]  ;;  %v1332_v29 = vld [vmem:[#allocation2 + $0x488] sm:$0xff]  ;;  %v1334_v30 = vld [vmem:[#allocation2 + $0x498] sm:$0xff] }
 0x209   :  { %1754 = vmatpush1.bf16.msra.mxu0 %v1235_v31  ;;  %1918 = vmatpush1.bf16.msra.mxu1 %v1237_v33  ;;  %v1331_v31 = vld [vmem:[#allocation2 + $0x480] sm:$0xff]  ;;  %v1333_v33 = vld [vmem:[#allocation2 + $0x490] sm:$0xff] }
 0x20a   :  { %1755 = vmatprep.subr.bf16.mxu0 %v1244_v41  ;;  %1919 = vmatprep.subr.bf16.mxu1 %v1246_v57  ;;  %v1340_v41 = vld [vmem:[#allocation2 + $0x4c8] sm:$0xff]  ;;  %v1342_v57 = vld [vmem:[#allocation2 + $0x4d8] sm:$0xff] }
 0x20d   :  { %1756 = vmatpush1.bf16.msra.mxu0 %v1243_v42  ;;  %1920 = vmatpush1.bf16.msra.mxu1 %v1245_v43  ;;  %v1339_v42 = vld [vmem:[#allocation2 + $0x4c0] sm:$0xff]  ;;  %v1341_v43 = vld [vmem:[#allocation2 + $0x4d0] sm:$0xff] }
 0x20e   :  { %1757 = vmatprep.subr.bf16.mxu0 %v1252_v44  ;;  %1921 = vmatprep.subr.bf16.mxu1 %v1254_v45  ;;  %v1348_v44 = vld [vmem:[#allocation2 + $0x508] sm:$0xff]  ;;  %v1350_v45 = vld [vmem:[#allocation2 + $0x518] sm:$0xff] }
 0x211   :  { %1758 = vmatpush1.bf16.msra.mxu0 %v1251_v46  ;;  %1922 = vmatpush1.bf16.msra.mxu1 %v1253_v47  ;;  %v1347_v46 = vld [vmem:[#allocation2 + $0x500] sm:$0xff]  ;;  %v1349_v47 = vld [vmem:[#allocation2 + $0x510] sm:$0xff] }
 0x212   :  { %1759 = vmatprep.subr.bf16.mxu0 %v1260_v48  ;;  %1923 = vmatprep.subr.bf16.mxu1 %v1262_v49  ;;  %v1356_v48 = vld [vmem:[#allocation2 + $0x548] sm:$0xff]  ;;  %v1358_v49 = vld [vmem:[#allocation2 + $0x558] sm:$0xff] }
 0x215   :  { %1760 = vmatpush1.bf16.msra.mxu0 %v1259_v50  ;;  %1924 = vmatpush1.bf16.msra.mxu1 %v1261_v51  ;;  %v1355_v50 = vld [vmem:[#allocation2 + $0x540] sm:$0xff]  ;;  %v1357_v51 = vld [vmem:[#allocation2 + $0x550] sm:$0xff] }
 0x216   :  { %1761 = vmatprep.subr.bf16.mxu0 %v1268_v52  ;;  %1925 = vmatprep.subr.bf16.mxu1 %v1270_v53  ;;  %v1364_v52 = vld [vmem:[#allocation2 + $0x588] sm:$0xff]  ;;  %v1366_v53 = vld [vmem:[#allocation2 + $0x598] sm:$0xff] }
 0x219   :  { %1762 = vmatpush1.bf16.msra.mxu0 %v1267_v54  ;;  %1926 = vmatpush1.bf16.msra.mxu1 %v1269_v55  ;;  %v1363_v54 = vld [vmem:[#allocation2 + $0x580] sm:$0xff]  ;;  %v1365_v55 = vld [vmem:[#allocation2 + $0x590] sm:$0xff] }
 0x21a   :  { %1763 = vmatprep.subr.bf16.mxu0 %v1276_v56  ;;  %1927 = vmatprep.subr.bf16.mxu1 %v1278_v58  ;;  %v1372_v56 = vld [vmem:[#allocation2 + $0x5c8] sm:$0xff]  ;;  %v1374_v58 = vld [vmem:[#allocation2 + $0x5d8] sm:$0xff] }
 0x21d   :  { %1764 = vmatpush1.bf16.msra.mxu0 %v1275_v59  ;;  %1928 = vmatpush1.bf16.msra.mxu1 %v1277_v61  ;;  %v1371_v59 = vld [vmem:[#allocation2 + $0x5c0] sm:$0xff]  ;;  %v1373_v61 = vld [vmem:[#allocation2 + $0x5d0] sm:$0xff] }
 0x21e   :  { %1765 = vmatprep.subr.bf16.mxu0 %v1284_v1  ;;  %1929 = vmatprep.subr.bf16.mxu1 %v1286_v2  ;;  %v1380_v1 = vld [vmem:[#allocation2 + $0x608] sm:$0xff]  ;;  %v1382_v2 = vld [vmem:[#allocation2 + $0x618] sm:$0xff] }
 0x221   :  { %1766 = vmatpush1.bf16.msra.mxu0 %v1283_v3  ;;  %1930 = vmatpush1.bf16.msra.mxu1 %v1285_v4  ;;  %v1379_v3 = vld [vmem:[#allocation2 + $0x600] sm:$0xff]  ;;  %v1381_v4 = vld [vmem:[#allocation2 + $0x610] sm:$0xff] }
 0x222   :  { %1767 = vmatprep.subr.bf16.mxu0 %v1292_v5  ;;  %1931 = vmatprep.subr.bf16.mxu1 %v1294_v6  ;;  %v1388_v5 = vld [vmem:[#allocation2 + $0x648] sm:$0xff]  ;;  %v1390_v6 = vld [vmem:[#allocation2 + $0x658] sm:$0xff] }
 0x225   :  { %1768 = vmatpush1.bf16.msra.mxu0 %v1291_v7  ;;  %1932 = vmatpush1.bf16.msra.mxu1 %v1293_v9  ;;  %v1387_v7 = vld [vmem:[#allocation2 + $0x640] sm:$0xff]  ;;  %v1389_v9 = vld [vmem:[#allocation2 + $0x650] sm:$0xff] }
 0x226   :  { %1769 = vmatprep.subr.bf16.mxu0 %v1300_v14  ;;  %1933 = vmatprep.subr.bf16.mxu1 %v1302_v15  ;;  %v1396_v14 = vld [vmem:[#allocation2 + $0x688] sm:$0xff]  ;;  %v1398_v15 = vld [vmem:[#allocation2 + $0x698] sm:$0xff] }
 0x229   :  { %1770 = vmatpush1.bf16.msra.mxu0 %v1299_v16  ;;  %1934 = vmatpush1.bf16.msra.mxu1 %v1301_v17  ;;  %v1395_v16 = vld [vmem:[#allocation2 + $0x680] sm:$0xff]  ;;  %v1397_v17 = vld [vmem:[#allocation2 + $0x690] sm:$0xff] }
 0x22a   :  { %1771 = vmatprep.subr.bf16.mxu0 %v1308_v12  ;;  %1935 = vmatprep.subr.bf16.mxu1 %v1310_v18  ;;  %v1404_v12 = vld [vmem:[#allocation2 + $0x6c8] sm:$0xff]  ;;  %v1406_v18 = vld [vmem:[#allocation2 + $0x6d8] sm:$0xff] }
 0x22d   :  { %1772 = vmatpush1.bf16.msra.mxu0 %v1307_v19  ;;  %1936 = vmatpush1.bf16.msra.mxu1 %v1309_v20  ;;  %v1403_v19 = vld [vmem:[#allocation2 + $0x6c0] sm:$0xff]  ;;  %v1405_v20 = vld [vmem:[#allocation2 + $0x6d0] sm:$0xff] }
 0x22e   :  { %1782 = vmatprep.subr.bf16.mxu0 %v1316_v21  ;;  %1946 = vmatprep.subr.bf16.mxu1 %v1318_v22  ;;  %v1412_v21 = vld [vmem:[#allocation2 + $0x708] sm:$0xff]  ;;  %v1414_v22 = vld [vmem:[#allocation2 + $0x718] sm:$0xff] }
 0x230   :  { %1774 = vmatmul.mubr.bf16.vlgmr.msra.gmra.mrb[8].mxu0 %v4667_v32  ;;  %1938 = vmatmul.mubr.bf16.vlgmr.msra.gmra.mrb[8].mxu1 %v4667_v32 }
 0x231   :  { %1783 = vmatpush1.bf16.msra.mxu0 %v1315_v23  ;;  %1947 = vmatpush1.bf16.msra.mxu1 %v1317_v24  ;;  %v1411_v23 = vld [vmem:[#allocation2 + $0x700] sm:$0xff]  ;;  %v1413_v24 = vld [vmem:[#allocation2 + $0x710] sm:$0xff] }
 0x232   :  { %1784 = vmatprep.subr.bf16.mxu0 %v1324_v25  ;;  %1948 = vmatprep.subr.bf16.mxu1 %v1326_v26  ;;  %v1420_v25 = vld [vmem:[#allocation2 + $0x748] sm:$0xff]  ;;  %v1422_v26 = vld [vmem:[#allocation2 + $0x758] sm:$0xff] }
 0x233   :  { %1814 = vmatprep.mubr.bf16.mxu0 %v4673_v36  ;;  %1978 = vmatprep.mubr.bf16.mxu1 %v4673_v36 }
 0x235   :  { %1785 = vmatpush1.bf16.msra.mxu0 %v1323_v27  ;;  %1949 = vmatpush1.bf16.msra.mxu1 %v1325_v28  ;;  %v1419_v27 = vld [vmem:[#allocation2 + $0x740] sm:$0xff]  ;;  %v1421_v28 = vld [vmem:[#allocation2 + $0x750] sm:$0xff] }
 0x236   :  { %1786 = vmatprep.subr.bf16.mxu0 %v1332_v29  ;;  %1950 = vmatprep.subr.bf16.mxu1 %v1334_v30  ;;  %v1428_v29 = vld [vmem:[#allocation2 + $0x788] sm:$0xff]  ;;  %v1430_v30 = vld [vmem:[#allocation2 + $0x798] sm:$0xff] }
 0x239   :  { %1787 = vmatpush1.bf16.msra.mxu0 %v1331_v31  ;;  %1951 = vmatpush1.bf16.msra.mxu1 %v1333_v33  ;;  %v1427_v31 = vld [vmem:[#allocation2 + $0x780] sm:$0xff]  ;;  %v1429_v33 = vld [vmem:[#allocation2 + $0x790] sm:$0xff] }
 0x23a   :  { %1788 = vmatprep.subr.bf16.mxu0 %v1340_v41  ;;  %1952 = vmatprep.subr.bf16.mxu1 %v1342_v57  ;;  %v1436_v41 = vld [vmem:[#allocation2 + $0x7c8] sm:$0xff]  ;;  %v1438_v57 = vld [vmem:[#allocation2 + $0x7d8] sm:$0xff] }
 0x23d   :  { %1789 = vmatpush1.bf16.msra.mxu0 %v1339_v42  ;;  %1953 = vmatpush1.bf16.msra.mxu1 %v1341_v43  ;;  %v1435_v42 = vld [vmem:[#allocation2 + $0x7c0] sm:$0xff]  ;;  %v1437_v43 = vld [vmem:[#allocation2 + $0x7d0] sm:$0xff] }
 0x23e   :  { %1790 = vmatprep.subr.bf16.mxu0 %v1348_v44  ;;  %1954 = vmatprep.subr.bf16.mxu1 %v1350_v45  ;;  %v1444_v44 = vld [vmem:[#allocation2 + $0x808] sm:$0xff]  ;;  %v1446_v45 = vld [vmem:[#allocation2 + $0x818] sm:$0xff] }
 0x241   :  { %1791 = vmatpush1.bf16.msra.mxu0 %v1347_v46  ;;  %1955 = vmatpush1.bf16.msra.mxu1 %v1349_v47  ;;  %v1443_v46 = vld [vmem:[#allocation2 + $0x800] sm:$0xff]  ;;  %v1445_v47 = vld [vmem:[#allocation2 + $0x810] sm:$0xff] }
 0x242   :  { %1792 = vmatprep.subr.bf16.mxu0 %v1356_v48  ;;  %1956 = vmatprep.subr.bf16.mxu1 %v1358_v49  ;;  %v1452_v48 = vld [vmem:[#allocation2 + $0x848] sm:$0xff]  ;;  %v1454_v49 = vld [vmem:[#allocation2 + $0x858] sm:$0xff] }
 0x245   :  { %1793 = vmatpush1.bf16.msra.mxu0 %v1355_v50  ;;  %1957 = vmatpush1.bf16.msra.mxu1 %v1357_v51  ;;  %v1451_v50 = vld [vmem:[#allocation2 + $0x840] sm:$0xff]  ;;  %v1453_v51 = vld [vmem:[#allocation2 + $0x850] sm:$0xff] }
 0x246   :  { %1794 = vmatprep.subr.bf16.mxu0 %v1364_v52  ;;  %1958 = vmatprep.subr.bf16.mxu1 %v1366_v53  ;;  %v1460_v52 = vld [vmem:[#allocation2 + $0x888] sm:$0xff]  ;;  %v1462_v53 = vld [vmem:[#allocation2 + $0x898] sm:$0xff] }
 0x249   :  { %1795 = vmatpush1.bf16.msra.mxu0 %v1363_v54  ;;  %1959 = vmatpush1.bf16.msra.mxu1 %v1365_v55  ;;  %v1459_v54 = vld [vmem:[#allocation2 + $0x880] sm:$0xff]  ;;  %v1461_v55 = vld [vmem:[#allocation2 + $0x890] sm:$0xff] }
 0x24a   :  { %1796 = vmatprep.subr.bf16.mxu0 %v1372_v56  ;;  %1960 = vmatprep.subr.bf16.mxu1 %v1374_v58  ;;  %v1468_v56 = vld [vmem:[#allocation2 + $0x8c8] sm:$0xff]  ;;  %v1470_v58 = vld [vmem:[#allocation2 + $0x8d8] sm:$0xff] }
 0x24d   :  { %1797 = vmatpush1.bf16.msra.mxu0 %v1371_v59  ;;  %1961 = vmatpush1.bf16.msra.mxu1 %v1373_v61  ;;  %v1467_v59 = vld [vmem:[#allocation2 + $0x8c0] sm:$0xff]  ;;  %v1469_v61 = vld [vmem:[#allocation2 + $0x8d0] sm:$0xff] }
 0x24e   :  { %1798 = vmatprep.subr.bf16.mxu0 %v1380_v1  ;;  %1962 = vmatprep.subr.bf16.mxu1 %v1382_v2  ;;  %v1476_v1 = vld [vmem:[#allocation2 + $0x908] sm:$0xff]  ;;  %v1478_v2 = vld [vmem:[#allocation2 + $0x918] sm:$0xff] }
 0x251   :  { %1799 = vmatpush1.bf16.msra.mxu0 %v1379_v3  ;;  %1963 = vmatpush1.bf16.msra.mxu1 %v1381_v4  ;;  %v1475_v3 = vld [vmem:[#allocation2 + $0x900] sm:$0xff]  ;;  %v1477_v4 = vld [vmem:[#allocation2 + $0x910] sm:$0xff] }
 0x252   :  { %1800 = vmatprep.subr.bf16.mxu0 %v1388_v5  ;;  %1964 = vmatprep.subr.bf16.mxu1 %v1390_v6  ;;  %v1484_v5 = vld [vmem:[#allocation2 + $0x948] sm:$0xff]  ;;  %v1486_v6 = vld [vmem:[#allocation2 + $0x958] sm:$0xff] }
 0x255   :  { %1801 = vmatpush1.bf16.msra.mxu0 %v1387_v7  ;;  %1965 = vmatpush1.bf16.msra.mxu1 %v1389_v9  ;;  %v1483_v7 = vld [vmem:[#allocation2 + $0x940] sm:$0xff]  ;;  %v1485_v9 = vld [vmem:[#allocation2 + $0x950] sm:$0xff] }
 0x256   :  { %1802 = vmatprep.subr.bf16.mxu0 %v1396_v14  ;;  %1966 = vmatprep.subr.bf16.mxu1 %v1398_v15  ;;  %v1492_v14 = vld [vmem:[#allocation2 + $0x988] sm:$0xff]  ;;  %v1494_v15 = vld [vmem:[#allocation2 + $0x998] sm:$0xff] }
 0x259   :  { %1803 = vmatpush1.bf16.msra.mxu0 %v1395_v16  ;;  %1967 = vmatpush1.bf16.msra.mxu1 %v1397_v17  ;;  %v1491_v16 = vld [vmem:[#allocation2 + $0x980] sm:$0xff]  ;;  %v1493_v17 = vld [vmem:[#allocation2 + $0x990] sm:$0xff] }
 0x25a   :  { %1804 = vmatprep.subr.bf16.mxu0 %v1404_v12  ;;  %1968 = vmatprep.subr.bf16.mxu1 %v1406_v18  ;;  %v1500_v12 = vld [vmem:[#allocation2 + $0x9c8] sm:$0xff]  ;;  %v1502_v18 = vld [vmem:[#allocation2 + $0x9d8] sm:$0xff] }
 0x25d   :  { %1805 = vmatpush1.bf16.msra.mxu0 %v1403_v19  ;;  %1969 = vmatpush1.bf16.msra.mxu1 %v1405_v20  ;;  %v1499_v19 = vld [vmem:[#allocation2 + $0x9c0] sm:$0xff]  ;;  %v1501_v20 = vld [vmem:[#allocation2 + $0x9d0] sm:$0xff] }
 0x25e   :  { %1806 = vmatprep.subr.bf16.mxu0 %v1412_v21  ;;  %1970 = vmatprep.subr.bf16.mxu1 %v1414_v22  ;;  %v1508_v21 = vld [vmem:[#allocation2 + $0xa08] sm:$0xff]  ;;  %v1510_v22 = vld [vmem:[#allocation2 + $0xa18] sm:$0xff] }
 0x261   :  { %1807 = vmatpush1.bf16.msra.mxu0 %v1411_v23  ;;  %1971 = vmatpush1.bf16.msra.mxu1 %v1413_v24  ;;  %v1507_v23 = vld [vmem:[#allocation2 + $0xa00] sm:$0xff]  ;;  %v1509_v24 = vld [vmem:[#allocation2 + $0xa10] sm:$0xff] }
 0x262   :  { %1808 = vmatprep.subr.bf16.mxu0 %v1420_v25  ;;  %1972 = vmatprep.subr.bf16.mxu1 %v1422_v26  ;;  %v1516_v25 = vld [vmem:[#allocation2 + $0xa48] sm:$0xff]  ;;  %v1518_v26 = vld [vmem:[#allocation2 + $0xa58] sm:$0xff] }
 0x265   :  { %1809 = vmatpush1.bf16.msra.mxu0 %v1419_v27  ;;  %1973 = vmatpush1.bf16.msra.mxu1 %v1421_v28  ;;  %v1515_v27 = vld [vmem:[#allocation2 + $0xa40] sm:$0xff]  ;;  %v1517_v28 = vld [vmem:[#allocation2 + $0xa50] sm:$0xff] }
 0x266   :  { %1810 = vmatprep.subr.bf16.mxu0 %v1428_v29  ;;  %1974 = vmatprep.subr.bf16.mxu1 %v1430_v30  ;;  %v1524_v29 = vld [vmem:[#allocation2 + $0xa88] sm:$0xff]  ;;  %v1526_v30 = vld [vmem:[#allocation2 + $0xa98] sm:$0xff] }
 0x269   :  { %1811 = vmatpush1.bf16.msra.mxu0 %v1427_v31  ;;  %1975 = vmatpush1.bf16.msra.mxu1 %v1429_v33  ;;  %v1523_v31 = vld [vmem:[#allocation2 + $0xa80] sm:$0xff]  ;;  %v1525_v33 = vld [vmem:[#allocation2 + $0xa90] sm:$0xff] }
 0x26a   :  { %1812 = vmatprep.subr.bf16.mxu0 %v1436_v41  ;;  %1976 = vmatprep.subr.bf16.mxu1 %v1438_v57  ;;  %v1532_v41 = vld [vmem:[#allocation2 + $0xac8] sm:$0xff]  ;;  %v1534_v57 = vld [vmem:[#allocation2 + $0xad8] sm:$0xff] }
 0x26d   :  { %1813 = vmatpush1.bf16.msra.mxu0 %v1435_v42  ;;  %1977 = vmatpush1.bf16.msra.mxu1 %v1437_v43  ;;  %v1531_v42 = vld [vmem:[#allocation2 + $0xac0] sm:$0xff]  ;;  %v1533_v43 = vld [vmem:[#allocation2 + $0xad0] sm:$0xff] }
 0x26e   :  { %1823 = vmatprep.subr.bf16.mxu0 %v1444_v44  ;;  %1987 = vmatprep.subr.bf16.mxu1 %v1446_v45  ;;  %v1540_v44 = vld [vmem:[#allocation2 + $0xb08] sm:$0xff]  ;;  %v1542_v45 = vld [vmem:[#allocation2 + $0xb18] sm:$0xff] }
 0x270   :  { %1815 = vmatmul.mubr.bf16.vlgmr.msra.gmra.mrb[8].mxu0 %v4669_v34  ;;  %1979 = vmatmul.mubr.bf16.vlgmr.msra.gmra.mrb[8].mxu1 %v4669_v34 }
 0x271   :  { %1824 = vmatpush1.bf16.msra.mxu0 %v1443_v46  ;;  %1988 = vmatpush1.bf16.msra.mxu1 %v1445_v47  ;;  %v1539_v46 = vld [vmem:[#allocation2 + $0xb00] sm:$0xff]  ;;  %v1541_v47 = vld [vmem:[#allocation2 + $0xb10] sm:$0xff] }
 0x272   :  { %1825 = vmatprep.subr.bf16.mxu0 %v1452_v48  ;;  %1989 = vmatprep.subr.bf16.mxu1 %v1454_v49  ;;  %v1548_v48 = vld [vmem:[#allocation2 + $0xb48] sm:$0xff]  ;;  %v1550_v49 = vld [vmem:[#allocation2 + $0xb58] sm:$0xff] }
 0x273   :  { %1855 = vmatprep.mubr.bf16.mxu0 %v4691_v63  ;;  %2019 = vmatprep.mubr.bf16.mxu1 %v4691_v63 }
 0x275   :  { %1826 = vmatpush1.bf16.msra.mxu0 %v1451_v50  ;;  %1990 = vmatpush1.bf16.msra.mxu1 %v1453_v51  ;;  %v1547_v50 = vld [vmem:[#allocation2 + $0xb40] sm:$0xff]  ;;  %v1549_v51 = vld [vmem:[#allocation2 + $0xb50] sm:$0xff] }
 0x276   :  { %1827 = vmatprep.subr.bf16.mxu0 %v1460_v52  ;;  %1991 = vmatprep.subr.bf16.mxu1 %v1462_v53  ;;  %v1556_v52 = vld [vmem:[#allocation2 + $0xb88] sm:$0xff]  ;;  %v1558_v53 = vld [vmem:[#allocation2 + $0xb98] sm:$0xff] }
 0x279   :  { %1828 = vmatpush1.bf16.msra.mxu0 %v1459_v54  ;;  %1992 = vmatpush1.bf16.msra.mxu1 %v1461_v55  ;;  %v1555_v54 = vld [vmem:[#allocation2 + $0xb80] sm:$0xff]  ;;  %v1557_v55 = vld [vmem:[#allocation2 + $0xb90] sm:$0xff] }
 0x27a   :  { %1829 = vmatprep.subr.bf16.mxu0 %v1468_v56  ;;  %1993 = vmatprep.subr.bf16.mxu1 %v1470_v58  ;;  %v1564_v56 = vld [vmem:[#allocation2 + $0xbc8] sm:$0xff]  ;;  %v1566_v58 = vld [vmem:[#allocation2 + $0xbd8] sm:$0xff] }
 0x27d   :  { %1830 = vmatpush1.bf16.msra.mxu0 %v1467_v59  ;;  %1994 = vmatpush1.bf16.msra.mxu1 %v1469_v61  ;;  %v1563_v59 = vld [vmem:[#allocation2 + $0xbc0] sm:$0xff]  ;;  %v1565_v61 = vld [vmem:[#allocation2 + $0xbd0] sm:$0xff] }
 0x27e   :  { %1831 = vmatprep.subr.bf16.mxu0 %v1476_v1  ;;  %1995 = vmatprep.subr.bf16.mxu1 %v1478_v2  ;;  %v1572_v1 = vld [vmem:[#allocation2 + $0xc08] sm:$0xff]  ;;  %v1574_v2 = vld [vmem:[#allocation2 + $0xc18] sm:$0xff] }
 0x281   :  { %1832 = vmatpush1.bf16.msra.mxu0 %v1475_v3  ;;  %1996 = vmatpush1.bf16.msra.mxu1 %v1477_v4  ;;  %v1571_v3 = vld [vmem:[#allocation2 + $0xc00] sm:$0xff]  ;;  %v1573_v4 = vld [vmem:[#allocation2 + $0xc10] sm:$0xff] }
 0x282   :  { %1833 = vmatprep.subr.bf16.mxu0 %v1484_v5  ;;  %1997 = vmatprep.subr.bf16.mxu1 %v1486_v6  ;;  %v1580_v5 = vld [vmem:[#allocation2 + $0xc48] sm:$0xff]  ;;  %v1582_v6 = vld [vmem:[#allocation2 + $0xc58] sm:$0xff] }
 0x285   :  { %1834 = vmatpush1.bf16.msra.mxu0 %v1483_v7  ;;  %1998 = vmatpush1.bf16.msra.mxu1 %v1485_v9  ;;  %v1579_v7 = vld [vmem:[#allocation2 + $0xc40] sm:$0xff]  ;;  %v1581_v9 = vld [vmem:[#allocation2 + $0xc50] sm:$0xff] }
 0x286   :  { %1835 = vmatprep.subr.bf16.mxu0 %v1492_v14  ;;  %1999 = vmatprep.subr.bf16.mxu1 %v1494_v15  ;;  %v1588_v14 = vld [vmem:[#allocation2 + $0xc88] sm:$0xff]  ;;  %v1590_v15 = vld [vmem:[#allocation2 + $0xc98] sm:$0xff] }
 0x289   :  { %1836 = vmatpush1.bf16.msra.mxu0 %v1491_v16  ;;  %2000 = vmatpush1.bf16.msra.mxu1 %v1493_v17  ;;  %v1587_v16 = vld [vmem:[#allocation2 + $0xc80] sm:$0xff]  ;;  %v1589_v17 = vld [vmem:[#allocation2 + $0xc90] sm:$0xff] }
 0x28a   :  { %1837 = vmatprep.subr.bf16.mxu0 %v1500_v12  ;;  %2001 = vmatprep.subr.bf16.mxu1 %v1502_v18  ;;  %v1596_v12 = vld [vmem:[#allocation2 + $0xcc8] sm:$0xff]  ;;  %v1598_v18 = vld [vmem:[#allocation2 + $0xcd8] sm:$0xff] }
 0x28d   :  { %1838 = vmatpush1.bf16.msra.mxu0 %v1499_v19  ;;  %2002 = vmatpush1.bf16.msra.mxu1 %v1501_v20  ;;  %v1595_v19 = vld [vmem:[#allocation2 + $0xcc0] sm:$0xff]  ;;  %v1597_v20 = vld [vmem:[#allocation2 + $0xcd0] sm:$0xff] }
 0x28e   :  { %1839 = vmatprep.subr.bf16.mxu0 %v1508_v21  ;;  %2003 = vmatprep.subr.bf16.mxu1 %v1510_v22  ;;  %v1604_v21 = vld [vmem:[#allocation2 + $0xd08] sm:$0xff]  ;;  %v1606_v22 = vld [vmem:[#allocation2 + $0xd18] sm:$0xff] }
 0x291   :  { %1840 = vmatpush1.bf16.msra.mxu0 %v1507_v23  ;;  %2004 = vmatpush1.bf16.msra.mxu1 %v1509_v24  ;;  %v1603_v23 = vld [vmem:[#allocation2 + $0xd00] sm:$0xff]  ;;  %v1605_v24 = vld [vmem:[#allocation2 + $0xd10] sm:$0xff] }
 0x292   :  { %1841 = vmatprep.subr.bf16.mxu0 %v1516_v25  ;;  %2005 = vmatprep.subr.bf16.mxu1 %v1518_v26  ;;  %v1612_v25 = vld [vmem:[#allocation2 + $0xd48] sm:$0xff]  ;;  %v1614_v26 = vld [vmem:[#allocation2 + $0xd58] sm:$0xff] }
 0x295   :  { %1842 = vmatpush1.bf16.msra.mxu0 %v1515_v27  ;;  %2006 = vmatpush1.bf16.msra.mxu1 %v1517_v28  ;;  %v1611_v27 = vld [vmem:[#allocation2 + $0xd40] sm:$0xff]  ;;  %v1613_v28 = vld [vmem:[#allocation2 + $0xd50] sm:$0xff] }
 0x296   :  { %1843 = vmatprep.subr.bf16.mxu0 %v1524_v29  ;;  %2007 = vmatprep.subr.bf16.mxu1 %v1526_v30  ;;  %v1620_v29 = vld [vmem:[#allocation2 + $0xd88] sm:$0xff]  ;;  %v1622_v30 = vld [vmem:[#allocation2 + $0xd98] sm:$0xff] }
 0x299   :  { %1844 = vmatpush1.bf16.msra.mxu0 %v1523_v31  ;;  %2008 = vmatpush1.bf16.msra.mxu1 %v1525_v33  ;;  %v1619_v31 = vld [vmem:[#allocation2 + $0xd80] sm:$0xff]  ;;  %v1621_v33 = vld [vmem:[#allocation2 + $0xd90] sm:$0xff] }
 0x29a   :  { %1845 = vmatprep.subr.bf16.mxu0 %v1532_v41  ;;  %2009 = vmatprep.subr.bf16.mxu1 %v1534_v57  ;;  %v1628_v41 = vld [vmem:[#allocation2 + $0xdc8] sm:$0xff]  ;;  %v1630_v57 = vld [vmem:[#allocation2 + $0xdd8] sm:$0xff] }
 0x29d   :  { %1846 = vmatpush1.bf16.msra.mxu0 %v1531_v42  ;;  %2010 = vmatpush1.bf16.msra.mxu1 %v1533_v43  ;;  %v1627_v42 = vld [vmem:[#allocation2 + $0xdc0] sm:$0xff]  ;;  %v1629_v43 = vld [vmem:[#allocation2 + $0xdd0] sm:$0xff] }
 0x29e   :  { %1847 = vmatprep.subr.bf16.mxu0 %v1540_v44  ;;  %2011 = vmatprep.subr.bf16.mxu1 %v1542_v45  ;;  %v1636_v44 = vld [vmem:[#allocation2 + $0xe08] sm:$0xff]  ;;  %v1638_v45 = vld [vmem:[#allocation2 + $0xe18] sm:$0xff] }
 0x2a1   :  { %1848 = vmatpush1.bf16.msra.mxu0 %v1539_v46  ;;  %2012 = vmatpush1.bf16.msra.mxu1 %v1541_v47  ;;  %v1635_v46 = vld [vmem:[#allocation2 + $0xe00] sm:$0xff]  ;;  %v1637_v47 = vld [vmem:[#allocation2 + $0xe10] sm:$0xff] }
 0x2a2   :  { %1849 = vmatprep.subr.bf16.mxu0 %v1548_v48  ;;  %2013 = vmatprep.subr.bf16.mxu1 %v1550_v49  ;;  %v1644_v48 = vld [vmem:[#allocation2 + $0xe48] sm:$0xff]  ;;  %v1646_v49 = vld [vmem:[#allocation2 + $0xe58] sm:$0xff] }
 0x2a5   :  { %1850 = vmatpush1.bf16.msra.mxu0 %v1547_v50  ;;  %2014 = vmatpush1.bf16.msra.mxu1 %v1549_v51  ;;  %v1643_v50 = vld [vmem:[#allocation2 + $0xe40] sm:$0xff]  ;;  %v1645_v51 = vld [vmem:[#allocation2 + $0xe50] sm:$0xff] }
 0x2a6   :  { %1851 = vmatprep.subr.bf16.mxu0 %v1556_v52  ;;  %2015 = vmatprep.subr.bf16.mxu1 %v1558_v53  ;;  %v1652_v52 = vld [vmem:[#allocation2 + $0xe88] sm:$0xff]  ;;  %v1654_v53 = vld [vmem:[#allocation2 + $0xe98] sm:$0xff] }
 0x2a9   :  { %1852 = vmatpush1.bf16.msra.mxu0 %v1555_v54  ;;  %2016 = vmatpush1.bf16.msra.mxu1 %v1557_v55  ;;  %v1651_v54 = vld [vmem:[#allocation2 + $0xe80] sm:$0xff]  ;;  %v1653_v55 = vld [vmem:[#allocation2 + $0xe90] sm:$0xff] }
 0x2aa   :  { %1853 = vmatprep.subr.bf16.mxu0 %v1564_v56  ;;  %2017 = vmatprep.subr.bf16.mxu1 %v1566_v58  ;;  %v1660_v56 = vld [vmem:[#allocation2 + $0xec8] sm:$0xff]  ;;  %v1662_v58 = vld [vmem:[#allocation2 + $0xed8] sm:$0xff] }
 0x2ad   :  { %1854 = vmatpush1.bf16.msra.mxu0 %v1563_v59  ;;  %2018 = vmatpush1.bf16.msra.mxu1 %v1565_v61  ;;  %v1659_v59 = vld [vmem:[#allocation2 + $0xec0] sm:$0xff]  ;;  %v1661_v61 = vld [vmem:[#allocation2 + $0xed0] sm:$0xff] }
 0x2ae   :  { %1864 = vmatprep.subr.bf16.mxu0 %v1572_v1  ;;  %2028 = vmatprep.subr.bf16.mxu1 %v1574_v2  ;;  %v1668_v1 = vld [vmem:[#allocation2 + $0xf08] sm:$0xff]  ;;  %v1670_v2 = vld [vmem:[#allocation2 + $0xf18] sm:$0xff] }
 0x2b0   :  { %1856 = vmatmul.mubr.bf16.vlgmr.msra.gmra.mrb[8].mxu0 %v4687_v60  ;;  %2020 = vmatmul.mubr.bf16.vlgmr.msra.gmra.mrb[8].mxu1 %v4687_v60 }
 0x2b1   :  { %1865 = vmatpush1.bf16.msra.mxu0 %v1571_v3  ;;  %2029 = vmatpush1.bf16.msra.mxu1 %v1573_v4  ;;  %v1667_v3 = vld [vmem:[#allocation2 + $0xf00] sm:$0xff]  ;;  %v1669_v4 = vld [vmem:[#allocation2 + $0xf10] sm:$0xff] }
 0x2b2   :  { %1866 = vmatprep.subr.bf16.mxu0 %v1580_v5  ;;  %2030 = vmatprep.subr.bf16.mxu1 %v1582_v6  ;;  %v1676_v5 = vld [vmem:[#allocation2 + $0xf48] sm:$0xff]  ;;  %v1678_v6 = vld [vmem:[#allocation2 + $0xf58] sm:$0xff] }
 0x2b3   :  { %1896 = vmatprep.mubr.bf16.mxu0 %v4693_v0  ;;  %2060 = vmatprep.mubr.bf16.mxu1 %v4693_v0 }
 0x2b5   :  { %1867 = vmatpush1.bf16.msra.mxu0 %v1579_v7  ;;  %2031 = vmatpush1.bf16.msra.mxu1 %v1581_v9  ;;  %v1675_v7 = vld [vmem:[#allocation2 + $0xf40] sm:$0xff]  ;;  %v1677_v9 = vld [vmem:[#allocation2 + $0xf50] sm:$0xff] }
 0x2b6   :  { %1868 = vmatprep.subr.bf16.mxu0 %v1588_v14  ;;  %2032 = vmatprep.subr.bf16.mxu1 %v1590_v15  ;;  %v1684_v14 = vld [vmem:[#allocation2 + $0xf88] sm:$0xff]  ;;  %v1686_v15 = vld [vmem:[#allocation2 + $0xf98] sm:$0xff] }
 0x2b9   :  { %1869 = vmatpush1.bf16.msra.mxu0 %v1587_v16  ;;  %2033 = vmatpush1.bf16.msra.mxu1 %v1589_v17  ;;  %v1683_v16 = vld [vmem:[#allocation2 + $0xf80] sm:$0xff]  ;;  %v1685_v17 = vld [vmem:[#allocation2 + $0xf90] sm:$0xff] }
 0x2ba   :  { %1870 = vmatprep.subr.bf16.mxu0 %v1596_v12  ;;  %2034 = vmatprep.subr.bf16.mxu1 %v1598_v18  ;;  %v1692_v12 = vld [vmem:[#allocation2 + $0xfc8] sm:$0xff]  ;;  %v1694_v18 = vld [vmem:[#allocation2 + $0xfd8] sm:$0xff] }
 0x2bd   :  { %1871 = vmatpush1.bf16.msra.mxu0 %v1595_v19  ;;  %2035 = vmatpush1.bf16.msra.mxu1 %v1597_v20  ;;  %v1691_v19 = vld [vmem:[#allocation2 + $0xfc0] sm:$0xff]  ;;  %v1693_v20 = vld [vmem:[#allocation2 + $0xfd0] sm:$0xff] }
 0x2be   :  { %1872 = vmatprep.subr.bf16.mxu0 %v1604_v21  ;;  %2036 = vmatprep.subr.bf16.mxu1 %v1606_v22  ;;  %v1192_v21 = vld [vmem:[#allocation2 + $0x28] sm:$0xff]  ;;  %v1194_v22 = vld [vmem:[#allocation2 + $0x38] sm:$0xff] }
 0x2c1   :  { %1873 = vmatpush1.bf16.msra.mxu0 %v1603_v23  ;;  %2037 = vmatpush1.bf16.msra.mxu1 %v1605_v24  ;;  %v1191_v23 = vld [vmem:[#allocation2 + $0x20] sm:$0xff]  ;;  %v1193_v24 = vld [vmem:[#allocation2 + $0x30] sm:$0xff] }
 0x2c2   :  { %1874 = vmatprep.subr.bf16.mxu0 %v1612_v25  ;;  %2038 = vmatprep.subr.bf16.mxu1 %v1614_v26  ;;  %v1200_v25 = vld [vmem:[#allocation2 + $0x68] sm:$0xff]  ;;  %v1202_v26 = vld [vmem:[#allocation2 + $0x78] sm:$0xff] }
 0x2c5   :  { %1875 = vmatpush1.bf16.msra.mxu0 %v1611_v27  ;;  %2039 = vmatpush1.bf16.msra.mxu1 %v1613_v28  ;;  %v1199_v27 = vld [vmem:[#allocation2 + $0x60] sm:$0xff]  ;;  %v1201_v28 = vld [vmem:[#allocation2 + $0x70] sm:$0xff] }
 0x2c6   :  { %1876 = vmatprep.subr.bf16.mxu0 %v1620_v29  ;;  %2040 = vmatprep.subr.bf16.mxu1 %v1622_v30  ;;  %v1208_v29 = vld [vmem:[#allocation2 + $0xa8] sm:$0xff]  ;;  %v1210_v30 = vld [vmem:[#allocation2 + $0xb8] sm:$0xff] }
 0x2c9   :  { %1877 = vmatpush1.bf16.msra.mxu0 %v1619_v31  ;;  %2041 = vmatpush1.bf16.msra.mxu1 %v1621_v33  ;;  %v1207_v31 = vld [vmem:[#allocation2 + $0xa0] sm:$0xff]  ;;  %v1209_v33 = vld [vmem:[#allocation2 + $0xb0] sm:$0xff] }
 0x2ca   :  { %1878 = vmatprep.subr.bf16.mxu0 %v1628_v41  ;;  %2042 = vmatprep.subr.bf16.mxu1 %v1630_v57  ;;  %v1216_v41 = vld [vmem:[#allocation2 + $0xe8] sm:$0xff]  ;;  %v1218_v57 = vld [vmem:[#allocation2 + $0xf8] sm:$0xff] }
 0x2cd   :  { %1879 = vmatpush1.bf16.msra.mxu0 %v1627_v42  ;;  %2043 = vmatpush1.bf16.msra.mxu1 %v1629_v43  ;;  %v1215_v42 = vld [vmem:[#allocation2 + $0xe0] sm:$0xff]  ;;  %v1217_v43 = vld [vmem:[#allocation2 + $0xf0] sm:$0xff] }
 0x2ce   :  { %1880 = vmatprep.subr.bf16.mxu0 %v1636_v44  ;;  %2044 = vmatprep.subr.bf16.mxu1 %v1638_v45  ;;  %v1224_v44 = vld [vmem:[#allocation2 + $0x128] sm:$0xff]  ;;  %v1226_v45 = vld [vmem:[#allocation2 + $0x138] sm:$0xff] }
 0x2d1   :  { %1881 = vmatpush1.bf16.msra.mxu0 %v1635_v46  ;;  %2045 = vmatpush1.bf16.msra.mxu1 %v1637_v47  ;;  %v1225_v46 = vld [vmem:[#allocation2 + $0x130] sm:$0xff]  ;;  %v1232_v47 = vld [vmem:[#allocation2 + $0x168] sm:$0xff] }
 0x2d2   :  { %1882 = vmatprep.subr.bf16.mxu0 %v1644_v48  ;;  %2046 = vmatprep.subr.bf16.mxu1 %v1646_v49  ;;  %v1234_v48 = vld [vmem:[#allocation2 + $0x178] sm:$0xff]  ;;  %v1231_v49 = vld [vmem:[#allocation2 + $0x160] sm:$0xff] }
 0x2d5   :  { %1883 = vmatpush1.bf16.msra.mxu0 %v1643_v50  ;;  %2047 = vmatpush1.bf16.msra.mxu1 %v1645_v51  ;;  %v1233_v50 = vld [vmem:[#allocation2 + $0x170] sm:$0xff]  ;;  %v1240_v51 = vld [vmem:[#allocation2 + $0x1a8] sm:$0xff] }
 0x2d6   :  { %1884 = vmatprep.subr.bf16.mxu0 %v1652_v52  ;;  %2048 = vmatprep.subr.bf16.mxu1 %v1654_v53  ;;  %v1242_v52 = vld [vmem:[#allocation2 + $0x1b8] sm:$0xff]  ;;  %v1239_v53 = vld [vmem:[#allocation2 + $0x1a0] sm:$0xff] }
 0x2d9   :  { %1885 = vmatpush1.bf16.msra.mxu0 %v1651_v54  ;;  %2049 = vmatpush1.bf16.msra.mxu1 %v1653_v55  ;;  %v1241_v54 = vld [vmem:[#allocation2 + $0x1b0] sm:$0xff]  ;;  %v1248_v55 = vld [vmem:[#allocation2 + $0x1e8] sm:$0xff] }
 0x2da   :  { %1886 = vmatprep.subr.bf16.mxu0 %v1660_v56  ;;  %2050 = vmatprep.subr.bf16.mxu1 %v1662_v58  ;;  %v1250_v56 = vld [vmem:[#allocation2 + $0x1f8] sm:$0xff]  ;;  %v1247_v58 = vld [vmem:[#allocation2 + $0x1e0] sm:$0xff] }
 0x2dd   :  { %1887 = vmatpush1.bf16.msra.mxu0 %v1659_v59  ;;  %2051 = vmatpush1.bf16.msra.mxu1 %v1661_v61  ;;  %v1249_v59 = vld [vmem:[#allocation2 + $0x1f0] sm:$0xff]  ;;  %v1256_v61 = vld [vmem:[#allocation2 + $0x228] sm:$0xff] }
 0x2de   :  { %1888 = vmatprep.subr.bf16.mxu0 %v1668_v1  ;;  %2052 = vmatprep.subr.bf16.mxu1 %v1670_v2  ;;  %v1258_v1 = vld [vmem:[#allocation2 + $0x238] sm:$0xff]  ;;  %v1255_v2 = vld [vmem:[#allocation2 + $0x220] sm:$0xff] }
 0x2e1   :  { %1889 = vmatpush1.bf16.msra.mxu0 %v1667_v3  ;;  %2053 = vmatpush1.bf16.msra.mxu1 %v1669_v4  ;;  %v1257_v3 = vld [vmem:[#allocation2 + $0x230] sm:$0xff]  ;;  %v1264_v4 = vld [vmem:[#allocation2 + $0x268] sm:$0xff] }
 0x2e2   :  { %1890 = vmatprep.subr.bf16.mxu0 %v1676_v5  ;;  %2054 = vmatprep.subr.bf16.mxu1 %v1678_v6  ;;  %v1266_v5 = vld [vmem:[#allocation2 + $0x278] sm:$0xff]  ;;  %v1263_v6 = vld [vmem:[#allocation2 + $0x260] sm:$0xff] }
 0x2e5   :  { %1891 = vmatpush1.bf16.msra.mxu0 %v1675_v7  ;;  %2055 = vmatpush1.bf16.msra.mxu1 %v1677_v9  ;;  %v1265_v7 = vld [vmem:[#allocation2 + $0x270] sm:$0xff]  ;;  %v1272_v9 = vld [vmem:[#allocation2 + $0x2a8] sm:$0xff] }
 0x2e6   :  { %1892 = vmatprep.subr.bf16.mxu0 %v1684_v14  ;;  %2056 = vmatprep.subr.bf16.mxu1 %v1686_v15  ;;  %v1274_v14 = vld [vmem:[#allocation2 + $0x2b8] sm:$0xff]  ;;  %v1271_v15 = vld [vmem:[#allocation2 + $0x2a0] sm:$0xff] }
 0x2e9   :  { %1893 = vmatpush1.bf16.msra.mxu0 %v1683_v16  ;;  %2057 = vmatpush1.bf16.msra.mxu1 %v1685_v17  ;;  %v1273_v16 = vld [vmem:[#allocation2 + $0x2b0] sm:$0xff]  ;;  %v1280_v17 = vld [vmem:[#allocation2 + $0x2e8] sm:$0xff] }
 0x2ea   :  { %1894 = vmatprep.subr.bf16.mxu0 %v1692_v12  ;;  %2058 = vmatprep.subr.bf16.mxu1 %v1694_v18  ;;  %v1282_v12 = vld [vmem:[#allocation2 + $0x2f8] sm:$0xff]  ;;  %v1279_v18 = vld [vmem:[#allocation2 + $0x2e0] sm:$0xff] }
 0x2ed   :  { %1895 = vmatpush1.bf16.msra.mxu0 %v1691_v19  ;;  %2059 = vmatpush1.bf16.msra.mxu1 %v1693_v20  ;;  %v1281_v19 = vld [vmem:[#allocation2 + $0x2f0] sm:$0xff]  ;;  %v1288_v20 = vld [vmem:[#allocation2 + $0x328] sm:$0xff] }
 0x2ee   :  { %2069 = vmatprep.subr.bf16.mxu0 %v1192_v21  ;;  %2233 = vmatprep.subr.bf16.mxu1 %v1194_v22  ;;  %v1290_v21 = vld [vmem:[#allocation2 + $0x338] sm:$0xff]  ;;  %v1287_v22 = vld [vmem:[#allocation2 + $0x320] sm:$0xff] }
 0x2f0   :  { %1897 = vmatmul.mubr.bf16.vlgmr.msra.gmra.mrb[8].mxu0 %v4689_v62  ;;  %2061 = vmatmul.mubr.bf16.vlgmr.msra.gmra.mrb[8].mxu1 %v4689_v62 }
 0x2f1   :  { %2070 = vmatpush1.bf16.msra.mxu0 %v1191_v23  ;;  %2234 = vmatpush1.bf16.msra.mxu1 %v1193_v24  ;;  %v1289_v23 = vld [vmem:[#allocation2 + $0x330] sm:$0xff]  ;;  %v1296_v24 = vld [vmem:[#allocation2 + $0x368] sm:$0xff] }
 0x2f2   :  { %2071 = vmatprep.subr.bf16.mxu0 %v1200_v25  ;;  %2235 = vmatprep.subr.bf16.mxu1 %v1202_v26  ;;  %v1298_v25 = vld [vmem:[#allocation2 + $0x378] sm:$0xff]  ;;  %v1295_v26 = vld [vmem:[#allocation2 + $0x360] sm:$0xff] }
 0x2f3   :  { %2101 = vmatprep.mubr.bf16.mxu0 %v4671_v35  ;;  %2265 = vmatprep.mubr.bf16.mxu1 %v4671_v35  ;;  %v1223_v35 = vld [vmem:[#allocation2 + $0x120] sm:$0xff] }
 0x2f5   :  { %2072 = vmatpush1.bf16.msra.mxu0 %v1199_v27  ;;  %2236 = vmatpush1.bf16.msra.mxu1 %v1201_v28  ;;  %v1297_v27 = vld [vmem:[#allocation2 + $0x370] sm:$0xff]  ;;  %v1304_v28 = vld [vmem:[#allocation2 + $0x3a8] sm:$0xff] }
 0x2f6   :  { %2073 = vmatprep.subr.bf16.mxu0 %v1208_v29  ;;  %2237 = vmatprep.subr.bf16.mxu1 %v1210_v30  ;;  %v1306_v29 = vld [vmem:[#allocation2 + $0x3b8] sm:$0xff]  ;;  %v1303_v30 = vld [vmem:[#allocation2 + $0x3a0] sm:$0xff] }
 0x2f9   :  { %2074 = vmatpush1.bf16.msra.mxu0 %v1207_v31  ;;  %2238 = vmatpush1.bf16.msra.mxu1 %v1209_v33  ;;  %v1305_v31 = vld [vmem:[#allocation2 + $0x3b0] sm:$0xff]  ;;  %v1312_v33 = vld [vmem:[#allocation2 + $0x3e8] sm:$0xff] }
 0x2fa   :  { %2075 = vmatprep.subr.bf16.mxu0 %v1216_v41  ;;  %2239 = vmatprep.subr.bf16.mxu1 %v1218_v57  ;;  %v1314_v41 = vld [vmem:[#allocation2 + $0x3f8] sm:$0xff]  ;;  %v1311_v57 = vld [vmem:[#allocation2 + $0x3e0] sm:$0xff] }
 0x2fd   :  { %2076 = vmatpush1.bf16.msra.mxu0 %v1215_v42  ;;  %2240 = vmatpush1.bf16.msra.mxu1 %v1217_v43  ;;  %v1313_v42 = vld [vmem:[#allocation2 + $0x3f0] sm:$0xff]  ;;  %v1320_v43 = vld [vmem:[#allocation2 + $0x428] sm:$0xff] }
 0x2fe   :  { %2077 = vmatprep.subr.bf16.mxu0 %v1224_v44  ;;  %2241 = vmatprep.subr.bf16.mxu1 %v1226_v45  ;;  %v1322_v44 = vld [vmem:[#allocation2 + $0x438] sm:$0xff]  ;;  %v1319_v45 = vld [vmem:[#allocation2 + $0x420] sm:$0xff] }
 0x301   :  { %2078 = vmatpush1.bf16.msra.mxu0 %v1223_v35  ;;  %2242 = vmatpush1.bf16.msra.mxu1 %v1225_v46  ;;  %v1321_v35 = vld [vmem:[#allocation2 + $0x430] sm:$0xff]  ;;  %v1328_v46 = vld [vmem:[#allocation2 + $0x468] sm:$0xff] }
 0x302   :  { %2079 = vmatprep.subr.bf16.mxu0 %v1232_v47  ;;  %2243 = vmatprep.subr.bf16.mxu1 %v1234_v48  ;;  %v1330_v47 = vld [vmem:[#allocation2 + $0x478] sm:$0xff]  ;;  %v1327_v48 = vld [vmem:[#allocation2 + $0x460] sm:$0xff] }
 0x305   :  { %2080 = vmatpush1.bf16.msra.mxu0 %v1231_v49  ;;  %2244 = vmatpush1.bf16.msra.mxu1 %v1233_v50  ;;  %v1329_v49 = vld [vmem:[#allocation2 + $0x470] sm:$0xff]  ;;  %v1336_v50 = vld [vmem:[#allocation2 + $0x4a8] sm:$0xff] }
 0x306   :  { %2081 = vmatprep.subr.bf16.mxu0 %v1240_v51  ;;  %2245 = vmatprep.subr.bf16.mxu1 %v1242_v52  ;;  %v1338_v51 = vld [vmem:[#allocation2 + $0x4b8] sm:$0xff]  ;;  %v1335_v52 = vld [vmem:[#allocation2 + $0x4a0] sm:$0xff] }
 0x309   :  { %2082 = vmatpush1.bf16.msra.mxu0 %v1239_v53  ;;  %2246 = vmatpush1.bf16.msra.mxu1 %v1241_v54  ;;  %v1337_v53 = vld [vmem:[#allocation2 + $0x4b0] sm:$0xff]  ;;  %v1344_v54 = vld [vmem:[#allocation2 + $0x4e8] sm:$0xff] }
 0x30a   :  { %2083 = vmatprep.subr.bf16.mxu0 %v1248_v55  ;;  %2247 = vmatprep.subr.bf16.mxu1 %v1250_v56  ;;  %v1343_v55 = vld [vmem:[#allocation2 + $0x4e0] sm:$0xff]  ;;  %v1345_v56 = vld [vmem:[#allocation2 + $0x4f0] sm:$0xff] }
 0x30d   :  { %2084 = vmatpush1.bf16.msra.mxu0 %v1247_v58  ;;  %2248 = vmatpush1.bf16.msra.mxu1 %v1249_v59  ;;  %v1352_v58 = vld [vmem:[#allocation2 + $0x528] sm:$0xff]  ;;  %v1354_v59 = vld [vmem:[#allocation2 + $0x538] sm:$0xff] }
 0x30e   :  { %2085 = vmatprep.subr.bf16.mxu0 %v1256_v61  ;;  %2249 = vmatprep.subr.bf16.mxu1 %v1258_v1  ;;  %v1353_v61 = vld [vmem:[#allocation2 + $0x530] sm:$0xff]  ;;  %v1360_v1 = vld [vmem:[#allocation2 + $0x568] sm:$0xff] }
 0x311   :  { %2086 = vmatpush1.bf16.msra.mxu0 %v1255_v2  ;;  %2250 = vmatpush1.bf16.msra.mxu1 %v1257_v3  ;;  %v1362_v2 = vld [vmem:[#allocation2 + $0x578] sm:$0xff]  ;;  %v1359_v3 = vld [vmem:[#allocation2 + $0x560] sm:$0xff] }
 0x312   :  { %2087 = vmatprep.subr.bf16.mxu0 %v1264_v4  ;;  %2251 = vmatprep.subr.bf16.mxu1 %v1266_v5  ;;  %v1361_v4 = vld [vmem:[#allocation2 + $0x570] sm:$0xff]  ;;  %v1368_v5 = vld [vmem:[#allocation2 + $0x5a8] sm:$0xff] }
 0x315   :  { %2088 = vmatpush1.bf16.msra.mxu0 %v1263_v6  ;;  %2252 = vmatpush1.bf16.msra.mxu1 %v1265_v7  ;;  %v1370_v6 = vld [vmem:[#allocation2 + $0x5b8] sm:$0xff]  ;;  %v1367_v7 = vld [vmem:[#allocation2 + $0x5a0] sm:$0xff] }
 0x316   :  { %2089 = vmatprep.subr.bf16.mxu0 %v1272_v9  ;;  %2253 = vmatprep.subr.bf16.mxu1 %v1274_v14  ;;  %v1369_v9 = vld [vmem:[#allocation2 + $0x5b0] sm:$0xff]  ;;  %v1376_v14 = vld [vmem:[#allocation2 + $0x5e8] sm:$0xff] }
 0x319   :  { %2090 = vmatpush1.bf16.msra.mxu0 %v1271_v15  ;;  %2254 = vmatpush1.bf16.msra.mxu1 %v1273_v16  ;;  %v1378_v15 = vld [vmem:[#allocation2 + $0x5f8] sm:$0xff]  ;;  %v1375_v16 = vld [vmem:[#allocation2 + $0x5e0] sm:$0xff] }
 0x31a   :  { %2091 = vmatprep.subr.bf16.mxu0 %v1280_v17  ;;  %2255 = vmatprep.subr.bf16.mxu1 %v1282_v12  ;;  %v1377_v17 = vld [vmem:[#allocation2 + $0x5f0] sm:$0xff]  ;;  %v1384_v12 = vld [vmem:[#allocation2 + $0x628] sm:$0xff] }
 0x31d   :  { %2092 = vmatpush1.bf16.msra.mxu0 %v1279_v18  ;;  %2256 = vmatpush1.bf16.msra.mxu1 %v1281_v19  ;;  %v1386_v18 = vld [vmem:[#allocation2 + $0x638] sm:$0xff]  ;;  %v1383_v19 = vld [vmem:[#allocation2 + $0x620] sm:$0xff] }
 0x31e   :  { %2093 = vmatprep.subr.bf16.mxu0 %v1288_v20  ;;  %2257 = vmatprep.subr.bf16.mxu1 %v1290_v21  ;;  %v1385_v20 = vld [vmem:[#allocation2 + $0x630] sm:$0xff]  ;;  %v1392_v21 = vld [vmem:[#allocation2 + $0x668] sm:$0xff] }
 0x321   :  { %2094 = vmatpush1.bf16.msra.mxu0 %v1287_v22  ;;  %2258 = vmatpush1.bf16.msra.mxu1 %v1289_v23  ;;  %v1394_v22 = vld [vmem:[#allocation2 + $0x678] sm:$0xff]  ;;  %v1391_v23 = vld [vmem:[#allocation2 + $0x660] sm:$0xff] }
 0x322   :  { %2095 = vmatprep.subr.bf16.mxu0 %v1296_v24  ;;  %2259 = vmatprep.subr.bf16.mxu1 %v1298_v25  ;;  %v1393_v24 = vld [vmem:[#allocation2 + $0x670] sm:$0xff]  ;;  %v1400_v25 = vld [vmem:[#allocation2 + $0x6a8] sm:$0xff] }
 0x325   :  { %2096 = vmatpush1.bf16.msra.mxu0 %v1295_v26  ;;  %2260 = vmatpush1.bf16.msra.mxu1 %v1297_v27  ;;  %v1402_v26 = vld [vmem:[#allocation2 + $0x6b8] sm:$0xff]  ;;  %v1399_v27 = vld [vmem:[#allocation2 + $0x6a0] sm:$0xff] }
 0x326   :  { %2097 = vmatprep.subr.bf16.mxu0 %v1304_v28  ;;  %2261 = vmatprep.subr.bf16.mxu1 %v1306_v29  ;;  %v1401_v28 = vld [vmem:[#allocation2 + $0x6b0] sm:$0xff]  ;;  %v1408_v29 = vld [vmem:[#allocation2 + $0x6e8] sm:$0xff] }
 0x329   :  { %2098 = vmatpush1.bf16.msra.mxu0 %v1303_v30  ;;  %2262 = vmatpush1.bf16.msra.mxu1 %v1305_v31  ;;  %v1410_v30 = vld [vmem:[#allocation2 + $0x6f8] sm:$0xff]  ;;  %v1407_v31 = vld [vmem:[#allocation2 + $0x6e0] sm:$0xff] }
 0x32a   :  { %2099 = vmatprep.subr.bf16.mxu0 %v1312_v33  ;;  %2263 = vmatprep.subr.bf16.mxu1 %v1314_v41  ;;  %v1409_v33 = vld [vmem:[#allocation2 + $0x6f0] sm:$0xff]  ;;  %v1416_v41 = vld [vmem:[#allocation2 + $0x728] sm:$0xff] }
 0x32d   :  { %2100 = vmatpush1.bf16.msra.mxu0 %v1311_v57  ;;  %2264 = vmatpush1.bf16.msra.mxu1 %v1313_v42  ;;  %v1418_v57 = vld [vmem:[#allocation2 + $0x738] sm:$0xff]  ;;  %v1415_v42 = vld [vmem:[#allocation2 + $0x720] sm:$0xff] }
 0x32e   :  { %2110 = vmatprep.subr.bf16.mxu0 %v1320_v43  ;;  %2274 = vmatprep.subr.bf16.mxu1 %v1322_v44  ;;  %v1417_v43 = vld [vmem:[#allocation2 + $0x730] sm:$0xff]  ;;  %v1424_v44 = vld [vmem:[#allocation2 + $0x768] sm:$0xff] }
 0x330   :  { %2102 = vmatmul.mubr.bf16.vlgmr.msra.gmra.mrb[12].mxu0 %v4667_v32  ;;  %2266 = vmatmul.mubr.bf16.vlgmr.msra.gmra.mrb[12].mxu1 %v4667_v32  ;;  %v1346_v32 = vld [vmem:[#allocation2 + $0x4f8] sm:$0xff] }
 0x331   :  { %2111 = vmatpush1.bf16.msra.mxu0 %v1319_v45  ;;  %2275 = vmatpush1.bf16.msra.mxu1 %v1321_v35  ;;  %v1426_v45 = vld [vmem:[#allocation2 + $0x778] sm:$0xff]  ;;  %v1423_v35 = vld [vmem:[#allocation2 + $0x760] sm:$0xff] }
 0x332   :  { %2112 = vmatprep.subr.bf16.mxu0 %v1328_v46  ;;  %2276 = vmatprep.subr.bf16.mxu1 %v1330_v47  ;;  %v1425_v46 = vld [vmem:[#allocation2 + $0x770] sm:$0xff]  ;;  %v1432_v47 = vld [vmem:[#allocation2 + $0x7a8] sm:$0xff] }
 0x333   :  { %2142 = vmatprep.mubr.bf16.mxu0 %v4673_v36  ;;  %2306 = vmatprep.mubr.bf16.mxu1 %v4673_v36  ;;  %v1351_v36 = vld [vmem:[#allocation2 + $0x520] sm:$0xff] }
 0x335   :  { %2113 = vmatpush1.bf16.msra.mxu0 %v1327_v48  ;;  %2277 = vmatpush1.bf16.msra.mxu1 %v1329_v49  ;;  %v1434_v48 = vld [vmem:[#allocation2 + $0x7b8] sm:$0xff]  ;;  %v1431_v49 = vld [vmem:[#allocation2 + $0x7a0] sm:$0xff] }
 0x336   :  { %2114 = vmatprep.subr.bf16.mxu0 %v1336_v50  ;;  %2278 = vmatprep.subr.bf16.mxu1 %v1338_v51  ;;  %v1433_v50 = vld [vmem:[#allocation2 + $0x7b0] sm:$0xff]  ;;  %v1440_v51 = vld [vmem:[#allocation2 + $0x7e8] sm:$0xff] }
 0x339   :  { %2115 = vmatpush1.bf16.msra.mxu0 %v1335_v52  ;;  %2279 = vmatpush1.bf16.msra.mxu1 %v1337_v53  ;;  %v1442_v52 = vld [vmem:[#allocation2 + $0x7f8] sm:$0xff]  ;;  %v1439_v53 = vld [vmem:[#allocation2 + $0x7e0] sm:$0xff] }
 0x33a   :  { %2116 = vmatprep.subr.bf16.mxu0 %v1344_v54  ;;  %2280 = vmatprep.subr.bf16.mxu1 %v1346_v32  ;;  %v1441_v54 = vld [vmem:[#allocation2 + $0x7f0] sm:$0xff]  ;;  %v1448_v32 = vld [vmem:[#allocation2 + $0x828] sm:$0xff] }
 0x33d   :  { %2117 = vmatpush1.bf16.msra.mxu0 %v1343_v55  ;;  %2281 = vmatpush1.bf16.msra.mxu1 %v1345_v56  ;;  %v1450_v55 = vld [vmem:[#allocation2 + $0x838] sm:$0xff]  ;;  %v1447_v56 = vld [vmem:[#allocation2 + $0x820] sm:$0xff] }
 0x33e   :  { %2118 = vmatprep.subr.bf16.mxu0 %v1352_v58  ;;  %2282 = vmatprep.subr.bf16.mxu1 %v1354_v59  ;;  %v1449_v58 = vld [vmem:[#allocation2 + $0x830] sm:$0xff]  ;;  %v1456_v59 = vld [vmem:[#allocation2 + $0x868] sm:$0xff] }
 0x341   :  { %2119 = vmatpush1.bf16.msra.mxu0 %v1351_v36  ;;  %2283 = vmatpush1.bf16.msra.mxu1 %v1353_v61  ;;  %v1458_v36 = vld [vmem:[#allocation2 + $0x878] sm:$0xff]  ;;  %v1455_v61 = vld [vmem:[#allocation2 + $0x860] sm:$0xff] }
 0x342   :  { %2120 = vmatprep.subr.bf16.mxu0 %v1360_v1  ;;  %2284 = vmatprep.subr.bf16.mxu1 %v1362_v2  ;;  %v1457_v1 = vld [vmem:[#allocation2 + $0x870] sm:$0xff]  ;;  %v1464_v2 = vld [vmem:[#allocation2 + $0x8a8] sm:$0xff] }
 0x345   :  { %2121 = vmatpush1.bf16.msra.mxu0 %v1359_v3  ;;  %2285 = vmatpush1.bf16.msra.mxu1 %v1361_v4  ;;  %v1466_v3 = vld [vmem:[#allocation2 + $0x8b8] sm:$0xff]  ;;  %v1463_v4 = vld [vmem:[#allocation2 + $0x8a0] sm:$0xff] }
 0x346   :  { %2122 = vmatprep.subr.bf16.mxu0 %v1368_v5  ;;  %2286 = vmatprep.subr.bf16.mxu1 %v1370_v6  ;;  %v1465_v5 = vld [vmem:[#allocation2 + $0x8b0] sm:$0xff]  ;;  %v1472_v6 = vld [vmem:[#allocation2 + $0x8e8] sm:$0xff] }
 0x349   :  { %2123 = vmatpush1.bf16.msra.mxu0 %v1367_v7  ;;  %2287 = vmatpush1.bf16.msra.mxu1 %v1369_v9  ;;  %v1471_v7 = vld [vmem:[#allocation2 + $0x8e0] sm:$0xff]  ;;  %v1473_v9 = vld [vmem:[#allocation2 + $0x8f0] sm:$0xff] }
 0x34a   :  { %2124 = vmatprep.subr.bf16.mxu0 %v1376_v14  ;;  %2288 = vmatprep.subr.bf16.mxu1 %v1378_v15  ;;  %v1480_v14 = vld [vmem:[#allocation2 + $0x928] sm:$0xff]  ;;  %v1482_v15 = vld [vmem:[#allocation2 + $0x938] sm:$0xff] }
 0x34d   :  { %2125 = vmatpush1.bf16.msra.mxu0 %v1375_v16  ;;  %2289 = vmatpush1.bf16.msra.mxu1 %v1377_v17  ;;  %v1481_v16 = vld [vmem:[#allocation2 + $0x930] sm:$0xff]  ;;  %v1488_v17 = vld [vmem:[#allocation2 + $0x968] sm:$0xff] }
 0x34e   :  { %2126 = vmatprep.subr.bf16.mxu0 %v1384_v12  ;;  %2290 = vmatprep.subr.bf16.mxu1 %v1386_v18  ;;  %v1490_v12 = vld [vmem:[#allocation2 + $0x978] sm:$0xff]  ;;  %v1487_v18 = vld [vmem:[#allocation2 + $0x960] sm:$0xff] }
 0x351   :  { %2127 = vmatpush1.bf16.msra.mxu0 %v1383_v19  ;;  %2291 = vmatpush1.bf16.msra.mxu1 %v1385_v20  ;;  %v1489_v19 = vld [vmem:[#allocation2 + $0x970] sm:$0xff]  ;;  %v1496_v20 = vld [vmem:[#allocation2 + $0x9a8] sm:$0xff] }
 0x352   :  { %2128 = vmatprep.subr.bf16.mxu0 %v1392_v21  ;;  %2292 = vmatprep.subr.bf16.mxu1 %v1394_v22  ;;  %v1498_v21 = vld [vmem:[#allocation2 + $0x9b8] sm:$0xff]  ;;  %v1495_v22 = vld [vmem:[#allocation2 + $0x9a0] sm:$0xff] }
 0x355   :  { %2129 = vmatpush1.bf16.msra.mxu0 %v1391_v23  ;;  %2293 = vmatpush1.bf16.msra.mxu1 %v1393_v24  ;;  %v1497_v23 = vld [vmem:[#allocation2 + $0x9b0] sm:$0xff]  ;;  %v1504_v24 = vld [vmem:[#allocation2 + $0x9e8] sm:$0xff] }
 0x356   :  { %2130 = vmatprep.subr.bf16.mxu0 %v1400_v25  ;;  %2294 = vmatprep.subr.bf16.mxu1 %v1402_v26  ;;  %v1506_v25 = vld [vmem:[#allocation2 + $0x9f8] sm:$0xff]  ;;  %v1503_v26 = vld [vmem:[#allocation2 + $0x9e0] sm:$0xff] }
 0x359   :  { %2131 = vmatpush1.bf16.msra.mxu0 %v1399_v27  ;;  %2295 = vmatpush1.bf16.msra.mxu1 %v1401_v28  ;;  %v1505_v27 = vld [vmem:[#allocation2 + $0x9f0] sm:$0xff]  ;;  %v1512_v28 = vld [vmem:[#allocation2 + $0xa28] sm:$0xff] }
 0x35a   :  { %2132 = vmatprep.subr.bf16.mxu0 %v1408_v29  ;;  %2296 = vmatprep.subr.bf16.mxu1 %v1410_v30  ;;  %v1514_v29 = vld [vmem:[#allocation2 + $0xa38] sm:$0xff]  ;;  %v1511_v30 = vld [vmem:[#allocation2 + $0xa20] sm:$0xff] }
 0x35d   :  { %2133 = vmatpush1.bf16.msra.mxu0 %v1407_v31  ;;  %2297 = vmatpush1.bf16.msra.mxu1 %v1409_v33  ;;  %v1513_v31 = vld [vmem:[#allocation2 + $0xa30] sm:$0xff]  ;;  %v1520_v33 = vld [vmem:[#allocation2 + $0xa68] sm:$0xff] }
 0x35e   :  { %2134 = vmatprep.subr.bf16.mxu0 %v1416_v41  ;;  %2298 = vmatprep.subr.bf16.mxu1 %v1418_v57  ;;  %v1522_v41 = vld [vmem:[#allocation2 + $0xa78] sm:$0xff]  ;;  %v1519_v57 = vld [vmem:[#allocation2 + $0xa60] sm:$0xff] }
 0x361   :  { %2135 = vmatpush1.bf16.msra.mxu0 %v1415_v42  ;;  %2299 = vmatpush1.bf16.msra.mxu1 %v1417_v43  ;;  %v1521_v42 = vld [vmem:[#allocation2 + $0xa70] sm:$0xff]  ;;  %v1528_v43 = vld [vmem:[#allocation2 + $0xaa8] sm:$0xff] }
 0x362   :  { %2136 = vmatprep.subr.bf16.mxu0 %v1424_v44  ;;  %2300 = vmatprep.subr.bf16.mxu1 %v1426_v45  ;;  %v1530_v44 = vld [vmem:[#allocation2 + $0xab8] sm:$0xff]  ;;  %v1527_v45 = vld [vmem:[#allocation2 + $0xaa0] sm:$0xff] }
 0x365   :  { %2137 = vmatpush1.bf16.msra.mxu0 %v1423_v35  ;;  %2301 = vmatpush1.bf16.msra.mxu1 %v1425_v46  ;;  %v1529_v35 = vld [vmem:[#allocation2 + $0xab0] sm:$0xff]  ;;  %v1536_v46 = vld [vmem:[#allocation2 + $0xae8] sm:$0xff] }
 0x366   :  { %2138 = vmatprep.subr.bf16.mxu0 %v1432_v47  ;;  %2302 = vmatprep.subr.bf16.mxu1 %v1434_v48  ;;  %v1538_v47 = vld [vmem:[#allocation2 + $0xaf8] sm:$0xff]  ;;  %v1535_v48 = vld [vmem:[#allocation2 + $0xae0] sm:$0xff] }
 0x369   :  { %2139 = vmatpush1.bf16.msra.mxu0 %v1431_v49  ;;  %2303 = vmatpush1.bf16.msra.mxu1 %v1433_v50  ;;  %v1537_v49 = vld [vmem:[#allocation2 + $0xaf0] sm:$0xff]  ;;  %v1544_v50 = vld [vmem:[#allocation2 + $0xb28] sm:$0xff] }
 0x36a   :  { %2140 = vmatprep.subr.bf16.mxu0 %v1440_v51  ;;  %2304 = vmatprep.subr.bf16.mxu1 %v1442_v52  ;;  %v1546_v51 = vld [vmem:[#allocation2 + $0xb38] sm:$0xff]  ;;  %v1543_v52 = vld [vmem:[#allocation2 + $0xb20] sm:$0xff] }
 0x36d   :  { %2141 = vmatpush1.bf16.msra.mxu0 %v1439_v53  ;;  %2305 = vmatpush1.bf16.msra.mxu1 %v1441_v54  ;;  %v1545_v53 = vld [vmem:[#allocation2 + $0xb30] sm:$0xff]  ;;  %v1552_v54 = vld [vmem:[#allocation2 + $0xb68] sm:$0xff] }
 0x36e   :  { %2151 = vmatprep.subr.bf16.mxu0 %v1448_v32  ;;  %2315 = vmatprep.subr.bf16.mxu1 %v1450_v55  ;;  %v1554_v32 = vld [vmem:[#allocation2 + $0xb78] sm:$0xff]  ;;  %v1551_v55 = vld [vmem:[#allocation2 + $0xb60] sm:$0xff] }
 0x370   :  { %2143 = vmatmul.mubr.bf16.vlgmr.msra.gmra.mrb[12].mxu0 %v4669_v34  ;;  %2307 = vmatmul.mubr.bf16.vlgmr.msra.gmra.mrb[12].mxu1 %v4669_v34  ;;  %v1474_v34 = vld [vmem:[#allocation2 + $0x8f8] sm:$0xff] }
 0x371   :  { %2152 = vmatpush1.bf16.msra.mxu0 %v1447_v56  ;;  %2316 = vmatpush1.bf16.msra.mxu1 %v1449_v58  ;;  %v1553_v56 = vld [vmem:[#allocation2 + $0xb70] sm:$0xff]  ;;  %v1560_v58 = vld [vmem:[#allocation2 + $0xba8] sm:$0xff] }
 0x372   :  { %2153 = vmatprep.subr.bf16.mxu0 %v1456_v59  ;;  %2317 = vmatprep.subr.bf16.mxu1 %v1458_v36  ;;  %v1562_v59 = vld [vmem:[#allocation2 + $0xbb8] sm:$0xff]  ;;  %v1559_v36 = vld [vmem:[#allocation2 + $0xba0] sm:$0xff] }
 0x373   :  { %2183 = vmatprep.mubr.bf16.mxu0 %v4691_v63  ;;  %2347 = vmatprep.mubr.bf16.mxu1 %v4691_v63  ;;  %v1479_v63 = vld [vmem:[#allocation2 + $0x920] sm:$0xff] }
 0x375   :  { %2154 = vmatpush1.bf16.msra.mxu0 %v1455_v61  ;;  %2318 = vmatpush1.bf16.msra.mxu1 %v1457_v1  ;;  %v1561_v61 = vld [vmem:[#allocation2 + $0xbb0] sm:$0xff]  ;;  %v1568_v1 = vld [vmem:[#allocation2 + $0xbe8] sm:$0xff] }
 0x376   :  { %2155 = vmatprep.subr.bf16.mxu0 %v1464_v2  ;;  %2319 = vmatprep.subr.bf16.mxu1 %v1466_v3  ;;  %v1570_v2 = vld [vmem:[#allocation2 + $0xbf8] sm:$0xff]  ;;  %v1567_v3 = vld [vmem:[#allocation2 + $0xbe0] sm:$0xff] }
 0x379   :  { %2156 = vmatpush1.bf16.msra.mxu0 %v1463_v4  ;;  %2320 = vmatpush1.bf16.msra.mxu1 %v1465_v5  ;;  %v1569_v4 = vld [vmem:[#allocation2 + $0xbf0] sm:$0xff]  ;;  %v1576_v5 = vld [vmem:[#allocation2 + $0xc28] sm:$0xff] }
 0x37a   :  { %2157 = vmatprep.subr.bf16.mxu0 %v1472_v6  ;;  %2321 = vmatprep.subr.bf16.mxu1 %v1474_v34  ;;  %v1578_v6 = vld [vmem:[#allocation2 + $0xc38] sm:$0xff]  ;;  %v1575_v34 = vld [vmem:[#allocation2 + $0xc20] sm:$0xff] }
 0x37d   :  { %2158 = vmatpush1.bf16.msra.mxu0 %v1471_v7  ;;  %2322 = vmatpush1.bf16.msra.mxu1 %v1473_v9  ;;  %v1577_v7 = vld [vmem:[#allocation2 + $0xc30] sm:$0xff]  ;;  %v1584_v9 = vld [vmem:[#allocation2 + $0xc68] sm:$0xff] }
 0x37e   :  { %2159 = vmatprep.subr.bf16.mxu0 %v1480_v14  ;;  %2323 = vmatprep.subr.bf16.mxu1 %v1482_v15  ;;  %v1586_v14 = vld [vmem:[#allocation2 + $0xc78] sm:$0xff]  ;;  %v1583_v15 = vld [vmem:[#allocation2 + $0xc60] sm:$0xff] }
 0x381   :  { %2160 = vmatpush1.bf16.msra.mxu0 %v1479_v63  ;;  %2324 = vmatpush1.bf16.msra.mxu1 %v1481_v16  ;;  %v1585_v63 = vld [vmem:[#allocation2 + $0xc70] sm:$0xff]  ;;  %v1592_v16 = vld [vmem:[#allocation2 + $0xca8] sm:$0xff] }
 0x382   :  { %2161 = vmatprep.subr.bf16.mxu0 %v1488_v17  ;;  %2325 = vmatprep.subr.bf16.mxu1 %v1490_v12  ;;  %v1594_v17 = vld [vmem:[#allocation2 + $0xcb8] sm:$0xff]  ;;  %v1591_v12 = vld [vmem:[#allocation2 + $0xca0] sm:$0xff] }
 0x385   :  { %2162 = vmatpush1.bf16.msra.mxu0 %v1487_v18  ;;  %2326 = vmatpush1.bf16.msra.mxu1 %v1489_v19  ;;  %v1593_v18 = vld [vmem:[#allocation2 + $0xcb0] sm:$0xff]  ;;  %v1600_v19 = vld [vmem:[#allocation2 + $0xce8] sm:$0xff] }
 0x386   :  { %2163 = vmatprep.subr.bf16.mxu0 %v1496_v20  ;;  %2327 = vmatprep.subr.bf16.mxu1 %v1498_v21  ;;  %v1599_v20 = vld [vmem:[#allocation2 + $0xce0] sm:$0xff]  ;;  %v1601_v21 = vld [vmem:[#allocation2 + $0xcf0] sm:$0xff] }
 0x389   :  { %2164 = vmatpush1.bf16.msra.mxu0 %v1495_v22  ;;  %2328 = vmatpush1.bf16.msra.mxu1 %v1497_v23  ;;  %v1608_v22 = vld [vmem:[#allocation2 + $0xd28] sm:$0xff]  ;;  %v1610_v23 = vld [vmem:[#allocation2 + $0xd38] sm:$0xff] }
 0x38a   :  { %2165 = vmatprep.subr.bf16.mxu0 %v1504_v24  ;;  %2329 = vmatprep.subr.bf16.mxu1 %v1506_v25  ;;  %v4725_v24 = vld [vmem:[#allocation12] sm:$0xff]  ;;  %v1609_v25 = vld [vmem:[#allocation2 + $0xd30] sm:$0xff] }
 0x38d   :  { %2166 = vmatpush1.bf16.msra.mxu0 %v1503_v26  ;;  %2330 = vmatpush1.bf16.msra.mxu1 %v1505_v27  ;;  %v1616_v26 = vld [vmem:[#allocation2 + $0xd68] sm:$0xff]  ;;  %v1618_v27 = vld [vmem:[#allocation2 + $0xd78] sm:$0xff] }
 0x38e   :  { %2167 = vmatprep.subr.bf16.mxu0 %v1512_v28  ;;  %2331 = vmatprep.subr.bf16.mxu1 %v1514_v29  ;;  %v1704_v28 = vrot.slane %v4725_v24, %v4655_v8  ;;  %v1712_v29 = vrot.slane %v4725_v24, %v4657_v10 }
 0x391   :  { %2168 = vmatpush1.bf16.msra.mxu0 %v1511_v30  ;;  %2332 = vmatpush1.bf16.msra.mxu1 %v1513_v31  ;;  %v1708_v30 = vrot.slane %v4725_v24, %v4659_v11  ;;  %v1716_v31 = vrot.slane %v4725_v24, %v4661_v13 }
 0x392   :  { %2169 = vmatprep.subr.bf16.mxu0 %v1520_v33  ;;  %2333 = vmatprep.subr.bf16.mxu1 %v1522_v41  ;;  %v1615_v33 = vld [vmem:[#allocation2 + $0xd60] sm:$0xff]  ;;  %v1617_v41 = vld [vmem:[#allocation2 + $0xd70] sm:$0xff] }
 0x395   :  { %2170 = vmatpush1.bf16.msra.mxu0 %v1519_v57  ;;  %2334 = vmatpush1.bf16.msra.mxu1 %v1521_v42 }
 0x396   :  { %2171 = vmatprep.subr.bf16.mxu0 %v1528_v43  ;;  %2335 = vmatprep.subr.bf16.mxu1 %v1530_v44  ;;  %v1624_v43 = vld [vmem:[#allocation2 + $0xda8] sm:$0xff]  ;;  %v1626_v44 = vld [vmem:[#allocation2 + $0xdb8] sm:$0xff] }
 0x399   :  { %2172 = vmatpush1.bf16.msra.mxu0 %v1527_v45  ;;  %2336 = vmatpush1.bf16.msra.mxu1 %v1529_v35 }
 0x39a   :  { %2173 = vmatprep.subr.bf16.mxu0 %v1536_v46  ;;  %2337 = vmatprep.subr.bf16.mxu1 %v1538_v47 }
 0x39d   :  { %2174 = vmatpush1.bf16.msra.mxu0 %v1535_v48  ;;  %2338 = vmatpush1.bf16.msra.mxu1 %v1537_v49 }
 0x39e   :  { %2175 = vmatprep.subr.bf16.mxu0 %v1544_v50  ;;  %2339 = vmatprep.subr.bf16.mxu1 %v1546_v51 }
 0x3a1   :  { %2176 = vmatpush1.bf16.msra.mxu0 %v1543_v52  ;;  %2340 = vmatpush1.bf16.msra.mxu1 %v1545_v53 }
 0x3a2   :  { %2177 = vmatprep.subr.bf16.mxu0 %v1552_v54  ;;  %2341 = vmatprep.subr.bf16.mxu1 %v1554_v32 }
 0x3a5   :  { %2178 = vmatpush1.bf16.msra.mxu0 %v1551_v55  ;;  %2342 = vmatpush1.bf16.msra.mxu1 %v1553_v56  ;;  %v1623_v55 = vld [vmem:[#allocation2 + $0xda0] sm:$0xff]  ;;  %v1625_v56 = vld [vmem:[#allocation2 + $0xdb0] sm:$0xff] }
 0x3a6   :  { %2179 = vmatprep.subr.bf16.mxu0 %v1560_v58  ;;  %2343 = vmatprep.subr.bf16.mxu1 %v1562_v59 }
 0x3a9   :  { %2180 = vmatpush1.bf16.msra.mxu0 %v1559_v36  ;;  %2344 = vmatpush1.bf16.msra.mxu1 %v1561_v61  ;;  %v1632_v36 = vld [vmem:[#allocation2 + $0xde8] sm:$0xff]  ;;  %v1634_v61 = vld [vmem:[#allocation2 + $0xdf8] sm:$0xff] }
 0x3aa   :  { %2181 = vmatprep.subr.bf16.mxu0 %v1568_v1  ;;  %2345 = vmatprep.subr.bf16.mxu1 %v1570_v2 }
 0x3ad   :  { %2182 = vmatpush1.bf16.msra.mxu0 %v1567_v3  ;;  %2346 = vmatpush1.bf16.msra.mxu1 %v1569_v4 }
 0x3ae   :  { %2192 = vmatprep.subr.bf16.mxu0 %v1576_v5  ;;  %2356 = vmatprep.subr.bf16.mxu1 %v1578_v6  ;;  %v1631_v5 = vld [vmem:[#allocation2 + $0xde0] sm:$0xff]  ;;  %v1633_v6 = vld [vmem:[#allocation2 + $0xdf0] sm:$0xff] }
 0x3b0   :  { %2184 = vmatmul.mubr.bf16.vlgmr.msra.gmra.mrb[12].mxu0 %v4687_v60  ;;  %2348 = vmatmul.mubr.bf16.vlgmr.msra.gmra.mrb[12].mxu1 %v4687_v60  ;;  %v1602_v60 = vld [vmem:[#allocation2 + $0xcf8] sm:$0xff] }
 0x3b1   :  { %2193 = vmatpush1.bf16.msra.mxu0 %v1575_v34  ;;  %2357 = vmatpush1.bf16.msra.mxu1 %v1577_v7  ;;  %v1640_v34 = vld [vmem:[#allocation2 + $0xe28] sm:$0xff]  ;;  %v1642_v7 = vld [vmem:[#allocation2 + $0xe38] sm:$0xff] }
 0x3b2   :  { %2194 = vmatprep.subr.bf16.mxu0 %v1584_v9  ;;  %2358 = vmatprep.subr.bf16.mxu1 %v1586_v14  ;;  %v1639_v9 = vld [vmem:[#allocation2 + $0xe20] sm:$0xff]  ;;  %v1641_v14 = vld [vmem:[#allocation2 + $0xe30] sm:$0xff] }
 0x3b3   :  { %2224 = vmatprep.mubr.bf16.mxu0 %v4693_v0  ;;  %2388 = vmatprep.mubr.bf16.mxu1 %v4693_v0  ;;  %v1607_v0 = vld [vmem:[#allocation2 + $0xd20] sm:$0xff] }
 0x3b5   :  { %2195 = vmatpush1.bf16.msra.mxu0 %v1583_v15  ;;  %2359 = vmatpush1.bf16.msra.mxu1 %v1585_v63  ;;  %v1648_v15 = vld [vmem:[#allocation2 + $0xe68] sm:$0xff]  ;;  %v1650_v63 = vld [vmem:[#allocation2 + $0xe78] sm:$0xff] }
 0x3b6   :  { %2196 = vmatprep.subr.bf16.mxu0 %v1592_v16  ;;  %2360 = vmatprep.subr.bf16.mxu1 %v1594_v17  ;;  %v1647_v16 = vld [vmem:[#allocation2 + $0xe60] sm:$0xff]  ;;  %v1649_v17 = vld [vmem:[#allocation2 + $0xe70] sm:$0xff] }
 0x3b9   :  { %2197 = vmatpush1.bf16.msra.mxu0 %v1591_v12  ;;  %2361 = vmatpush1.bf16.msra.mxu1 %v1593_v18  ;;  %v1656_v12 = vld [vmem:[#allocation2 + $0xea8] sm:$0xff]  ;;  %v1658_v18 = vld [vmem:[#allocation2 + $0xeb8] sm:$0xff] }
 0x3ba   :  { %2198 = vmatprep.subr.bf16.mxu0 %v1600_v19  ;;  %2362 = vmatprep.subr.bf16.mxu1 %v1602_v60  ;;  %v1655_v19 = vld [vmem:[#allocation2 + $0xea0] sm:$0xff]  ;;  %v1657_v60 = vld [vmem:[#allocation2 + $0xeb0] sm:$0xff] }
 0x3bd   :  { %2199 = vmatpush1.bf16.msra.mxu0 %v1599_v20  ;;  %2363 = vmatpush1.bf16.msra.mxu1 %v1601_v21  ;;  %v1664_v20 = vld [vmem:[#allocation2 + $0xee8] sm:$0xff]  ;;  %v1666_v21 = vld [vmem:[#allocation2 + $0xef8] sm:$0xff] }
 0x3be   :  { %2200 = vmatprep.subr.bf16.mxu0 %v1608_v22  ;;  %2364 = vmatprep.subr.bf16.mxu1 %v1610_v23  ;;  %v1663_v22 = vld [vmem:[#allocation2 + $0xee0] sm:$0xff]  ;;  %v1665_v23 = vld [vmem:[#allocation2 + $0xef0] sm:$0xff] }
 0x3c1   :  { %2201 = vmatpush1.bf16.msra.mxu0 %v1607_v0  ;;  %2365 = vmatpush1.bf16.msra.mxu1 %v1609_v25  ;;  %v1672_v0 = vld [vmem:[#allocation2 + $0xf28] sm:$0xff]  ;;  %v1674_v25 = vld [vmem:[#allocation2 + $0xf38] sm:$0xff] }
 0x3c2   :  { %2202 = vmatprep.subr.bf16.mxu0 %v1616_v26  ;;  %2366 = vmatprep.subr.bf16.mxu1 %v1618_v27  ;;  %v1671_v26 = vld [vmem:[#allocation2 + $0xf20] sm:$0xff]  ;;  %v1673_v27 = vld [vmem:[#allocation2 + $0xf30] sm:$0xff] }
 0x3c3   :  { %v1898_v57 = vpop.f32.mrb[8].mxu0  ;;  %v2062_v42 = vpop.f32.mrb[8].mxu1 }
 0x3c4   :  { %v4149_v45 = vadd.f32 %v1898_v57, %v1704_v28  ;;  %v4151_v35 = vadd.f32 %v2062_v42, %v1712_v29  ;;  %v1900_v46 = vpop.f32.mrb[9].mxu0  ;;  %v2064_v47 = vpop.f32.mrb[9].mxu1  ;;  %v1680_v28 = vld [vmem:[#allocation2 + $0xf68] sm:$0xff]  ;;  %v1682_v29 = vld [vmem:[#allocation2 + $0xf78] sm:$0xff]  ;;  %v1687_v57 = vld [vmem:[#allocation2 + $0xfa0] sm:$0xff] }
 0x3c5   :  { %v4150_v48 = vadd.f32 %v1900_v46, %v1708_v30  ;;  %v4152_v49 = vadd.f32 %v2064_v47, %v1716_v31  ;;  %v1902_v50 = vpop.f32.mrb[10].mxu0  ;;  %v2066_v51 = vpop.f32.mrb[10].mxu1  ;;  %2203 = vmatpush1.bf16.msra.mxu0 %v1615_v33  ;;  %2367 = vmatpush1.bf16.msra.mxu1 %v1617_v41  ;;  %v1679_v30 = vld [vmem:[#allocation2 + $0xf60] sm:$0xff]  ;;  %v1681_v31 = vld [vmem:[#allocation2 + $0xf70] sm:$0xff]  ;;  %v1688_v33 = vld [vmem:[#allocation2 + $0xfa8] sm:$0xff]  ;;  %v1720_v46 = vrot.slane %v4725_v24, %v4675_v37 }
 0x3c6   :  { %v2397_v52 = vmax.f32 %v4149_v45, 0.0  ;;  %v2399_v53 = vmax.f32 %v4151_v35, 0.0  ;;  %v1903_v54 = vpop.f32.mrb[11].mxu0  ;;  %v2067_v32 = vpop.f32.mrb[11].mxu1  ;;  %2204 = vmatprep.subr.bf16.mxu0 %v1624_v43  ;;  %2368 = vmatprep.subr.bf16.mxu1 %v1626_v44  ;;  %v1690_v41 = vld [vmem:[#allocation2 + $0xfb8] sm:$0xff]  ;;  %v1689_v42 = vld [vmem:[#allocation2 + $0xfb0] sm:$0xff]  ;;  %v1728_v47 = vrot.slane %v4725_v24, %v4677_v38 }
 0x3c7   :  { %v2398_v58 = vmax.f32 %v4150_v48, 0.0  ;;  %v2400_v59 = vmax.f32 %v4152_v49, 0.0  ;;  %v1696_v43 = vld [vmem:[#allocation2 + $0xfe8] sm:$0xff]  ;;  %v1698_v44 = vld [vmem:[#allocation2 + $0xff8] sm:$0xff]  ;;  %v1695_v45 = vld [vmem:[#allocation2 + $0xfe0] sm:$0xff]  ;;  %v1724_v48 = vrot.slane %v4725_v24, %v4679_v39  ;;  %v1732_v49 = vrot.slane %v4725_v24, %v4681_v40 }
 0x3c8   :  { %v4735_v1 = vpack.c.bf16 %v2397_v52, %v2397_v52  ;;  %v4737_v2 = vpack.c.bf16 %v2399_v53, %v2399_v53  ;;  %v1697_v35 = vld [vmem:[#allocation2 + $0xff0] sm:$0xff] }
 0x3c9   :  { %v4739_v3 = vpack.c.bf16 %v2398_v58, %v2398_v58  ;;  %v4741_v4 = vpack.c.bf16 %v2400_v59, %v2400_v59  ;;  %2205 = vmatpush1.bf16.msra.mxu0 %v1623_v55  ;;  %2369 = vmatpush1.bf16.msra.mxu1 %v1625_v56 }
 0x3ca   :  { %2206 = vmatprep.subr.bf16.mxu0 %v1632_v36  ;;  %2370 = vmatprep.subr.bf16.mxu1 %v1634_v61 }
 0x3cd   :  { %2207 = vmatpush1.bf16.msra.mxu0 %v1631_v5  ;;  %2371 = vmatpush1.bf16.msra.mxu1 %v1633_v6 }
 0x3ce   :  { %2208 = vmatprep.subr.bf16.mxu0 %v1640_v34  ;;  %2372 = vmatprep.subr.bf16.mxu1 %v1642_v7 }
 0x3d1   :  { %2209 = vmatpush1.bf16.msra.mxu0 %v1639_v9  ;;  %2373 = vmatpush1.bf16.msra.mxu1 %v1641_v14 }
 0x3d2   :  { %2210 = vmatprep.subr.bf16.mxu0 %v1648_v15  ;;  %2374 = vmatprep.subr.bf16.mxu1 %v1650_v63 }
 0x3d5   :  { %2211 = vmatpush1.bf16.msra.mxu0 %v1647_v16  ;;  %2375 = vmatpush1.bf16.msra.mxu1 %v1649_v17 }
 0x3d6   :  { %2212 = vmatprep.subr.bf16.mxu0 %v1656_v12  ;;  %2376 = vmatprep.subr.bf16.mxu1 %v1658_v18 }
 0x3d9   :  { %2213 = vmatpush1.bf16.msra.mxu0 %v1655_v19  ;;  %2377 = vmatpush1.bf16.msra.mxu1 %v1657_v60 }
 0x3da   :  { %2214 = vmatprep.subr.bf16.mxu0 %v1664_v20  ;;  %2378 = vmatprep.subr.bf16.mxu1 %v1666_v21 }
 0x3dd   :  { %2215 = vmatpush1.bf16.msra.mxu0 %v1663_v22  ;;  %2379 = vmatpush1.bf16.msra.mxu1 %v1665_v23 }
 0x3de   :  { %2216 = vmatprep.subr.bf16.mxu0 %v1672_v0  ;;  %2380 = vmatprep.subr.bf16.mxu1 %v1674_v25 }
 0x3e1   :  { %2217 = vmatpush1.bf16.msra.mxu0 %v1671_v26  ;;  %2381 = vmatpush1.bf16.msra.mxu1 %v1673_v27 }
 0x3e2   :  { %2218 = vmatprep.subr.bf16.mxu0 %v1680_v28  ;;  %2382 = vmatprep.subr.bf16.mxu1 %v1682_v29 }
 0x3e5   :  { %2219 = vmatpush1.bf16.msra.mxu0 %v1679_v30  ;;  %2383 = vmatpush1.bf16.msra.mxu1 %v1681_v31 }
 0x3e6   :  { %2220 = vmatprep.subr.bf16.mxu0 %v1688_v33  ;;  %2384 = vmatprep.subr.bf16.mxu1 %v1690_v41 }
 0x3e9   :  { %2221 = vmatpush1.bf16.msra.mxu0 %v1687_v57  ;;  %2385 = vmatpush1.bf16.msra.mxu1 %v1689_v42 }
 0x3ea   :  { %2222 = vmatprep.subr.bf16.mxu0 %v1696_v43  ;;  %2386 = vmatprep.subr.bf16.mxu1 %v1698_v44 }
 0x3ed   :  { %2223 = vmatpush1.bf16.msra.mxu0 %v1695_v45  ;;  %2387 = vmatpush1.bf16.msra.mxu1 %v1697_v35 }
 0x3f0   :  { %2225 = vmatmul.mubr.bf16.vlgmr.msra.gmra.mrb[12].mxu0 %v4689_v62  ;;  %2389 = vmatmul.mubr.bf16.vlgmr.msra.gmra.mrb[12].mxu1 %v4689_v62 }
 0x4c3   :  { %v2226_v50 = vpop.f32.mrb[12].mxu0  ;;  %v2390_v51 = vpop.f32.mrb[12].mxu1 }
 0x4c4   :  { %v4153_v52 = vadd.f32 %v2226_v50, %v1720_v46  ;;  %v4155_v53 = vadd.f32 %v2390_v51, %v1728_v47  ;;  %v2228_v54 = vpop.f32.mrb[13].mxu0  ;;  %v2392_v32 = vpop.f32.mrb[13].mxu1 }
 0x4c5   :  { %v4154_v55 = vadd.f32 %v2228_v54, %v1724_v48  ;;  %v4156_v62 = vadd.f32 %v2392_v32, %v1732_v49  ;;  %v2230_v56 = vpop.f32.mrb[14].mxu0  ;;  %v2394_v58 = vpop.f32.mrb[14].mxu1 }
 0x4c6   :  { %v2401_v59 = vmax.f32 %v4153_v52, 0.0  ;;  %v2403_v36 = vmax.f32 %v4155_v53, 0.0  ;;  %v2231_v61 = vpop.f32.mrb[15].mxu0  ;;  %v2395_v5 = vpop.f32.mrb[15].mxu1 }
 0x4c7   :  { %v2402_v6 = vmax.f32 %v4154_v55, 0.0  ;;  %v2404_v34 = vmax.f32 %v4156_v62, 0.0 }
 0x4c8   :  { %v4753_v7 = vpack.c.bf16 %v2401_v59, %v2401_v59  ;;  %v4755_v9 = vpack.c.bf16 %v2403_v36, %v2403_v36 }
 0x4c9   :  { %v4757_v24 = vpack.c.bf16 %v2402_v6, %v2402_v6  ;;  %v4759_v14 = vpack.c.bf16 %v2404_v34, %v2404_v34 }
 0x4ca   :  { %4470 = dma.done.wait [#allocation5 + $0x1], 65536 }
 0x4cb   :  { %4471 = vsyncadd [#allocation5 + $0x1], 4294901760  ;;  %3007 = vmatprep.mubr.bf16.mxu0 %v4739_v3  ;;  %3171 = vmatprep.mubr.bf16.mxu1 %v4739_v3  ;;  %v2422_v15 = vld [vmem:[#allocation3 + $0x8] sm:$0xff]  ;;  %v2424_v63 = vld [vmem:[#allocation3 + $0x18] sm:$0xff] }
 0x4cc   :  { %v2421_v16 = vld [vmem:[#allocation3] sm:$0xff]  ;;  %2975 = vmatprep.subr.bf16.mxu0 %v2422_v15  ;;  %3139 = vmatprep.subr.bf16.mxu1 %v2424_v63  ;;  %v2423_v17 = vld [vmem:[#allocation3 + $0x10] sm:$0xff]  ;;  %v2430_v12 = vld [vmem:[#allocation3 + $0x48] sm:$0xff] }
 0x4cd   :  { %v2432_v18 = vld [vmem:[#allocation3 + $0x58] sm:$0xff]  ;;  %2976 = vmatpush1.bf16.msra.mxu0 %v2421_v16  ;;  %3140 = vmatpush1.bf16.msra.mxu1 %v2423_v17  ;;  %v2429_v19 = vld [vmem:[#allocation3 + $0x40] sm:$0xff]  ;;  %v2431_v60 = vld [vmem:[#allocation3 + $0x50] sm:$0xff] }
 0x4ce   :  { %2977 = vmatprep.subr.bf16.mxu0 %v2430_v12  ;;  %3141 = vmatprep.subr.bf16.mxu1 %v2432_v18  ;;  %v2438_v20 = vld [vmem:[#allocation3 + $0x88] sm:$0xff]  ;;  %v2440_v21 = vld [vmem:[#allocation3 + $0x98] sm:$0xff]  ;;  %v2437_v22 = vld [vmem:[#allocation3 + $0x80] sm:$0xff] }
 0x4cf   :  { %v2439_v23 = vld [vmem:[#allocation3 + $0x90] sm:$0xff]  ;;  %v2446_v0 = vld [vmem:[#allocation3 + $0xc8] sm:$0xff]  ;;  %v2448_v25 = vld [vmem:[#allocation3 + $0xd8] sm:$0xff] }
 0x4d0   :  { %v2445_v26 = vld [vmem:[#allocation3 + $0xc0] sm:$0xff]  ;;  %v2447_v27 = vld [vmem:[#allocation3 + $0xd0] sm:$0xff]  ;;  %v2454_v28 = vld [vmem:[#allocation3 + $0x108] sm:$0xff] }
 0x4d1   :  { %2978 = vmatpush1.bf16.msra.mxu0 %v2429_v19  ;;  %3142 = vmatpush1.bf16.msra.mxu1 %v2431_v60  ;;  %v2456_v29 = vld [vmem:[#allocation3 + $0x118] sm:$0xff]  ;;  %v2453_v30 = vld [vmem:[#allocation3 + $0x100] sm:$0xff]  ;;  %v2455_v31 = vld [vmem:[#allocation3 + $0x110] sm:$0xff] }
 0x4d2   :  { %2979 = vmatprep.subr.bf16.mxu0 %v2438_v20  ;;  %3143 = vmatprep.subr.bf16.mxu1 %v2440_v21  ;;  %v2462_v33 = vld [vmem:[#allocation3 + $0x148] sm:$0xff]  ;;  %v2464_v41 = vld [vmem:[#allocation3 + $0x158] sm:$0xff]  ;;  %v2461_v57 = vld [vmem:[#allocation3 + $0x140] sm:$0xff] }
 0x4d3   :  { %v2463_v42 = vld [vmem:[#allocation3 + $0x150] sm:$0xff]  ;;  %v2470_v43 = vld [vmem:[#allocation3 + $0x188] sm:$0xff]  ;;  %v2472_v44 = vld [vmem:[#allocation3 + $0x198] sm:$0xff] }
 0x4d4   :  { %v2469_v45 = vld [vmem:[#allocation3 + $0x180] sm:$0xff]  ;;  %v2471_v35 = vld [vmem:[#allocation3 + $0x190] sm:$0xff]  ;;  %v2478_v46 = vld [vmem:[#allocation3 + $0x1c8] sm:$0xff] }
 0x4d5   :  { %2980 = vmatpush1.bf16.msra.mxu0 %v2437_v22  ;;  %3144 = vmatpush1.bf16.msra.mxu1 %v2439_v23  ;;  %v2480_v47 = vld [vmem:[#allocation3 + $0x1d8] sm:$0xff]  ;;  %v2477_v48 = vld [vmem:[#allocation3 + $0x1c0] sm:$0xff]  ;;  %v2479_v49 = vld [vmem:[#allocation3 + $0x1d0] sm:$0xff] }
 0x4d6   :  { %2981 = vmatprep.subr.bf16.mxu0 %v2446_v0  ;;  %3145 = vmatprep.subr.bf16.mxu1 %v2448_v25  ;;  %v2486_v50 = vld [vmem:[#allocation3 + $0x208] sm:$0xff]  ;;  %v2488_v51 = vld [vmem:[#allocation3 + $0x218] sm:$0xff]  ;;  %v2485_v52 = vld [vmem:[#allocation3 + $0x200] sm:$0xff] }
 0x4d7   :  { %v2487_v53 = vld [vmem:[#allocation3 + $0x210] sm:$0xff]  ;;  %v2494_v54 = vld [vmem:[#allocation3 + $0x248] sm:$0xff]  ;;  %v2496_v32 = vld [vmem:[#allocation3 + $0x258] sm:$0xff] }
 0x4d8   :  { %v2493_v55 = vld [vmem:[#allocation3 + $0x240] sm:$0xff]  ;;  %v2495_v62 = vld [vmem:[#allocation3 + $0x250] sm:$0xff]  ;;  %v2502_v56 = vld [vmem:[#allocation3 + $0x288] sm:$0xff] }
 0x4d9   :  { %2982 = vmatpush1.bf16.msra.mxu0 %v2445_v26  ;;  %3146 = vmatpush1.bf16.msra.mxu1 %v2447_v27  ;;  %v2504_v58 = vld [vmem:[#allocation3 + $0x298] sm:$0xff]  ;;  %v2501_v59 = vld [vmem:[#allocation3 + $0x280] sm:$0xff]  ;;  %v2503_v36 = vld [vmem:[#allocation3 + $0x290] sm:$0xff] }
 0x4da   :  { %2983 = vmatprep.subr.bf16.mxu0 %v2454_v28  ;;  %3147 = vmatprep.subr.bf16.mxu1 %v2456_v29  ;;  %v2510_v61 = vld [vmem:[#allocation3 + $0x2c8] sm:$0xff]  ;;  %v2512_v5 = vld [vmem:[#allocation3 + $0x2d8] sm:$0xff]  ;;  %v2509_v6 = vld [vmem:[#allocation3 + $0x2c0] sm:$0xff] }
 0x4db   :  { %v2511_v34 = vld [vmem:[#allocation3 + $0x2d0] sm:$0xff]  ;;  %v2518_v15 = vld [vmem:[#allocation3 + $0x308] sm:$0xff]  ;;  %v2520_v63 = vld [vmem:[#allocation3 + $0x318] sm:$0xff] }
 0x4dc   :  { %v2517_v16 = vld [vmem:[#allocation3 + $0x300] sm:$0xff]  ;;  %v2519_v17 = vld [vmem:[#allocation3 + $0x310] sm:$0xff]  ;;  %v2526_v12 = vld [vmem:[#allocation3 + $0x348] sm:$0xff] }
 0x4dd   :  { %2984 = vmatpush1.bf16.msra.mxu0 %v2453_v30  ;;  %3148 = vmatpush1.bf16.msra.mxu1 %v2455_v31  ;;  %v2528_v18 = vld [vmem:[#allocation3 + $0x358] sm:$0xff]  ;;  %v2525_v19 = vld [vmem:[#allocation3 + $0x340] sm:$0xff]  ;;  %v2527_v60 = vld [vmem:[#allocation3 + $0x350] sm:$0xff] }
 0x4de   :  { %2985 = vmatprep.subr.bf16.mxu0 %v2462_v33  ;;  %3149 = vmatprep.subr.bf16.mxu1 %v2464_v41  ;;  %v2534_v20 = vld [vmem:[#allocation3 + $0x388] sm:$0xff]  ;;  %v2536_v21 = vld [vmem:[#allocation3 + $0x398] sm:$0xff]  ;;  %v2533_v22 = vld [vmem:[#allocation3 + $0x380] sm:$0xff] }
 0x4df   :  { %v2535_v23 = vld [vmem:[#allocation3 + $0x390] sm:$0xff]  ;;  %v2542_v0 = vld [vmem:[#allocation3 + $0x3c8] sm:$0xff]  ;;  %v2544_v25 = vld [vmem:[#allocation3 + $0x3d8] sm:$0xff] }
 0x4e0   :  { %v2541_v26 = vld [vmem:[#allocation3 + $0x3c0] sm:$0xff]  ;;  %v2543_v27 = vld [vmem:[#allocation3 + $0x3d0] sm:$0xff]  ;;  %v2550_v28 = vld [vmem:[#allocation3 + $0x408] sm:$0xff] }
 0x4e1   :  { %2986 = vmatpush1.bf16.msra.mxu0 %v2461_v57  ;;  %3150 = vmatpush1.bf16.msra.mxu1 %v2463_v42  ;;  %v2552_v29 = vld [vmem:[#allocation3 + $0x418] sm:$0xff]  ;;  %v2549_v30 = vld [vmem:[#allocation3 + $0x400] sm:$0xff]  ;;  %v2551_v31 = vld [vmem:[#allocation3 + $0x410] sm:$0xff] }
 0x4e2   :  { %2987 = vmatprep.subr.bf16.mxu0 %v2470_v43  ;;  %3151 = vmatprep.subr.bf16.mxu1 %v2472_v44  ;;  %v2558_v33 = vld [vmem:[#allocation3 + $0x448] sm:$0xff]  ;;  %v2560_v41 = vld [vmem:[#allocation3 + $0x458] sm:$0xff]  ;;  %v2557_v57 = vld [vmem:[#allocation3 + $0x440] sm:$0xff] }
 0x4e3   :  { %v2559_v42 = vld [vmem:[#allocation3 + $0x450] sm:$0xff]  ;;  %v2566_v43 = vld [vmem:[#allocation3 + $0x488] sm:$0xff]  ;;  %v2568_v44 = vld [vmem:[#allocation3 + $0x498] sm:$0xff] }
 0x4e5   :  { %2988 = vmatpush1.bf16.msra.mxu0 %v2469_v45  ;;  %3152 = vmatpush1.bf16.msra.mxu1 %v2471_v35  ;;  %v2565_v45 = vld [vmem:[#allocation3 + $0x480] sm:$0xff]  ;;  %v2567_v35 = vld [vmem:[#allocation3 + $0x490] sm:$0xff] }
 0x4e6   :  { %2989 = vmatprep.subr.bf16.mxu0 %v2478_v46  ;;  %3153 = vmatprep.subr.bf16.mxu1 %v2480_v47  ;;  %v2574_v46 = vld [vmem:[#allocation3 + $0x4c8] sm:$0xff]  ;;  %v2576_v47 = vld [vmem:[#allocation3 + $0x4d8] sm:$0xff] }
 0x4e9   :  { %2990 = vmatpush1.bf16.msra.mxu0 %v2477_v48  ;;  %3154 = vmatpush1.bf16.msra.mxu1 %v2479_v49  ;;  %v2573_v48 = vld [vmem:[#allocation3 + $0x4c0] sm:$0xff]  ;;  %v2575_v49 = vld [vmem:[#allocation3 + $0x4d0] sm:$0xff] }
 0x4ea   :  { %2991 = vmatprep.subr.bf16.mxu0 %v2486_v50  ;;  %3155 = vmatprep.subr.bf16.mxu1 %v2488_v51  ;;  %v2582_v50 = vld [vmem:[#allocation3 + $0x508] sm:$0xff]  ;;  %v2584_v51 = vld [vmem:[#allocation3 + $0x518] sm:$0xff] }
 0x4ed   :  { %2992 = vmatpush1.bf16.msra.mxu0 %v2485_v52  ;;  %3156 = vmatpush1.bf16.msra.mxu1 %v2487_v53  ;;  %v2581_v52 = vld [vmem:[#allocation3 + $0x500] sm:$0xff]  ;;  %v2583_v53 = vld [vmem:[#allocation3 + $0x510] sm:$0xff] }
 0x4ee   :  { %2993 = vmatprep.subr.bf16.mxu0 %v2494_v54  ;;  %3157 = vmatprep.subr.bf16.mxu1 %v2496_v32  ;;  %v2590_v54 = vld [vmem:[#allocation3 + $0x548] sm:$0xff]  ;;  %v2592_v32 = vld [vmem:[#allocation3 + $0x558] sm:$0xff] }
 0x4f1   :  { %2994 = vmatpush1.bf16.msra.mxu0 %v2493_v55  ;;  %3158 = vmatpush1.bf16.msra.mxu1 %v2495_v62  ;;  %v2589_v55 = vld [vmem:[#allocation3 + $0x540] sm:$0xff]  ;;  %v2591_v62 = vld [vmem:[#allocation3 + $0x550] sm:$0xff] }
 0x4f2   :  { %2995 = vmatprep.subr.bf16.mxu0 %v2502_v56  ;;  %3159 = vmatprep.subr.bf16.mxu1 %v2504_v58  ;;  %v2598_v56 = vld [vmem:[#allocation3 + $0x588] sm:$0xff]  ;;  %v2600_v58 = vld [vmem:[#allocation3 + $0x598] sm:$0xff] }
 0x4f5   :  { %2996 = vmatpush1.bf16.msra.mxu0 %v2501_v59  ;;  %3160 = vmatpush1.bf16.msra.mxu1 %v2503_v36  ;;  %v2597_v59 = vld [vmem:[#allocation3 + $0x580] sm:$0xff]  ;;  %v2599_v36 = vld [vmem:[#allocation3 + $0x590] sm:$0xff] }
 0x4f6   :  { %2997 = vmatprep.subr.bf16.mxu0 %v2510_v61  ;;  %3161 = vmatprep.subr.bf16.mxu1 %v2512_v5  ;;  %v2606_v61 = vld [vmem:[#allocation3 + $0x5c8] sm:$0xff]  ;;  %v2608_v5 = vld [vmem:[#allocation3 + $0x5d8] sm:$0xff] }
 0x4f9   :  { %2998 = vmatpush1.bf16.msra.mxu0 %v2509_v6  ;;  %3162 = vmatpush1.bf16.msra.mxu1 %v2511_v34  ;;  %v2605_v6 = vld [vmem:[#allocation3 + $0x5c0] sm:$0xff]  ;;  %v2607_v34 = vld [vmem:[#allocation3 + $0x5d0] sm:$0xff] }
 0x4fa   :  { %2999 = vmatprep.subr.bf16.mxu0 %v2518_v15  ;;  %3163 = vmatprep.subr.bf16.mxu1 %v2520_v63  ;;  %v2614_v15 = vld [vmem:[#allocation3 + $0x608] sm:$0xff]  ;;  %v2616_v63 = vld [vmem:[#allocation3 + $0x618] sm:$0xff] }
 0x4fd   :  { %3000 = vmatpush1.bf16.msra.mxu0 %v2517_v16  ;;  %3164 = vmatpush1.bf16.msra.mxu1 %v2519_v17  ;;  %v2613_v16 = vld [vmem:[#allocation3 + $0x600] sm:$0xff]  ;;  %v2615_v17 = vld [vmem:[#allocation3 + $0x610] sm:$0xff] }
 0x4fe   :  { %3001 = vmatprep.subr.bf16.mxu0 %v2526_v12  ;;  %3165 = vmatprep.subr.bf16.mxu1 %v2528_v18  ;;  %v2622_v12 = vld [vmem:[#allocation3 + $0x648] sm:$0xff]  ;;  %v2624_v18 = vld [vmem:[#allocation3 + $0x658] sm:$0xff] }
 0x501   :  { %3002 = vmatpush1.bf16.msra.mxu0 %v2525_v19  ;;  %3166 = vmatpush1.bf16.msra.mxu1 %v2527_v60  ;;  %v2621_v19 = vld [vmem:[#allocation3 + $0x640] sm:$0xff]  ;;  %v2623_v60 = vld [vmem:[#allocation3 + $0x650] sm:$0xff] }
 0x502   :  { %3003 = vmatprep.subr.bf16.mxu0 %v2534_v20  ;;  %3167 = vmatprep.subr.bf16.mxu1 %v2536_v21  ;;  %v2630_v20 = vld [vmem:[#allocation3 + $0x688] sm:$0xff]  ;;  %v2632_v21 = vld [vmem:[#allocation3 + $0x698] sm:$0xff] }
 0x505   :  { %3004 = vmatpush1.bf16.msra.mxu0 %v2533_v22  ;;  %3168 = vmatpush1.bf16.msra.mxu1 %v2535_v23  ;;  %v2629_v22 = vld [vmem:[#allocation3 + $0x680] sm:$0xff]  ;;  %v2631_v23 = vld [vmem:[#allocation3 + $0x690] sm:$0xff] }
 0x506   :  { %3005 = vmatprep.subr.bf16.mxu0 %v2542_v0  ;;  %3169 = vmatprep.subr.bf16.mxu1 %v2544_v25  ;;  %v2638_v0 = vld [vmem:[#allocation3 + $0x6c8] sm:$0xff]  ;;  %v2640_v25 = vld [vmem:[#allocation3 + $0x6d8] sm:$0xff] }
 0x509   :  { %3006 = vmatpush1.bf16.msra.mxu0 %v2541_v26  ;;  %3170 = vmatpush1.bf16.msra.mxu1 %v2543_v27  ;;  %v2637_v26 = vld [vmem:[#allocation3 + $0x6c0] sm:$0xff]  ;;  %v2639_v27 = vld [vmem:[#allocation3 + $0x6d0] sm:$0xff] }
 0x50a   :  { %3016 = vmatprep.subr.bf16.mxu0 %v2550_v28  ;;  %3180 = vmatprep.subr.bf16.mxu1 %v2552_v29  ;;  %v2646_v28 = vld [vmem:[#allocation3 + $0x708] sm:$0xff]  ;;  %v2648_v29 = vld [vmem:[#allocation3 + $0x718] sm:$0xff] }
 0x50c   :  { %3008 = vmatmul.mubr.bf16.vlgmr.msra.gmra.mrb[16].mxu0 %v4735_v1  ;;  %3172 = vmatmul.mubr.bf16.vlgmr.msra.gmra.mrb[16].mxu1 %v4735_v1 }
 0x50d   :  { %3017 = vmatpush1.bf16.msra.mxu0 %v2549_v30  ;;  %3181 = vmatpush1.bf16.msra.mxu1 %v2551_v31  ;;  %v2645_v30 = vld [vmem:[#allocation3 + $0x700] sm:$0xff]  ;;  %v2647_v31 = vld [vmem:[#allocation3 + $0x710] sm:$0xff] }
 0x50e   :  { %3018 = vmatprep.subr.bf16.mxu0 %v2558_v33  ;;  %3182 = vmatprep.subr.bf16.mxu1 %v2560_v41  ;;  %v2654_v33 = vld [vmem:[#allocation3 + $0x748] sm:$0xff]  ;;  %v2656_v41 = vld [vmem:[#allocation3 + $0x758] sm:$0xff] }
 0x50f   :  { %3048 = vmatprep.mubr.bf16.mxu0 %v4741_v4  ;;  %3212 = vmatprep.mubr.bf16.mxu1 %v4741_v4 }
 0x511   :  { %3019 = vmatpush1.bf16.msra.mxu0 %v2557_v57  ;;  %3183 = vmatpush1.bf16.msra.mxu1 %v2559_v42  ;;  %v2653_v57 = vld [vmem:[#allocation3 + $0x740] sm:$0xff]  ;;  %v2655_v42 = vld [vmem:[#allocation3 + $0x750] sm:$0xff] }
 0x512   :  { %3020 = vmatprep.subr.bf16.mxu0 %v2566_v43  ;;  %3184 = vmatprep.subr.bf16.mxu1 %v2568_v44  ;;  %v2662_v43 = vld [vmem:[#allocation3 + $0x788] sm:$0xff]  ;;  %v2664_v44 = vld [vmem:[#allocation3 + $0x798] sm:$0xff] }
 0x515   :  { %3021 = vmatpush1.bf16.msra.mxu0 %v2565_v45  ;;  %3185 = vmatpush1.bf16.msra.mxu1 %v2567_v35  ;;  %v2661_v45 = vld [vmem:[#allocation3 + $0x780] sm:$0xff]  ;;  %v2663_v35 = vld [vmem:[#allocation3 + $0x790] sm:$0xff] }
 0x516   :  { %3022 = vmatprep.subr.bf16.mxu0 %v2574_v46  ;;  %3186 = vmatprep.subr.bf16.mxu1 %v2576_v47  ;;  %v2670_v46 = vld [vmem:[#allocation3 + $0x7c8] sm:$0xff]  ;;  %v2672_v47 = vld [vmem:[#allocation3 + $0x7d8] sm:$0xff] }
 0x519   :  { %3023 = vmatpush1.bf16.msra.mxu0 %v2573_v48  ;;  %3187 = vmatpush1.bf16.msra.mxu1 %v2575_v49  ;;  %v2669_v48 = vld [vmem:[#allocation3 + $0x7c0] sm:$0xff]  ;;  %v2671_v49 = vld [vmem:[#allocation3 + $0x7d0] sm:$0xff] }
 0x51a   :  { %3024 = vmatprep.subr.bf16.mxu0 %v2582_v50  ;;  %3188 = vmatprep.subr.bf16.mxu1 %v2584_v51  ;;  %v2678_v50 = vld [vmem:[#allocation3 + $0x808] sm:$0xff]  ;;  %v2680_v51 = vld [vmem:[#allocation3 + $0x818] sm:$0xff] }
 0x51d   :  { %3025 = vmatpush1.bf16.msra.mxu0 %v2581_v52  ;;  %3189 = vmatpush1.bf16.msra.mxu1 %v2583_v53  ;;  %v2677_v52 = vld [vmem:[#allocation3 + $0x800] sm:$0xff]  ;;  %v2679_v53 = vld [vmem:[#allocation3 + $0x810] sm:$0xff] }
 0x51e   :  { %3026 = vmatprep.subr.bf16.mxu0 %v2590_v54  ;;  %3190 = vmatprep.subr.bf16.mxu1 %v2592_v32  ;;  %v2686_v54 = vld [vmem:[#allocation3 + $0x848] sm:$0xff]  ;;  %v2688_v32 = vld [vmem:[#allocation3 + $0x858] sm:$0xff] }
 0x521   :  { %3027 = vmatpush1.bf16.msra.mxu0 %v2589_v55  ;;  %3191 = vmatpush1.bf16.msra.mxu1 %v2591_v62  ;;  %v2685_v55 = vld [vmem:[#allocation3 + $0x840] sm:$0xff]  ;;  %v2687_v62 = vld [vmem:[#allocation3 + $0x850] sm:$0xff] }
 0x522   :  { %3028 = vmatprep.subr.bf16.mxu0 %v2598_v56  ;;  %3192 = vmatprep.subr.bf16.mxu1 %v2600_v58  ;;  %v2694_v56 = vld [vmem:[#allocation3 + $0x888] sm:$0xff]  ;;  %v2696_v58 = vld [vmem:[#allocation3 + $0x898] sm:$0xff] }
 0x525   :  { %3029 = vmatpush1.bf16.msra.mxu0 %v2597_v59  ;;  %3193 = vmatpush1.bf16.msra.mxu1 %v2599_v36  ;;  %v2693_v59 = vld [vmem:[#allocation3 + $0x880] sm:$0xff]  ;;  %v2695_v36 = vld [vmem:[#allocation3 + $0x890] sm:$0xff] }
 0x526   :  { %3030 = vmatprep.subr.bf16.mxu0 %v2606_v61  ;;  %3194 = vmatprep.subr.bf16.mxu1 %v2608_v5  ;;  %v2702_v61 = vld [vmem:[#allocation3 + $0x8c8] sm:$0xff]  ;;  %v2704_v5 = vld [vmem:[#allocation3 + $0x8d8] sm:$0xff] }
 0x529   :  { %3031 = vmatpush1.bf16.msra.mxu0 %v2605_v6  ;;  %3195 = vmatpush1.bf16.msra.mxu1 %v2607_v34  ;;  %v2701_v6 = vld [vmem:[#allocation3 + $0x8c0] sm:$0xff]  ;;  %v2703_v34 = vld [vmem:[#allocation3 + $0x8d0] sm:$0xff] }
 0x52a   :  { %3032 = vmatprep.subr.bf16.mxu0 %v2614_v15  ;;  %3196 = vmatprep.subr.bf16.mxu1 %v2616_v63  ;;  %v2710_v15 = vld [vmem:[#allocation3 + $0x908] sm:$0xff]  ;;  %v2712_v63 = vld [vmem:[#allocation3 + $0x918] sm:$0xff] }
 0x52d   :  { %3033 = vmatpush1.bf16.msra.mxu0 %v2613_v16  ;;  %3197 = vmatpush1.bf16.msra.mxu1 %v2615_v17  ;;  %v2709_v16 = vld [vmem:[#allocation3 + $0x900] sm:$0xff]  ;;  %v2711_v17 = vld [vmem:[#allocation3 + $0x910] sm:$0xff] }
 0x52e   :  { %3034 = vmatprep.subr.bf16.mxu0 %v2622_v12  ;;  %3198 = vmatprep.subr.bf16.mxu1 %v2624_v18  ;;  %v2718_v12 = vld [vmem:[#allocation3 + $0x948] sm:$0xff]  ;;  %v2720_v18 = vld [vmem:[#allocation3 + $0x958] sm:$0xff] }
 0x531   :  { %3035 = vmatpush1.bf16.msra.mxu0 %v2621_v19  ;;  %3199 = vmatpush1.bf16.msra.mxu1 %v2623_v60  ;;  %v2717_v19 = vld [vmem:[#allocation3 + $0x940] sm:$0xff]  ;;  %v2719_v60 = vld [vmem:[#allocation3 + $0x950] sm:$0xff] }
 0x532   :  { %3036 = vmatprep.subr.bf16.mxu0 %v2630_v20  ;;  %3200 = vmatprep.subr.bf16.mxu1 %v2632_v21  ;;  %v2726_v20 = vld [vmem:[#allocation3 + $0x988] sm:$0xff]  ;;  %v2728_v21 = vld [vmem:[#allocation3 + $0x998] sm:$0xff] }
 0x535   :  { %3037 = vmatpush1.bf16.msra.mxu0 %v2629_v22  ;;  %3201 = vmatpush1.bf16.msra.mxu1 %v2631_v23  ;;  %v2725_v22 = vld [vmem:[#allocation3 + $0x980] sm:$0xff]  ;;  %v2727_v23 = vld [vmem:[#allocation3 + $0x990] sm:$0xff] }
 0x536   :  { %3038 = vmatprep.subr.bf16.mxu0 %v2638_v0  ;;  %3202 = vmatprep.subr.bf16.mxu1 %v2640_v25  ;;  %v2734_v0 = vld [vmem:[#allocation3 + $0x9c8] sm:$0xff]  ;;  %v2736_v25 = vld [vmem:[#allocation3 + $0x9d8] sm:$0xff] }
 0x539   :  { %3039 = vmatpush1.bf16.msra.mxu0 %v2637_v26  ;;  %3203 = vmatpush1.bf16.msra.mxu1 %v2639_v27  ;;  %v2733_v26 = vld [vmem:[#allocation3 + $0x9c0] sm:$0xff]  ;;  %v2735_v27 = vld [vmem:[#allocation3 + $0x9d0] sm:$0xff] }
 0x53a   :  { %3040 = vmatprep.subr.bf16.mxu0 %v2646_v28  ;;  %3204 = vmatprep.subr.bf16.mxu1 %v2648_v29  ;;  %v2742_v28 = vld [vmem:[#allocation3 + $0xa08] sm:$0xff]  ;;  %v2744_v29 = vld [vmem:[#allocation3 + $0xa18] sm:$0xff] }
 0x53d   :  { %3041 = vmatpush1.bf16.msra.mxu0 %v2645_v30  ;;  %3205 = vmatpush1.bf16.msra.mxu1 %v2647_v31  ;;  %v2741_v30 = vld [vmem:[#allocation3 + $0xa00] sm:$0xff]  ;;  %v2743_v31 = vld [vmem:[#allocation3 + $0xa10] sm:$0xff] }
 0x53e   :  { %3042 = vmatprep.subr.bf16.mxu0 %v2654_v33  ;;  %3206 = vmatprep.subr.bf16.mxu1 %v2656_v41  ;;  %v2750_v33 = vld [vmem:[#allocation3 + $0xa48] sm:$0xff]  ;;  %v2752_v41 = vld [vmem:[#allocation3 + $0xa58] sm:$0xff] }
 0x541   :  { %3043 = vmatpush1.bf16.msra.mxu0 %v2653_v57  ;;  %3207 = vmatpush1.bf16.msra.mxu1 %v2655_v42  ;;  %v2749_v57 = vld [vmem:[#allocation3 + $0xa40] sm:$0xff]  ;;  %v2751_v42 = vld [vmem:[#allocation3 + $0xa50] sm:$0xff] }
 0x542   :  { %3044 = vmatprep.subr.bf16.mxu0 %v2662_v43  ;;  %3208 = vmatprep.subr.bf16.mxu1 %v2664_v44  ;;  %v2758_v43 = vld [vmem:[#allocation3 + $0xa88] sm:$0xff]  ;;  %v2760_v44 = vld [vmem:[#allocation3 + $0xa98] sm:$0xff] }
 0x545   :  { %3045 = vmatpush1.bf16.msra.mxu0 %v2661_v45  ;;  %3209 = vmatpush1.bf16.msra.mxu1 %v2663_v35  ;;  %v2757_v45 = vld [vmem:[#allocation3 + $0xa80] sm:$0xff]  ;;  %v2759_v35 = vld [vmem:[#allocation3 + $0xa90] sm:$0xff] }
 0x546   :  { %3046 = vmatprep.subr.bf16.mxu0 %v2670_v46  ;;  %3210 = vmatprep.subr.bf16.mxu1 %v2672_v47  ;;  %v2766_v46 = vld [vmem:[#allocation3 + $0xac8] sm:$0xff]  ;;  %v2768_v47 = vld [vmem:[#allocation3 + $0xad8] sm:$0xff] }
 0x549   :  { %3047 = vmatpush1.bf16.msra.mxu0 %v2669_v48  ;;  %3211 = vmatpush1.bf16.msra.mxu1 %v2671_v49  ;;  %v2765_v48 = vld [vmem:[#allocation3 + $0xac0] sm:$0xff]  ;;  %v2767_v49 = vld [vmem:[#allocation3 + $0xad0] sm:$0xff] }
 0x54a   :  { %3057 = vmatprep.subr.bf16.mxu0 %v2678_v50  ;;  %3221 = vmatprep.subr.bf16.mxu1 %v2680_v51  ;;  %v2774_v50 = vld [vmem:[#allocation3 + $0xb08] sm:$0xff]  ;;  %v2776_v51 = vld [vmem:[#allocation3 + $0xb18] sm:$0xff] }
 0x54c   :  { %3049 = vmatmul.mubr.bf16.vlgmr.msra.gmra.mrb[16].mxu0 %v4737_v2  ;;  %3213 = vmatmul.mubr.bf16.vlgmr.msra.gmra.mrb[16].mxu1 %v4737_v2 }
 0x54d   :  { %3058 = vmatpush1.bf16.msra.mxu0 %v2677_v52  ;;  %3222 = vmatpush1.bf16.msra.mxu1 %v2679_v53  ;;  %v2773_v52 = vld [vmem:[#allocation3 + $0xb00] sm:$0xff]  ;;  %v2775_v53 = vld [vmem:[#allocation3 + $0xb10] sm:$0xff] }
 0x54e   :  { %3059 = vmatprep.subr.bf16.mxu0 %v2686_v54  ;;  %3223 = vmatprep.subr.bf16.mxu1 %v2688_v32  ;;  %v2782_v54 = vld [vmem:[#allocation3 + $0xb48] sm:$0xff]  ;;  %v2784_v32 = vld [vmem:[#allocation3 + $0xb58] sm:$0xff] }
 0x54f   :  { %3089 = vmatprep.mubr.bf16.mxu0 %v4757_v24  ;;  %3253 = vmatprep.mubr.bf16.mxu1 %v4757_v24 }
 0x551   :  { %3060 = vmatpush1.bf16.msra.mxu0 %v2685_v55  ;;  %3224 = vmatpush1.bf16.msra.mxu1 %v2687_v62  ;;  %v2781_v55 = vld [vmem:[#allocation3 + $0xb40] sm:$0xff]  ;;  %v2783_v62 = vld [vmem:[#allocation3 + $0xb50] sm:$0xff] }
 0x552   :  { %3061 = vmatprep.subr.bf16.mxu0 %v2694_v56  ;;  %3225 = vmatprep.subr.bf16.mxu1 %v2696_v58  ;;  %v2790_v56 = vld [vmem:[#allocation3 + $0xb88] sm:$0xff]  ;;  %v2792_v58 = vld [vmem:[#allocation3 + $0xb98] sm:$0xff] }
 0x555   :  { %3062 = vmatpush1.bf16.msra.mxu0 %v2693_v59  ;;  %3226 = vmatpush1.bf16.msra.mxu1 %v2695_v36  ;;  %v2789_v59 = vld [vmem:[#allocation3 + $0xb80] sm:$0xff]  ;;  %v2791_v36 = vld [vmem:[#allocation3 + $0xb90] sm:$0xff] }
 0x556   :  { %3063 = vmatprep.subr.bf16.mxu0 %v2702_v61  ;;  %3227 = vmatprep.subr.bf16.mxu1 %v2704_v5  ;;  %v2798_v61 = vld [vmem:[#allocation3 + $0xbc8] sm:$0xff]  ;;  %v2800_v5 = vld [vmem:[#allocation3 + $0xbd8] sm:$0xff] }
 0x559   :  { %3064 = vmatpush1.bf16.msra.mxu0 %v2701_v6  ;;  %3228 = vmatpush1.bf16.msra.mxu1 %v2703_v34  ;;  %v2797_v6 = vld [vmem:[#allocation3 + $0xbc0] sm:$0xff]  ;;  %v2799_v34 = vld [vmem:[#allocation3 + $0xbd0] sm:$0xff] }
 0x55a   :  { %3065 = vmatprep.subr.bf16.mxu0 %v2710_v15  ;;  %3229 = vmatprep.subr.bf16.mxu1 %v2712_v63  ;;  %v2806_v15 = vld [vmem:[#allocation3 + $0xc08] sm:$0xff]  ;;  %v2808_v63 = vld [vmem:[#allocation3 + $0xc18] sm:$0xff] }
 0x55d   :  { %3066 = vmatpush1.bf16.msra.mxu0 %v2709_v16  ;;  %3230 = vmatpush1.bf16.msra.mxu1 %v2711_v17  ;;  %v2805_v16 = vld [vmem:[#allocation3 + $0xc00] sm:$0xff]  ;;  %v2807_v17 = vld [vmem:[#allocation3 + $0xc10] sm:$0xff] }
 0x55e   :  { %3067 = vmatprep.subr.bf16.mxu0 %v2718_v12  ;;  %3231 = vmatprep.subr.bf16.mxu1 %v2720_v18  ;;  %v2814_v12 = vld [vmem:[#allocation3 + $0xc48] sm:$0xff]  ;;  %v2816_v18 = vld [vmem:[#allocation3 + $0xc58] sm:$0xff] }
 0x561   :  { %3068 = vmatpush1.bf16.msra.mxu0 %v2717_v19  ;;  %3232 = vmatpush1.bf16.msra.mxu1 %v2719_v60  ;;  %v2813_v19 = vld [vmem:[#allocation3 + $0xc40] sm:$0xff]  ;;  %v2815_v60 = vld [vmem:[#allocation3 + $0xc50] sm:$0xff] }
 0x562   :  { %3069 = vmatprep.subr.bf16.mxu0 %v2726_v20  ;;  %3233 = vmatprep.subr.bf16.mxu1 %v2728_v21  ;;  %v2822_v20 = vld [vmem:[#allocation3 + $0xc88] sm:$0xff]  ;;  %v2824_v21 = vld [vmem:[#allocation3 + $0xc98] sm:$0xff] }
 0x565   :  { %3070 = vmatpush1.bf16.msra.mxu0 %v2725_v22  ;;  %3234 = vmatpush1.bf16.msra.mxu1 %v2727_v23  ;;  %v2821_v22 = vld [vmem:[#allocation3 + $0xc80] sm:$0xff]  ;;  %v2823_v23 = vld [vmem:[#allocation3 + $0xc90] sm:$0xff] }
 0x566   :  { %3071 = vmatprep.subr.bf16.mxu0 %v2734_v0  ;;  %3235 = vmatprep.subr.bf16.mxu1 %v2736_v25  ;;  %v2830_v0 = vld [vmem:[#allocation3 + $0xcc8] sm:$0xff]  ;;  %v2832_v25 = vld [vmem:[#allocation3 + $0xcd8] sm:$0xff] }
 0x569   :  { %3072 = vmatpush1.bf16.msra.mxu0 %v2733_v26  ;;  %3236 = vmatpush1.bf16.msra.mxu1 %v2735_v27  ;;  %v2829_v26 = vld [vmem:[#allocation3 + $0xcc0] sm:$0xff]  ;;  %v2831_v27 = vld [vmem:[#allocation3 + $0xcd0] sm:$0xff] }
 0x56a   :  { %3073 = vmatprep.subr.bf16.mxu0 %v2742_v28  ;;  %3237 = vmatprep.subr.bf16.mxu1 %v2744_v29  ;;  %v2838_v28 = vld [vmem:[#allocation3 + $0xd08] sm:$0xff]  ;;  %v2840_v29 = vld [vmem:[#allocation3 + $0xd18] sm:$0xff] }
 0x56d   :  { %3074 = vmatpush1.bf16.msra.mxu0 %v2741_v30  ;;  %3238 = vmatpush1.bf16.msra.mxu1 %v2743_v31  ;;  %v2837_v30 = vld [vmem:[#allocation3 + $0xd00] sm:$0xff]  ;;  %v2839_v31 = vld [vmem:[#allocation3 + $0xd10] sm:$0xff] }
 0x56e   :  { %3075 = vmatprep.subr.bf16.mxu0 %v2750_v33  ;;  %3239 = vmatprep.subr.bf16.mxu1 %v2752_v41  ;;  %v2846_v33 = vld [vmem:[#allocation3 + $0xd48] sm:$0xff]  ;;  %v2848_v41 = vld [vmem:[#allocation3 + $0xd58] sm:$0xff] }
 0x571   :  { %3076 = vmatpush1.bf16.msra.mxu0 %v2749_v57  ;;  %3240 = vmatpush1.bf16.msra.mxu1 %v2751_v42  ;;  %v2845_v57 = vld [vmem:[#allocation3 + $0xd40] sm:$0xff]  ;;  %v2847_v42 = vld [vmem:[#allocation3 + $0xd50] sm:$0xff] }
 0x572   :  { %3077 = vmatprep.subr.bf16.mxu0 %v2758_v43  ;;  %3241 = vmatprep.subr.bf16.mxu1 %v2760_v44  ;;  %v2854_v43 = vld [vmem:[#allocation3 + $0xd88] sm:$0xff]  ;;  %v2856_v44 = vld [vmem:[#allocation3 + $0xd98] sm:$0xff] }
 0x575   :  { %3078 = vmatpush1.bf16.msra.mxu0 %v2757_v45  ;;  %3242 = vmatpush1.bf16.msra.mxu1 %v2759_v35  ;;  %v2853_v45 = vld [vmem:[#allocation3 + $0xd80] sm:$0xff]  ;;  %v2855_v35 = vld [vmem:[#allocation3 + $0xd90] sm:$0xff] }
 0x576   :  { %3079 = vmatprep.subr.bf16.mxu0 %v2766_v46  ;;  %3243 = vmatprep.subr.bf16.mxu1 %v2768_v47  ;;  %v2862_v46 = vld [vmem:[#allocation3 + $0xdc8] sm:$0xff]  ;;  %v2864_v47 = vld [vmem:[#allocation3 + $0xdd8] sm:$0xff] }
 0x579   :  { %3080 = vmatpush1.bf16.msra.mxu0 %v2765_v48  ;;  %3244 = vmatpush1.bf16.msra.mxu1 %v2767_v49  ;;  %v2861_v48 = vld [vmem:[#allocation3 + $0xdc0] sm:$0xff]  ;;  %v2863_v49 = vld [vmem:[#allocation3 + $0xdd0] sm:$0xff] }
 0x57a   :  { %3081 = vmatprep.subr.bf16.mxu0 %v2774_v50  ;;  %3245 = vmatprep.subr.bf16.mxu1 %v2776_v51  ;;  %v2870_v50 = vld [vmem:[#allocation3 + $0xe08] sm:$0xff]  ;;  %v2872_v51 = vld [vmem:[#allocation3 + $0xe18] sm:$0xff] }
 0x57d   :  { %3082 = vmatpush1.bf16.msra.mxu0 %v2773_v52  ;;  %3246 = vmatpush1.bf16.msra.mxu1 %v2775_v53  ;;  %v2869_v52 = vld [vmem:[#allocation3 + $0xe00] sm:$0xff]  ;;  %v2871_v53 = vld [vmem:[#allocation3 + $0xe10] sm:$0xff] }
 0x57e   :  { %3083 = vmatprep.subr.bf16.mxu0 %v2782_v54  ;;  %3247 = vmatprep.subr.bf16.mxu1 %v2784_v32  ;;  %v2878_v54 = vld [vmem:[#allocation3 + $0xe48] sm:$0xff]  ;;  %v2880_v32 = vld [vmem:[#allocation3 + $0xe58] sm:$0xff] }
 0x581   :  { %3084 = vmatpush1.bf16.msra.mxu0 %v2781_v55  ;;  %3248 = vmatpush1.bf16.msra.mxu1 %v2783_v62  ;;  %v2877_v55 = vld [vmem:[#allocation3 + $0xe40] sm:$0xff]  ;;  %v2879_v62 = vld [vmem:[#allocation3 + $0xe50] sm:$0xff] }
 0x582   :  { %3085 = vmatprep.subr.bf16.mxu0 %v2790_v56  ;;  %3249 = vmatprep.subr.bf16.mxu1 %v2792_v58  ;;  %v2886_v56 = vld [vmem:[#allocation3 + $0xe88] sm:$0xff]  ;;  %v2888_v58 = vld [vmem:[#allocation3 + $0xe98] sm:$0xff] }
 0x585   :  { %3086 = vmatpush1.bf16.msra.mxu0 %v2789_v59  ;;  %3250 = vmatpush1.bf16.msra.mxu1 %v2791_v36  ;;  %v2885_v59 = vld [vmem:[#allocation3 + $0xe80] sm:$0xff]  ;;  %v2887_v36 = vld [vmem:[#allocation3 + $0xe90] sm:$0xff] }
 0x586   :  { %3087 = vmatprep.subr.bf16.mxu0 %v2798_v61  ;;  %3251 = vmatprep.subr.bf16.mxu1 %v2800_v5  ;;  %v2894_v61 = vld [vmem:[#allocation3 + $0xec8] sm:$0xff]  ;;  %v2896_v5 = vld [vmem:[#allocation3 + $0xed8] sm:$0xff] }
 0x589   :  { %3088 = vmatpush1.bf16.msra.mxu0 %v2797_v6  ;;  %3252 = vmatpush1.bf16.msra.mxu1 %v2799_v34  ;;  %v2893_v6 = vld [vmem:[#allocation3 + $0xec0] sm:$0xff]  ;;  %v2895_v34 = vld [vmem:[#allocation3 + $0xed0] sm:$0xff] }
 0x58a   :  { %3098 = vmatprep.subr.bf16.mxu0 %v2806_v15  ;;  %3262 = vmatprep.subr.bf16.mxu1 %v2808_v63  ;;  %v2902_v15 = vld [vmem:[#allocation3 + $0xf08] sm:$0xff]  ;;  %v2904_v63 = vld [vmem:[#allocation3 + $0xf18] sm:$0xff] }
 0x58c   :  { %3090 = vmatmul.mubr.bf16.vlgmr.msra.gmra.mrb[16].mxu0 %v4753_v7  ;;  %3254 = vmatmul.mubr.bf16.vlgmr.msra.gmra.mrb[16].mxu1 %v4753_v7 }
 0x58d   :  { %3099 = vmatpush1.bf16.msra.mxu0 %v2805_v16  ;;  %3263 = vmatpush1.bf16.msra.mxu1 %v2807_v17  ;;  %v2901_v16 = vld [vmem:[#allocation3 + $0xf00] sm:$0xff]  ;;  %v2903_v17 = vld [vmem:[#allocation3 + $0xf10] sm:$0xff] }
 0x58e   :  { %3100 = vmatprep.subr.bf16.mxu0 %v2814_v12  ;;  %3264 = vmatprep.subr.bf16.mxu1 %v2816_v18  ;;  %v2910_v12 = vld [vmem:[#allocation3 + $0xf48] sm:$0xff]  ;;  %v2912_v18 = vld [vmem:[#allocation3 + $0xf58] sm:$0xff] }
 0x58f   :  { %3130 = vmatprep.mubr.bf16.mxu0 %v4759_v14  ;;  %3294 = vmatprep.mubr.bf16.mxu1 %v4759_v14 }
 0x591   :  { %3101 = vmatpush1.bf16.msra.mxu0 %v2813_v19  ;;  %3265 = vmatpush1.bf16.msra.mxu1 %v2815_v60  ;;  %v2909_v19 = vld [vmem:[#allocation3 + $0xf40] sm:$0xff]  ;;  %v2911_v60 = vld [vmem:[#allocation3 + $0xf50] sm:$0xff] }
 0x592   :  { %3102 = vmatprep.subr.bf16.mxu0 %v2822_v20  ;;  %3266 = vmatprep.subr.bf16.mxu1 %v2824_v21  ;;  %v2918_v20 = vld [vmem:[#allocation3 + $0xf88] sm:$0xff]  ;;  %v2920_v21 = vld [vmem:[#allocation3 + $0xf98] sm:$0xff] }
 0x595   :  { %3103 = vmatpush1.bf16.msra.mxu0 %v2821_v22  ;;  %3267 = vmatpush1.bf16.msra.mxu1 %v2823_v23  ;;  %v2917_v22 = vld [vmem:[#allocation3 + $0xf80] sm:$0xff]  ;;  %v2919_v23 = vld [vmem:[#allocation3 + $0xf90] sm:$0xff] }
 0x596   :  { %3104 = vmatprep.subr.bf16.mxu0 %v2830_v0  ;;  %3268 = vmatprep.subr.bf16.mxu1 %v2832_v25  ;;  %v2926_v0 = vld [vmem:[#allocation3 + $0xfc8] sm:$0xff]  ;;  %v2928_v25 = vld [vmem:[#allocation3 + $0xfd8] sm:$0xff] }
 0x599   :  { %3105 = vmatpush1.bf16.msra.mxu0 %v2829_v26  ;;  %3269 = vmatpush1.bf16.msra.mxu1 %v2831_v27  ;;  %v2925_v26 = vld [vmem:[#allocation3 + $0xfc0] sm:$0xff]  ;;  %v2927_v27 = vld [vmem:[#allocation3 + $0xfd0] sm:$0xff] }
 0x59a   :  { %3106 = vmatprep.subr.bf16.mxu0 %v2838_v28  ;;  %3270 = vmatprep.subr.bf16.mxu1 %v2840_v29  ;;  %v2426_v28 = vld [vmem:[#allocation3 + $0x28] sm:$0xff]  ;;  %v2428_v29 = vld [vmem:[#allocation3 + $0x38] sm:$0xff] }
 0x59d   :  { %3107 = vmatpush1.bf16.msra.mxu0 %v2837_v30  ;;  %3271 = vmatpush1.bf16.msra.mxu1 %v2839_v31  ;;  %v2425_v30 = vld [vmem:[#allocation3 + $0x20] sm:$0xff]  ;;  %v2427_v31 = vld [vmem:[#allocation3 + $0x30] sm:$0xff] }
 0x59e   :  { %3108 = vmatprep.subr.bf16.mxu0 %v2846_v33  ;;  %3272 = vmatprep.subr.bf16.mxu1 %v2848_v41  ;;  %v2434_v33 = vld [vmem:[#allocation3 + $0x68] sm:$0xff]  ;;  %v2436_v41 = vld [vmem:[#allocation3 + $0x78] sm:$0xff] }
 0x5a1   :  { %3109 = vmatpush1.bf16.msra.mxu0 %v2845_v57  ;;  %3273 = vmatpush1.bf16.msra.mxu1 %v2847_v42  ;;  %v2433_v57 = vld [vmem:[#allocation3 + $0x60] sm:$0xff]  ;;  %v2435_v42 = vld [vmem:[#allocation3 + $0x70] sm:$0xff] }
 0x5a2   :  { %3110 = vmatprep.subr.bf16.mxu0 %v2854_v43  ;;  %3274 = vmatprep.subr.bf16.mxu1 %v2856_v44  ;;  %v2442_v43 = vld [vmem:[#allocation3 + $0xa8] sm:$0xff]  ;;  %v2444_v44 = vld [vmem:[#allocation3 + $0xb8] sm:$0xff] }
 0x5a5   :  { %3111 = vmatpush1.bf16.msra.mxu0 %v2853_v45  ;;  %3275 = vmatpush1.bf16.msra.mxu1 %v2855_v35  ;;  %v2441_v45 = vld [vmem:[#allocation3 + $0xa0] sm:$0xff]  ;;  %v2443_v35 = vld [vmem:[#allocation3 + $0xb0] sm:$0xff] }
 0x5a6   :  { %3112 = vmatprep.subr.bf16.mxu0 %v2862_v46  ;;  %3276 = vmatprep.subr.bf16.mxu1 %v2864_v47  ;;  %v2450_v46 = vld [vmem:[#allocation3 + $0xe8] sm:$0xff]  ;;  %v2452_v47 = vld [vmem:[#allocation3 + $0xf8] sm:$0xff] }
 0x5a9   :  { %3113 = vmatpush1.bf16.msra.mxu0 %v2861_v48  ;;  %3277 = vmatpush1.bf16.msra.mxu1 %v2863_v49  ;;  %v2449_v48 = vld [vmem:[#allocation3 + $0xe0] sm:$0xff]  ;;  %v2451_v49 = vld [vmem:[#allocation3 + $0xf0] sm:$0xff] }
 0x5aa   :  { %3114 = vmatprep.subr.bf16.mxu0 %v2870_v50  ;;  %3278 = vmatprep.subr.bf16.mxu1 %v2872_v51  ;;  %v2458_v50 = vld [vmem:[#allocation3 + $0x128] sm:$0xff]  ;;  %v2460_v51 = vld [vmem:[#allocation3 + $0x138] sm:$0xff] }
 0x5ad   :  { %3115 = vmatpush1.bf16.msra.mxu0 %v2869_v52  ;;  %3279 = vmatpush1.bf16.msra.mxu1 %v2871_v53  ;;  %v2459_v52 = vld [vmem:[#allocation3 + $0x130] sm:$0xff]  ;;  %v2466_v53 = vld [vmem:[#allocation3 + $0x168] sm:$0xff] }
 0x5ae   :  { %3116 = vmatprep.subr.bf16.mxu0 %v2878_v54  ;;  %3280 = vmatprep.subr.bf16.mxu1 %v2880_v32  ;;  %v2468_v54 = vld [vmem:[#allocation3 + $0x178] sm:$0xff]  ;;  %v2465_v32 = vld [vmem:[#allocation3 + $0x160] sm:$0xff] }
 0x5b1   :  { %3117 = vmatpush1.bf16.msra.mxu0 %v2877_v55  ;;  %3281 = vmatpush1.bf16.msra.mxu1 %v2879_v62  ;;  %v2467_v55 = vld [vmem:[#allocation3 + $0x170] sm:$0xff]  ;;  %v2474_v62 = vld [vmem:[#allocation3 + $0x1a8] sm:$0xff] }
 0x5b2   :  { %3118 = vmatprep.subr.bf16.mxu0 %v2886_v56  ;;  %3282 = vmatprep.subr.bf16.mxu1 %v2888_v58  ;;  %v2476_v56 = vld [vmem:[#allocation3 + $0x1b8] sm:$0xff]  ;;  %v2473_v58 = vld [vmem:[#allocation3 + $0x1a0] sm:$0xff] }
 0x5b5   :  { %3119 = vmatpush1.bf16.msra.mxu0 %v2885_v59  ;;  %3283 = vmatpush1.bf16.msra.mxu1 %v2887_v36  ;;  %v2475_v59 = vld [vmem:[#allocation3 + $0x1b0] sm:$0xff]  ;;  %v2482_v36 = vld [vmem:[#allocation3 + $0x1e8] sm:$0xff] }
 0x5b6   :  { %3120 = vmatprep.subr.bf16.mxu0 %v2894_v61  ;;  %3284 = vmatprep.subr.bf16.mxu1 %v2896_v5  ;;  %v2484_v61 = vld [vmem:[#allocation3 + $0x1f8] sm:$0xff]  ;;  %v2481_v5 = vld [vmem:[#allocation3 + $0x1e0] sm:$0xff] }
 0x5b9   :  { %3121 = vmatpush1.bf16.msra.mxu0 %v2893_v6  ;;  %3285 = vmatpush1.bf16.msra.mxu1 %v2895_v34  ;;  %v2483_v6 = vld [vmem:[#allocation3 + $0x1f0] sm:$0xff]  ;;  %v2490_v34 = vld [vmem:[#allocation3 + $0x228] sm:$0xff] }
 0x5ba   :  { %3122 = vmatprep.subr.bf16.mxu0 %v2902_v15  ;;  %3286 = vmatprep.subr.bf16.mxu1 %v2904_v63  ;;  %v2492_v15 = vld [vmem:[#allocation3 + $0x238] sm:$0xff]  ;;  %v2489_v63 = vld [vmem:[#allocation3 + $0x220] sm:$0xff] }
 0x5bd   :  { %3123 = vmatpush1.bf16.msra.mxu0 %v2901_v16  ;;  %3287 = vmatpush1.bf16.msra.mxu1 %v2903_v17  ;;  %v2491_v16 = vld [vmem:[#allocation3 + $0x230] sm:$0xff]  ;;  %v2498_v17 = vld [vmem:[#allocation3 + $0x268] sm:$0xff] }
 0x5be   :  { %3124 = vmatprep.subr.bf16.mxu0 %v2910_v12  ;;  %3288 = vmatprep.subr.bf16.mxu1 %v2912_v18  ;;  %v2500_v12 = vld [vmem:[#allocation3 + $0x278] sm:$0xff]  ;;  %v2497_v18 = vld [vmem:[#allocation3 + $0x260] sm:$0xff] }
 0x5c1   :  { %3125 = vmatpush1.bf16.msra.mxu0 %v2909_v19  ;;  %3289 = vmatpush1.bf16.msra.mxu1 %v2911_v60  ;;  %v2499_v19 = vld [vmem:[#allocation3 + $0x270] sm:$0xff]  ;;  %v2506_v60 = vld [vmem:[#allocation3 + $0x2a8] sm:$0xff] }
 0x5c2   :  { %3126 = vmatprep.subr.bf16.mxu0 %v2918_v20  ;;  %3290 = vmatprep.subr.bf16.mxu1 %v2920_v21  ;;  %v2508_v20 = vld [vmem:[#allocation3 + $0x2b8] sm:$0xff]  ;;  %v2505_v21 = vld [vmem:[#allocation3 + $0x2a0] sm:$0xff] }
 0x5c5   :  { %3127 = vmatpush1.bf16.msra.mxu0 %v2917_v22  ;;  %3291 = vmatpush1.bf16.msra.mxu1 %v2919_v23  ;;  %v2507_v22 = vld [vmem:[#allocation3 + $0x2b0] sm:$0xff]  ;;  %v2514_v23 = vld [vmem:[#allocation3 + $0x2e8] sm:$0xff] }
 0x5c6   :  { %3128 = vmatprep.subr.bf16.mxu0 %v2926_v0  ;;  %3292 = vmatprep.subr.bf16.mxu1 %v2928_v25  ;;  %v2516_v0 = vld [vmem:[#allocation3 + $0x2f8] sm:$0xff]  ;;  %v2513_v25 = vld [vmem:[#allocation3 + $0x2e0] sm:$0xff] }
 0x5c9   :  { %3129 = vmatpush1.bf16.msra.mxu0 %v2925_v26  ;;  %3293 = vmatpush1.bf16.msra.mxu1 %v2927_v27  ;;  %v2515_v26 = vld [vmem:[#allocation3 + $0x2f0] sm:$0xff]  ;;  %v2522_v27 = vld [vmem:[#allocation3 + $0x328] sm:$0xff] }
 0x5ca   :  { %3303 = vmatprep.subr.bf16.mxu0 %v2426_v28  ;;  %3467 = vmatprep.subr.bf16.mxu1 %v2428_v29  ;;  %v2524_v28 = vld [vmem:[#allocation3 + $0x338] sm:$0xff]  ;;  %v2521_v29 = vld [vmem:[#allocation3 + $0x320] sm:$0xff] }
 0x5cc   :  { %3131 = vmatmul.mubr.bf16.vlgmr.msra.gmra.mrb[16].mxu0 %v4755_v9  ;;  %3295 = vmatmul.mubr.bf16.vlgmr.msra.gmra.mrb[16].mxu1 %v4755_v9 }
 0x5cd   :  { %3304 = vmatpush1.bf16.msra.mxu0 %v2425_v30  ;;  %3468 = vmatpush1.bf16.msra.mxu1 %v2427_v31  ;;  %v2523_v30 = vld [vmem:[#allocation3 + $0x330] sm:$0xff]  ;;  %v2530_v31 = vld [vmem:[#allocation3 + $0x368] sm:$0xff] }
 0x5ce   :  { %3305 = vmatprep.subr.bf16.mxu0 %v2434_v33  ;;  %3469 = vmatprep.subr.bf16.mxu1 %v2436_v41  ;;  %v2532_v33 = vld [vmem:[#allocation3 + $0x378] sm:$0xff]  ;;  %v2529_v41 = vld [vmem:[#allocation3 + $0x360] sm:$0xff] }
 0x5cf   :  { %3335 = vmatprep.mubr.bf16.mxu0 %v4739_v3  ;;  %3499 = vmatprep.mubr.bf16.mxu1 %v4739_v3  ;;  %v2457_v3 = vld [vmem:[#allocation3 + $0x120] sm:$0xff] }
 0x5d1   :  { %3306 = vmatpush1.bf16.msra.mxu0 %v2433_v57  ;;  %3470 = vmatpush1.bf16.msra.mxu1 %v2435_v42  ;;  %v2531_v57 = vld [vmem:[#allocation3 + $0x370] sm:$0xff]  ;;  %v2538_v42 = vld [vmem:[#allocation3 + $0x3a8] sm:$0xff] }
 0x5d2   :  { %3307 = vmatprep.subr.bf16.mxu0 %v2442_v43  ;;  %3471 = vmatprep.subr.bf16.mxu1 %v2444_v44  ;;  %v2540_v43 = vld [vmem:[#allocation3 + $0x3b8] sm:$0xff]  ;;  %v2537_v44 = vld [vmem:[#allocation3 + $0x3a0] sm:$0xff] }
 0x5d5   :  { %3308 = vmatpush1.bf16.msra.mxu0 %v2441_v45  ;;  %3472 = vmatpush1.bf16.msra.mxu1 %v2443_v35  ;;  %v2539_v45 = vld [vmem:[#allocation3 + $0x3b0] sm:$0xff]  ;;  %v2546_v35 = vld [vmem:[#allocation3 + $0x3e8] sm:$0xff] }
 0x5d6   :  { %3309 = vmatprep.subr.bf16.mxu0 %v2450_v46  ;;  %3473 = vmatprep.subr.bf16.mxu1 %v2452_v47  ;;  %v2548_v46 = vld [vmem:[#allocation3 + $0x3f8] sm:$0xff]  ;;  %v2545_v47 = vld [vmem:[#allocation3 + $0x3e0] sm:$0xff] }
 0x5d9   :  { %3310 = vmatpush1.bf16.msra.mxu0 %v2449_v48  ;;  %3474 = vmatpush1.bf16.msra.mxu1 %v2451_v49  ;;  %v2547_v48 = vld [vmem:[#allocation3 + $0x3f0] sm:$0xff]  ;;  %v2554_v49 = vld [vmem:[#allocation3 + $0x428] sm:$0xff] }
 0x5da   :  { %3311 = vmatprep.subr.bf16.mxu0 %v2458_v50  ;;  %3475 = vmatprep.subr.bf16.mxu1 %v2460_v51  ;;  %v2556_v50 = vld [vmem:[#allocation3 + $0x438] sm:$0xff]  ;;  %v2553_v51 = vld [vmem:[#allocation3 + $0x420] sm:$0xff] }
 0x5dd   :  { %3312 = vmatpush1.bf16.msra.mxu0 %v2457_v3  ;;  %3476 = vmatpush1.bf16.msra.mxu1 %v2459_v52  ;;  %v2555_v3 = vld [vmem:[#allocation3 + $0x430] sm:$0xff]  ;;  %v2562_v52 = vld [vmem:[#allocation3 + $0x468] sm:$0xff] }
 0x5de   :  { %3313 = vmatprep.subr.bf16.mxu0 %v2466_v53  ;;  %3477 = vmatprep.subr.bf16.mxu1 %v2468_v54  ;;  %v2564_v53 = vld [vmem:[#allocation3 + $0x478] sm:$0xff]  ;;  %v2561_v54 = vld [vmem:[#allocation3 + $0x460] sm:$0xff] }
 0x5e1   :  { %3314 = vmatpush1.bf16.msra.mxu0 %v2465_v32  ;;  %3478 = vmatpush1.bf16.msra.mxu1 %v2467_v55  ;;  %v2563_v32 = vld [vmem:[#allocation3 + $0x470] sm:$0xff]  ;;  %v2570_v55 = vld [vmem:[#allocation3 + $0x4a8] sm:$0xff] }
 0x5e2   :  { %3315 = vmatprep.subr.bf16.mxu0 %v2474_v62  ;;  %3479 = vmatprep.subr.bf16.mxu1 %v2476_v56  ;;  %v2572_v62 = vld [vmem:[#allocation3 + $0x4b8] sm:$0xff]  ;;  %v2569_v56 = vld [vmem:[#allocation3 + $0x4a0] sm:$0xff] }
 0x5e5   :  { %3316 = vmatpush1.bf16.msra.mxu0 %v2473_v58  ;;  %3480 = vmatpush1.bf16.msra.mxu1 %v2475_v59  ;;  %v2571_v58 = vld [vmem:[#allocation3 + $0x4b0] sm:$0xff]  ;;  %v2578_v59 = vld [vmem:[#allocation3 + $0x4e8] sm:$0xff] }
 0x5e6   :  { %3317 = vmatprep.subr.bf16.mxu0 %v2482_v36  ;;  %3481 = vmatprep.subr.bf16.mxu1 %v2484_v61  ;;  %v2577_v36 = vld [vmem:[#allocation3 + $0x4e0] sm:$0xff]  ;;  %v2579_v61 = vld [vmem:[#allocation3 + $0x4f0] sm:$0xff] }
 0x5e9   :  { %3318 = vmatpush1.bf16.msra.mxu0 %v2481_v5  ;;  %3482 = vmatpush1.bf16.msra.mxu1 %v2483_v6  ;;  %v2586_v5 = vld [vmem:[#allocation3 + $0x528] sm:$0xff]  ;;  %v2588_v6 = vld [vmem:[#allocation3 + $0x538] sm:$0xff] }
 0x5ea   :  { %3319 = vmatprep.subr.bf16.mxu0 %v2490_v34  ;;  %3483 = vmatprep.subr.bf16.mxu1 %v2492_v15  ;;  %v2587_v34 = vld [vmem:[#allocation3 + $0x530] sm:$0xff]  ;;  %v2594_v15 = vld [vmem:[#allocation3 + $0x568] sm:$0xff] }
 0x5ed   :  { %3320 = vmatpush1.bf16.msra.mxu0 %v2489_v63  ;;  %3484 = vmatpush1.bf16.msra.mxu1 %v2491_v16  ;;  %v2596_v63 = vld [vmem:[#allocation3 + $0x578] sm:$0xff]  ;;  %v2593_v16 = vld [vmem:[#allocation3 + $0x560] sm:$0xff] }
 0x5ee   :  { %3321 = vmatprep.subr.bf16.mxu0 %v2498_v17  ;;  %3485 = vmatprep.subr.bf16.mxu1 %v2500_v12  ;;  %v2595_v17 = vld [vmem:[#allocation3 + $0x570] sm:$0xff]  ;;  %v2602_v12 = vld [vmem:[#allocation3 + $0x5a8] sm:$0xff] }
 0x5f1   :  { %3322 = vmatpush1.bf16.msra.mxu0 %v2497_v18  ;;  %3486 = vmatpush1.bf16.msra.mxu1 %v2499_v19  ;;  %v2604_v18 = vld [vmem:[#allocation3 + $0x5b8] sm:$0xff]  ;;  %v2601_v19 = vld [vmem:[#allocation3 + $0x5a0] sm:$0xff] }
 0x5f2   :  { %3323 = vmatprep.subr.bf16.mxu0 %v2506_v60  ;;  %3487 = vmatprep.subr.bf16.mxu1 %v2508_v20  ;;  %v2603_v60 = vld [vmem:[#allocation3 + $0x5b0] sm:$0xff]  ;;  %v2610_v20 = vld [vmem:[#allocation3 + $0x5e8] sm:$0xff] }
 0x5f5   :  { %3324 = vmatpush1.bf16.msra.mxu0 %v2505_v21  ;;  %3488 = vmatpush1.bf16.msra.mxu1 %v2507_v22  ;;  %v2612_v21 = vld [vmem:[#allocation3 + $0x5f8] sm:$0xff]  ;;  %v2609_v22 = vld [vmem:[#allocation3 + $0x5e0] sm:$0xff] }
 0x5f6   :  { %3325 = vmatprep.subr.bf16.mxu0 %v2514_v23  ;;  %3489 = vmatprep.subr.bf16.mxu1 %v2516_v0  ;;  %v2611_v23 = vld [vmem:[#allocation3 + $0x5f0] sm:$0xff]  ;;  %v2618_v0 = vld [vmem:[#allocation3 + $0x628] sm:$0xff] }
 0x5f9   :  { %3326 = vmatpush1.bf16.msra.mxu0 %v2513_v25  ;;  %3490 = vmatpush1.bf16.msra.mxu1 %v2515_v26  ;;  %v2620_v25 = vld [vmem:[#allocation3 + $0x638] sm:$0xff]  ;;  %v2617_v26 = vld [vmem:[#allocation3 + $0x620] sm:$0xff] }
 0x5fa   :  { %3327 = vmatprep.subr.bf16.mxu0 %v2522_v27  ;;  %3491 = vmatprep.subr.bf16.mxu1 %v2524_v28  ;;  %v2619_v27 = vld [vmem:[#allocation3 + $0x630] sm:$0xff]  ;;  %v2626_v28 = vld [vmem:[#allocation3 + $0x668] sm:$0xff] }
 0x5fd   :  { %3328 = vmatpush1.bf16.msra.mxu0 %v2521_v29  ;;  %3492 = vmatpush1.bf16.msra.mxu1 %v2523_v30  ;;  %v2628_v29 = vld [vmem:[#allocation3 + $0x678] sm:$0xff]  ;;  %v2625_v30 = vld [vmem:[#allocation3 + $0x660] sm:$0xff] }
 0x5fe   :  { %3329 = vmatprep.subr.bf16.mxu0 %v2530_v31  ;;  %3493 = vmatprep.subr.bf16.mxu1 %v2532_v33  ;;  %v2627_v31 = vld [vmem:[#allocation3 + $0x670] sm:$0xff]  ;;  %v2634_v33 = vld [vmem:[#allocation3 + $0x6a8] sm:$0xff] }
 0x601   :  { %3330 = vmatpush1.bf16.msra.mxu0 %v2529_v41  ;;  %3494 = vmatpush1.bf16.msra.mxu1 %v2531_v57  ;;  %v2636_v41 = vld [vmem:[#allocation3 + $0x6b8] sm:$0xff]  ;;  %v2633_v57 = vld [vmem:[#allocation3 + $0x6a0] sm:$0xff] }
 0x602   :  { %3331 = vmatprep.subr.bf16.mxu0 %v2538_v42  ;;  %3495 = vmatprep.subr.bf16.mxu1 %v2540_v43  ;;  %v2635_v42 = vld [vmem:[#allocation3 + $0x6b0] sm:$0xff]  ;;  %v2642_v43 = vld [vmem:[#allocation3 + $0x6e8] sm:$0xff] }
 0x605   :  { %3332 = vmatpush1.bf16.msra.mxu0 %v2537_v44  ;;  %3496 = vmatpush1.bf16.msra.mxu1 %v2539_v45  ;;  %v2644_v44 = vld [vmem:[#allocation3 + $0x6f8] sm:$0xff]  ;;  %v2641_v45 = vld [vmem:[#allocation3 + $0x6e0] sm:$0xff] }
 0x606   :  { %3333 = vmatprep.subr.bf16.mxu0 %v2546_v35  ;;  %3497 = vmatprep.subr.bf16.mxu1 %v2548_v46  ;;  %v2643_v35 = vld [vmem:[#allocation3 + $0x6f0] sm:$0xff]  ;;  %v2650_v46 = vld [vmem:[#allocation3 + $0x728] sm:$0xff] }
 0x609   :  { %3334 = vmatpush1.bf16.msra.mxu0 %v2545_v47  ;;  %3498 = vmatpush1.bf16.msra.mxu1 %v2547_v48  ;;  %v2652_v47 = vld [vmem:[#allocation3 + $0x738] sm:$0xff]  ;;  %v2649_v48 = vld [vmem:[#allocation3 + $0x720] sm:$0xff] }
 0x60a   :  { %3344 = vmatprep.subr.bf16.mxu0 %v2554_v49  ;;  %3508 = vmatprep.subr.bf16.mxu1 %v2556_v50  ;;  %v2651_v49 = vld [vmem:[#allocation3 + $0x730] sm:$0xff]  ;;  %v2658_v50 = vld [vmem:[#allocation3 + $0x768] sm:$0xff] }
 0x60c   :  { %3336 = vmatmul.mubr.bf16.vlgmr.msra.gmra.mrb[20].mxu0 %v4735_v1  ;;  %3500 = vmatmul.mubr.bf16.vlgmr.msra.gmra.mrb[20].mxu1 %v4735_v1  ;;  %v2580_v1 = vld [vmem:[#allocation3 + $0x4f8] sm:$0xff] }
 0x60d   :  { %3345 = vmatpush1.bf16.msra.mxu0 %v2553_v51  ;;  %3509 = vmatpush1.bf16.msra.mxu1 %v2555_v3  ;;  %v2660_v51 = vld [vmem:[#allocation3 + $0x778] sm:$0xff]  ;;  %v2657_v3 = vld [vmem:[#allocation3 + $0x760] sm:$0xff] }
 0x60e   :  { %3346 = vmatprep.subr.bf16.mxu0 %v2562_v52  ;;  %3510 = vmatprep.subr.bf16.mxu1 %v2564_v53  ;;  %v2659_v52 = vld [vmem:[#allocation3 + $0x770] sm:$0xff]  ;;  %v2666_v53 = vld [vmem:[#allocation3 + $0x7a8] sm:$0xff] }
 0x60f   :  { %3376 = vmatprep.mubr.bf16.mxu0 %v4741_v4  ;;  %3540 = vmatprep.mubr.bf16.mxu1 %v4741_v4  ;;  %v2585_v4 = vld [vmem:[#allocation3 + $0x520] sm:$0xff] }
 0x611   :  { %3347 = vmatpush1.bf16.msra.mxu0 %v2561_v54  ;;  %3511 = vmatpush1.bf16.msra.mxu1 %v2563_v32  ;;  %v2668_v54 = vld [vmem:[#allocation3 + $0x7b8] sm:$0xff]  ;;  %v2665_v32 = vld [vmem:[#allocation3 + $0x7a0] sm:$0xff] }
 0x612   :  { %3348 = vmatprep.subr.bf16.mxu0 %v2570_v55  ;;  %3512 = vmatprep.subr.bf16.mxu1 %v2572_v62  ;;  %v2667_v55 = vld [vmem:[#allocation3 + $0x7b0] sm:$0xff]  ;;  %v2674_v62 = vld [vmem:[#allocation3 + $0x7e8] sm:$0xff] }
 0x615   :  { %3349 = vmatpush1.bf16.msra.mxu0 %v2569_v56  ;;  %3513 = vmatpush1.bf16.msra.mxu1 %v2571_v58  ;;  %v2676_v56 = vld [vmem:[#allocation3 + $0x7f8] sm:$0xff]  ;;  %v2673_v58 = vld [vmem:[#allocation3 + $0x7e0] sm:$0xff] }
 0x616   :  { %3350 = vmatprep.subr.bf16.mxu0 %v2578_v59  ;;  %3514 = vmatprep.subr.bf16.mxu1 %v2580_v1  ;;  %v2675_v59 = vld [vmem:[#allocation3 + $0x7f0] sm:$0xff]  ;;  %v2682_v1 = vld [vmem:[#allocation3 + $0x828] sm:$0xff] }
 0x619   :  { %3351 = vmatpush1.bf16.msra.mxu0 %v2577_v36  ;;  %3515 = vmatpush1.bf16.msra.mxu1 %v2579_v61  ;;  %v2684_v36 = vld [vmem:[#allocation3 + $0x838] sm:$0xff]  ;;  %v2681_v61 = vld [vmem:[#allocation3 + $0x820] sm:$0xff] }
 0x61a   :  { %3352 = vmatprep.subr.bf16.mxu0 %v2586_v5  ;;  %3516 = vmatprep.subr.bf16.mxu1 %v2588_v6  ;;  %v2683_v5 = vld [vmem:[#allocation3 + $0x830] sm:$0xff]  ;;  %v2690_v6 = vld [vmem:[#allocation3 + $0x868] sm:$0xff] }
 0x61d   :  { %3353 = vmatpush1.bf16.msra.mxu0 %v2585_v4  ;;  %3517 = vmatpush1.bf16.msra.mxu1 %v2587_v34  ;;  %v2692_v4 = vld [vmem:[#allocation3 + $0x878] sm:$0xff]  ;;  %v2689_v34 = vld [vmem:[#allocation3 + $0x860] sm:$0xff] }
 0x61e   :  { %3354 = vmatprep.subr.bf16.mxu0 %v2594_v15  ;;  %3518 = vmatprep.subr.bf16.mxu1 %v2596_v63  ;;  %v2691_v15 = vld [vmem:[#allocation3 + $0x870] sm:$0xff]  ;;  %v2698_v63 = vld [vmem:[#allocation3 + $0x8a8] sm:$0xff] }
 0x621   :  { %3355 = vmatpush1.bf16.msra.mxu0 %v2593_v16  ;;  %3519 = vmatpush1.bf16.msra.mxu1 %v2595_v17  ;;  %v2700_v16 = vld [vmem:[#allocation3 + $0x8b8] sm:$0xff]  ;;  %v2697_v17 = vld [vmem:[#allocation3 + $0x8a0] sm:$0xff] }
 0x622   :  { %3356 = vmatprep.subr.bf16.mxu0 %v2602_v12  ;;  %3520 = vmatprep.subr.bf16.mxu1 %v2604_v18  ;;  %v2699_v12 = vld [vmem:[#allocation3 + $0x8b0] sm:$0xff]  ;;  %v2706_v18 = vld [vmem:[#allocation3 + $0x8e8] sm:$0xff] }
 0x625   :  { %3357 = vmatpush1.bf16.msra.mxu0 %v2601_v19  ;;  %3521 = vmatpush1.bf16.msra.mxu1 %v2603_v60  ;;  %v2705_v19 = vld [vmem:[#allocation3 + $0x8e0] sm:$0xff]  ;;  %v2707_v60 = vld [vmem:[#allocation3 + $0x8f0] sm:$0xff] }
 0x626   :  { %3358 = vmatprep.subr.bf16.mxu0 %v2610_v20  ;;  %3522 = vmatprep.subr.bf16.mxu1 %v2612_v21  ;;  %v2714_v20 = vld [vmem:[#allocation3 + $0x928] sm:$0xff]  ;;  %v2716_v21 = vld [vmem:[#allocation3 + $0x938] sm:$0xff] }
 0x629   :  { %3359 = vmatpush1.bf16.msra.mxu0 %v2609_v22  ;;  %3523 = vmatpush1.bf16.msra.mxu1 %v2611_v23  ;;  %v2715_v22 = vld [vmem:[#allocation3 + $0x930] sm:$0xff]  ;;  %v2722_v23 = vld [vmem:[#allocation3 + $0x968] sm:$0xff] }
 0x62a   :  { %3360 = vmatprep.subr.bf16.mxu0 %v2618_v0  ;;  %3524 = vmatprep.subr.bf16.mxu1 %v2620_v25  ;;  %v2724_v0 = vld [vmem:[#allocation3 + $0x978] sm:$0xff]  ;;  %v2721_v25 = vld [vmem:[#allocation3 + $0x960] sm:$0xff] }
 0x62d   :  { %3361 = vmatpush1.bf16.msra.mxu0 %v2617_v26  ;;  %3525 = vmatpush1.bf16.msra.mxu1 %v2619_v27  ;;  %v2723_v26 = vld [vmem:[#allocation3 + $0x970] sm:$0xff]  ;;  %v2730_v27 = vld [vmem:[#allocation3 + $0x9a8] sm:$0xff] }
 0x62e   :  { %3362 = vmatprep.subr.bf16.mxu0 %v2626_v28  ;;  %3526 = vmatprep.subr.bf16.mxu1 %v2628_v29  ;;  %v2732_v28 = vld [vmem:[#allocation3 + $0x9b8] sm:$0xff]  ;;  %v2729_v29 = vld [vmem:[#allocation3 + $0x9a0] sm:$0xff] }
 0x631   :  { %3363 = vmatpush1.bf16.msra.mxu0 %v2625_v30  ;;  %3527 = vmatpush1.bf16.msra.mxu1 %v2627_v31  ;;  %v2731_v30 = vld [vmem:[#allocation3 + $0x9b0] sm:$0xff]  ;;  %v2738_v31 = vld [vmem:[#allocation3 + $0x9e8] sm:$0xff] }
 0x632   :  { %3364 = vmatprep.subr.bf16.mxu0 %v2634_v33  ;;  %3528 = vmatprep.subr.bf16.mxu1 %v2636_v41  ;;  %v2740_v33 = vld [vmem:[#allocation3 + $0x9f8] sm:$0xff]  ;;  %v2737_v41 = vld [vmem:[#allocation3 + $0x9e0] sm:$0xff] }
 0x635   :  { %3365 = vmatpush1.bf16.msra.mxu0 %v2633_v57  ;;  %3529 = vmatpush1.bf16.msra.mxu1 %v2635_v42  ;;  %v2739_v57 = vld [vmem:[#allocation3 + $0x9f0] sm:$0xff]  ;;  %v2746_v42 = vld [vmem:[#allocation3 + $0xa28] sm:$0xff] }
 0x636   :  { %3366 = vmatprep.subr.bf16.mxu0 %v2642_v43  ;;  %3530 = vmatprep.subr.bf16.mxu1 %v2644_v44  ;;  %v2748_v43 = vld [vmem:[#allocation3 + $0xa38] sm:$0xff]  ;;  %v2745_v44 = vld [vmem:[#allocation3 + $0xa20] sm:$0xff] }
 0x639   :  { %3367 = vmatpush1.bf16.msra.mxu0 %v2641_v45  ;;  %3531 = vmatpush1.bf16.msra.mxu1 %v2643_v35  ;;  %v2747_v45 = vld [vmem:[#allocation3 + $0xa30] sm:$0xff]  ;;  %v2754_v35 = vld [vmem:[#allocation3 + $0xa68] sm:$0xff] }
 0x63a   :  { %3368 = vmatprep.subr.bf16.mxu0 %v2650_v46  ;;  %3532 = vmatprep.subr.bf16.mxu1 %v2652_v47  ;;  %v2756_v46 = vld [vmem:[#allocation3 + $0xa78] sm:$0xff]  ;;  %v2753_v47 = vld [vmem:[#allocation3 + $0xa60] sm:$0xff] }
 0x63d   :  { %3369 = vmatpush1.bf16.msra.mxu0 %v2649_v48  ;;  %3533 = vmatpush1.bf16.msra.mxu1 %v2651_v49  ;;  %v2755_v48 = vld [vmem:[#allocation3 + $0xa70] sm:$0xff]  ;;  %v2762_v49 = vld [vmem:[#allocation3 + $0xaa8] sm:$0xff] }
 0x63e   :  { %3370 = vmatprep.subr.bf16.mxu0 %v2658_v50  ;;  %3534 = vmatprep.subr.bf16.mxu1 %v2660_v51  ;;  %v2764_v50 = vld [vmem:[#allocation3 + $0xab8] sm:$0xff]  ;;  %v2761_v51 = vld [vmem:[#allocation3 + $0xaa0] sm:$0xff] }
 0x641   :  { %3371 = vmatpush1.bf16.msra.mxu0 %v2657_v3  ;;  %3535 = vmatpush1.bf16.msra.mxu1 %v2659_v52  ;;  %v2763_v3 = vld [vmem:[#allocation3 + $0xab0] sm:$0xff]  ;;  %v2770_v52 = vld [vmem:[#allocation3 + $0xae8] sm:$0xff] }
 0x642   :  { %3372 = vmatprep.subr.bf16.mxu0 %v2666_v53  ;;  %3536 = vmatprep.subr.bf16.mxu1 %v2668_v54  ;;  %v2772_v53 = vld [vmem:[#allocation3 + $0xaf8] sm:$0xff]  ;;  %v2769_v54 = vld [vmem:[#allocation3 + $0xae0] sm:$0xff] }
 0x645   :  { %3373 = vmatpush1.bf16.msra.mxu0 %v2665_v32  ;;  %3537 = vmatpush1.bf16.msra.mxu1 %v2667_v55  ;;  %v2771_v32 = vld [vmem:[#allocation3 + $0xaf0] sm:$0xff]  ;;  %v2778_v55 = vld [vmem:[#allocation3 + $0xb28] sm:$0xff] }
 0x646   :  { %3374 = vmatprep.subr.bf16.mxu0 %v2674_v62  ;;  %3538 = vmatprep.subr.bf16.mxu1 %v2676_v56  ;;  %v2780_v62 = vld [vmem:[#allocation3 + $0xb38] sm:$0xff]  ;;  %v2777_v56 = vld [vmem:[#allocation3 + $0xb20] sm:$0xff] }
 0x649   :  { %3375 = vmatpush1.bf16.msra.mxu0 %v2673_v58  ;;  %3539 = vmatpush1.bf16.msra.mxu1 %v2675_v59  ;;  %v2779_v58 = vld [vmem:[#allocation3 + $0xb30] sm:$0xff]  ;;  %v2786_v59 = vld [vmem:[#allocation3 + $0xb68] sm:$0xff] }
 0x64a   :  { %3385 = vmatprep.subr.bf16.mxu0 %v2682_v1  ;;  %3549 = vmatprep.subr.bf16.mxu1 %v2684_v36  ;;  %v2788_v1 = vld [vmem:[#allocation3 + $0xb78] sm:$0xff]  ;;  %v2785_v36 = vld [vmem:[#allocation3 + $0xb60] sm:$0xff] }
 0x64c   :  { %3377 = vmatmul.mubr.bf16.vlgmr.msra.gmra.mrb[20].mxu0 %v4737_v2  ;;  %3541 = vmatmul.mubr.bf16.vlgmr.msra.gmra.mrb[20].mxu1 %v4737_v2  ;;  %v2708_v2 = vld [vmem:[#allocation3 + $0x8f8] sm:$0xff] }
 0x64d   :  { %3386 = vmatpush1.bf16.msra.mxu0 %v2681_v61  ;;  %3550 = vmatpush1.bf16.msra.mxu1 %v2683_v5  ;;  %v2787_v61 = vld [vmem:[#allocation3 + $0xb70] sm:$0xff]  ;;  %v2794_v5 = vld [vmem:[#allocation3 + $0xba8] sm:$0xff] }
 0x64e   :  { %3387 = vmatprep.subr.bf16.mxu0 %v2690_v6  ;;  %3551 = vmatprep.subr.bf16.mxu1 %v2692_v4  ;;  %v2796_v6 = vld [vmem:[#allocation3 + $0xbb8] sm:$0xff]  ;;  %v2793_v4 = vld [vmem:[#allocation3 + $0xba0] sm:$0xff] }
 0x64f   :  { %3417 = vmatprep.mubr.bf16.mxu0 %v4757_v24  ;;  %3581 = vmatprep.mubr.bf16.mxu1 %v4757_v24  ;;  %v2713_v24 = vld [vmem:[#allocation3 + $0x920] sm:$0xff] }
 0x651   :  { %3388 = vmatpush1.bf16.msra.mxu0 %v2689_v34  ;;  %3552 = vmatpush1.bf16.msra.mxu1 %v2691_v15  ;;  %v2795_v34 = vld [vmem:[#allocation3 + $0xbb0] sm:$0xff]  ;;  %v2802_v15 = vld [vmem:[#allocation3 + $0xbe8] sm:$0xff] }
 0x652   :  { %3389 = vmatprep.subr.bf16.mxu0 %v2698_v63  ;;  %3553 = vmatprep.subr.bf16.mxu1 %v2700_v16  ;;  %v2804_v63 = vld [vmem:[#allocation3 + $0xbf8] sm:$0xff]  ;;  %v2801_v16 = vld [vmem:[#allocation3 + $0xbe0] sm:$0xff] }
 0x655   :  { %3390 = vmatpush1.bf16.msra.mxu0 %v2697_v17  ;;  %3554 = vmatpush1.bf16.msra.mxu1 %v2699_v12  ;;  %v2803_v17 = vld [vmem:[#allocation3 + $0xbf0] sm:$0xff]  ;;  %v2810_v12 = vld [vmem:[#allocation3 + $0xc28] sm:$0xff] }
 0x656   :  { %3391 = vmatprep.subr.bf16.mxu0 %v2706_v18  ;;  %3555 = vmatprep.subr.bf16.mxu1 %v2708_v2  ;;  %v2812_v18 = vld [vmem:[#allocation3 + $0xc38] sm:$0xff]  ;;  %v2809_v2 = vld [vmem:[#allocation3 + $0xc20] sm:$0xff] }
 0x659   :  { %3392 = vmatpush1.bf16.msra.mxu0 %v2705_v19  ;;  %3556 = vmatpush1.bf16.msra.mxu1 %v2707_v60  ;;  %v2811_v19 = vld [vmem:[#allocation3 + $0xc30] sm:$0xff]  ;;  %v2818_v60 = vld [vmem:[#allocation3 + $0xc68] sm:$0xff] }
 0x65a   :  { %3393 = vmatprep.subr.bf16.mxu0 %v2714_v20  ;;  %3557 = vmatprep.subr.bf16.mxu1 %v2716_v21  ;;  %v2820_v20 = vld [vmem:[#allocation3 + $0xc78] sm:$0xff]  ;;  %v2817_v21 = vld [vmem:[#allocation3 + $0xc60] sm:$0xff] }
 0x65d   :  { %3394 = vmatpush1.bf16.msra.mxu0 %v2713_v24  ;;  %3558 = vmatpush1.bf16.msra.mxu1 %v2715_v22  ;;  %v2819_v24 = vld [vmem:[#allocation3 + $0xc70] sm:$0xff]  ;;  %v2826_v22 = vld [vmem:[#allocation3 + $0xca8] sm:$0xff] }
 0x65e   :  { %3395 = vmatprep.subr.bf16.mxu0 %v2722_v23  ;;  %3559 = vmatprep.subr.bf16.mxu1 %v2724_v0  ;;  %v2828_v23 = vld [vmem:[#allocation3 + $0xcb8] sm:$0xff]  ;;  %v2825_v0 = vld [vmem:[#allocation3 + $0xca0] sm:$0xff] }
 0x661   :  { %3396 = vmatpush1.bf16.msra.mxu0 %v2721_v25  ;;  %3560 = vmatpush1.bf16.msra.mxu1 %v2723_v26  ;;  %v2827_v25 = vld [vmem:[#allocation3 + $0xcb0] sm:$0xff]  ;;  %v2834_v26 = vld [vmem:[#allocation3 + $0xce8] sm:$0xff] }
 0x662   :  { %3397 = vmatprep.subr.bf16.mxu0 %v2730_v27  ;;  %3561 = vmatprep.subr.bf16.mxu1 %v2732_v28  ;;  %v2833_v27 = vld [vmem:[#allocation3 + $0xce0] sm:$0xff]  ;;  %v2835_v28 = vld [vmem:[#allocation3 + $0xcf0] sm:$0xff] }
 0x665   :  { %3398 = vmatpush1.bf16.msra.mxu0 %v2729_v29  ;;  %3562 = vmatpush1.bf16.msra.mxu1 %v2731_v30  ;;  %v2842_v29 = vld [vmem:[#allocation3 + $0xd28] sm:$0xff]  ;;  %v2844_v30 = vld [vmem:[#allocation3 + $0xd38] sm:$0xff] }
 0x666   :  { %3399 = vmatprep.subr.bf16.mxu0 %v2738_v31  ;;  %3563 = vmatprep.subr.bf16.mxu1 %v2740_v33  ;;  %v4791_v31 = vld [vmem:[#allocation14] sm:$0xff]  ;;  %v2843_v33 = vld [vmem:[#allocation3 + $0xd30] sm:$0xff] }
 0x669   :  { %3400 = vmatpush1.bf16.msra.mxu0 %v2737_v41  ;;  %3564 = vmatpush1.bf16.msra.mxu1 %v2739_v57  ;;  %v2850_v41 = vld [vmem:[#allocation3 + $0xd68] sm:$0xff]  ;;  %v2852_v57 = vld [vmem:[#allocation3 + $0xd78] sm:$0xff] }
 0x66a   :  { %3401 = vmatprep.subr.bf16.mxu0 %v2746_v42  ;;  %3565 = vmatprep.subr.bf16.mxu1 %v2748_v43  ;;  %v2938_v42 = vrot.slane %v4791_v31, %v4655_v8  ;;  %v2946_v43 = vrot.slane %v4791_v31, %v4657_v10 }
 0x66d   :  { %3402 = vmatpush1.bf16.msra.mxu0 %v2745_v44  ;;  %3566 = vmatpush1.bf16.msra.mxu1 %v2747_v45  ;;  %v2942_v44 = vrot.slane %v4791_v31, %v4659_v11  ;;  %v2950_v45 = vrot.slane %v4791_v31, %v4661_v13 }
 0x66e   :  { %3403 = vmatprep.subr.bf16.mxu0 %v2754_v35  ;;  %3567 = vmatprep.subr.bf16.mxu1 %v2756_v46  ;;  %v2849_v35 = vld [vmem:[#allocation3 + $0xd60] sm:$0xff]  ;;  %v2851_v46 = vld [vmem:[#allocation3 + $0xd70] sm:$0xff] }
 0x671   :  { %3404 = vmatpush1.bf16.msra.mxu0 %v2753_v47  ;;  %3568 = vmatpush1.bf16.msra.mxu1 %v2755_v48 }
 0x672   :  { %3405 = vmatprep.subr.bf16.mxu0 %v2762_v49  ;;  %3569 = vmatprep.subr.bf16.mxu1 %v2764_v50  ;;  %v2858_v49 = vld [vmem:[#allocation3 + $0xda8] sm:$0xff]  ;;  %v2860_v50 = vld [vmem:[#allocation3 + $0xdb8] sm:$0xff] }
 0x675   :  { %3406 = vmatpush1.bf16.msra.mxu0 %v2761_v51  ;;  %3570 = vmatpush1.bf16.msra.mxu1 %v2763_v3 }
 0x676   :  { %3407 = vmatprep.subr.bf16.mxu0 %v2770_v52  ;;  %3571 = vmatprep.subr.bf16.mxu1 %v2772_v53 }
 0x679   :  { %3408 = vmatpush1.bf16.msra.mxu0 %v2769_v54  ;;  %3572 = vmatpush1.bf16.msra.mxu1 %v2771_v32 }
 0x67a   :  { %3409 = vmatprep.subr.bf16.mxu0 %v2778_v55  ;;  %3573 = vmatprep.subr.bf16.mxu1 %v2780_v62 }
 0x67d   :  { %3410 = vmatpush1.bf16.msra.mxu0 %v2777_v56  ;;  %3574 = vmatpush1.bf16.msra.mxu1 %v2779_v58  ;;  %v2857_v56 = vld [vmem:[#allocation3 + $0xda0] sm:$0xff]  ;;  %v2859_v58 = vld [vmem:[#allocation3 + $0xdb0] sm:$0xff] }
 0x67e   :  { %3411 = vmatprep.subr.bf16.mxu0 %v2786_v59  ;;  %3575 = vmatprep.subr.bf16.mxu1 %v2788_v1 }
 0x681   :  { %3412 = vmatpush1.bf16.msra.mxu0 %v2785_v36  ;;  %3576 = vmatpush1.bf16.msra.mxu1 %v2787_v61  ;;  %v2866_v36 = vld [vmem:[#allocation3 + $0xde8] sm:$0xff]  ;;  %v2868_v61 = vld [vmem:[#allocation3 + $0xdf8] sm:$0xff] }
 0x682   :  { %3413 = vmatprep.subr.bf16.mxu0 %v2794_v5  ;;  %3577 = vmatprep.subr.bf16.mxu1 %v2796_v6 }
 0x685   :  { %3414 = vmatpush1.bf16.msra.mxu0 %v2793_v4  ;;  %3578 = vmatpush1.bf16.msra.mxu1 %v2795_v34 }
 0x686   :  { %3415 = vmatprep.subr.bf16.mxu0 %v2802_v15  ;;  %3579 = vmatprep.subr.bf16.mxu1 %v2804_v63  ;;  %v2865_v15 = vld [vmem:[#allocation3 + $0xde0] sm:$0xff]  ;;  %v2867_v63 = vld [vmem:[#allocation3 + $0xdf0] sm:$0xff] }
 0x689   :  { %3416 = vmatpush1.bf16.msra.mxu0 %v2801_v16  ;;  %3580 = vmatpush1.bf16.msra.mxu1 %v2803_v17  ;;  %v2874_v16 = vld [vmem:[#allocation3 + $0xe28] sm:$0xff]  ;;  %v2876_v17 = vld [vmem:[#allocation3 + $0xe38] sm:$0xff] }
 0x68a   :  { %3426 = vmatprep.subr.bf16.mxu0 %v2810_v12  ;;  %3590 = vmatprep.subr.bf16.mxu1 %v2812_v18  ;;  %v2873_v12 = vld [vmem:[#allocation3 + $0xe20] sm:$0xff]  ;;  %v2875_v18 = vld [vmem:[#allocation3 + $0xe30] sm:$0xff] }
 0x68c   :  { %3418 = vmatmul.mubr.bf16.vlgmr.msra.gmra.mrb[20].mxu0 %v4753_v7  ;;  %3582 = vmatmul.mubr.bf16.vlgmr.msra.gmra.mrb[20].mxu1 %v4753_v7  ;;  %v2836_v7 = vld [vmem:[#allocation3 + $0xcf8] sm:$0xff] }
 0x68d   :  { %3427 = vmatpush1.bf16.msra.mxu0 %v2809_v2  ;;  %3591 = vmatpush1.bf16.msra.mxu1 %v2811_v19  ;;  %v2882_v2 = vld [vmem:[#allocation3 + $0xe68] sm:$0xff]  ;;  %v2884_v19 = vld [vmem:[#allocation3 + $0xe78] sm:$0xff] }
 0x68e   :  { %3428 = vmatprep.subr.bf16.mxu0 %v2818_v60  ;;  %3592 = vmatprep.subr.bf16.mxu1 %v2820_v20  ;;  %v2881_v60 = vld [vmem:[#allocation3 + $0xe60] sm:$0xff]  ;;  %v2883_v20 = vld [vmem:[#allocation3 + $0xe70] sm:$0xff] }
 0x68f   :  { %3458 = vmatprep.mubr.bf16.mxu0 %v4759_v14  ;;  %3622 = vmatprep.mubr.bf16.mxu1 %v4759_v14  ;;  %v2841_v14 = vld [vmem:[#allocation3 + $0xd20] sm:$0xff] }
 0x691   :  { %3429 = vmatpush1.bf16.msra.mxu0 %v2817_v21  ;;  %3593 = vmatpush1.bf16.msra.mxu1 %v2819_v24  ;;  %v2890_v21 = vld [vmem:[#allocation3 + $0xea8] sm:$0xff]  ;;  %v2892_v24 = vld [vmem:[#allocation3 + $0xeb8] sm:$0xff] }
 0x692   :  { %3430 = vmatprep.subr.bf16.mxu0 %v2826_v22  ;;  %3594 = vmatprep.subr.bf16.mxu1 %v2828_v23  ;;  %v2889_v22 = vld [vmem:[#allocation3 + $0xea0] sm:$0xff]  ;;  %v2891_v23 = vld [vmem:[#allocation3 + $0xeb0] sm:$0xff] }
 0x695   :  { %3431 = vmatpush1.bf16.msra.mxu0 %v2825_v0  ;;  %3595 = vmatpush1.bf16.msra.mxu1 %v2827_v25  ;;  %v2898_v0 = vld [vmem:[#allocation3 + $0xee8] sm:$0xff]  ;;  %v2900_v25 = vld [vmem:[#allocation3 + $0xef8] sm:$0xff] }
 0x696   :  { %3432 = vmatprep.subr.bf16.mxu0 %v2834_v26  ;;  %3596 = vmatprep.subr.bf16.mxu1 %v2836_v7  ;;  %v2897_v26 = vld [vmem:[#allocation3 + $0xee0] sm:$0xff]  ;;  %v2899_v7 = vld [vmem:[#allocation3 + $0xef0] sm:$0xff] }
 0x699   :  { %3433 = vmatpush1.bf16.msra.mxu0 %v2833_v27  ;;  %3597 = vmatpush1.bf16.msra.mxu1 %v2835_v28  ;;  %v2906_v27 = vld [vmem:[#allocation3 + $0xf28] sm:$0xff]  ;;  %v2908_v28 = vld [vmem:[#allocation3 + $0xf38] sm:$0xff] }
 0x69a   :  { %3434 = vmatprep.subr.bf16.mxu0 %v2842_v29  ;;  %3598 = vmatprep.subr.bf16.mxu1 %v2844_v30  ;;  %v2905_v29 = vld [vmem:[#allocation3 + $0xf20] sm:$0xff]  ;;  %v2907_v30 = vld [vmem:[#allocation3 + $0xf30] sm:$0xff] }
 0x69d   :  { %3435 = vmatpush1.bf16.msra.mxu0 %v2841_v14  ;;  %3599 = vmatpush1.bf16.msra.mxu1 %v2843_v33  ;;  %v2914_v14 = vld [vmem:[#allocation3 + $0xf68] sm:$0xff]  ;;  %v2916_v33 = vld [vmem:[#allocation3 + $0xf78] sm:$0xff] }
 0x69e   :  { %3436 = vmatprep.subr.bf16.mxu0 %v2850_v41  ;;  %3600 = vmatprep.subr.bf16.mxu1 %v2852_v57  ;;  %v2913_v41 = vld [vmem:[#allocation3 + $0xf60] sm:$0xff]  ;;  %v2915_v57 = vld [vmem:[#allocation3 + $0xf70] sm:$0xff] }
 0x69f   :  { %v3132_v47 = vpop.f32.mrb[16].mxu0  ;;  %v3296_v48 = vpop.f32.mrb[16].mxu1 }
 0x6a0   :  { %v4157_v8 = vadd.f32 %v3132_v47, %v2938_v42  ;;  %v4159_v51 = vadd.f32 %v3296_v48, %v2946_v43  ;;  %v3134_v3 = vpop.f32.mrb[17].mxu0  ;;  %v3298_v10 = vpop.f32.mrb[17].mxu1  ;;  %v2922_v42 = vld [vmem:[#allocation3 + $0xfa8] sm:$0xff]  ;;  %v2924_v43 = vld [vmem:[#allocation3 + $0xfb8] sm:$0xff]  ;;  %v2929_v47 = vld [vmem:[#allocation3 + $0xfe0] sm:$0xff] }
 0x6a1   :  { %v4158_v52 = vadd.f32 %v3134_v3, %v2942_v44  ;;  %v4160_v53 = vadd.f32 %v3298_v10, %v2950_v45  ;;  %v3136_v54 = vpop.f32.mrb[18].mxu0  ;;  %v3300_v32 = vpop.f32.mrb[18].mxu1  ;;  %3437 = vmatpush1.bf16.msra.mxu0 %v2849_v35  ;;  %3601 = vmatpush1.bf16.msra.mxu1 %v2851_v46  ;;  %v2921_v44 = vld [vmem:[#allocation3 + $0xfa0] sm:$0xff]  ;;  %v2923_v45 = vld [vmem:[#allocation3 + $0xfb0] sm:$0xff]  ;;  %v2930_v35 = vld [vmem:[#allocation3 + $0xfe8] sm:$0xff] }
 0x6a2   :  { %v3631_v11 = vmax.f32 %v4157_v8, 0.0  ;;  %v3633_v13 = vmax.f32 %v4159_v51, 0.0  ;;  %v3137_v55 = vpop.f32.mrb[19].mxu0  ;;  %v3301_v62 = vpop.f32.mrb[19].mxu1  ;;  %3438 = vmatprep.subr.bf16.mxu0 %v2858_v49  ;;  %3602 = vmatprep.subr.bf16.mxu1 %v2860_v50  ;;  %v2932_v46 = vld [vmem:[#allocation3 + $0xff8] sm:$0xff]  ;;  %v2931_v48 = vld [vmem:[#allocation3 + $0xff0] sm:$0xff]  ;;  %v2954_v49 = vrot.slane %v4791_v31, %v4675_v37  ;;  %v2962_v50 = vrot.slane %v4791_v31, %v4677_v38 }
 0x6a3   :  { %v3632_v59 = vmax.f32 %v4158_v52, 0.0  ;;  %v3634_v1 = vmax.f32 %v4160_v53, 0.0  ;;  %v2958_v8 = vrot.slane %v4791_v31, %v4679_v39  ;;  %v2966_v51 = vrot.slane %v4791_v31, %v4681_v40 }
 0x6a4   :  { %v4801_v5 = vpack.c.bf16 %v3631_v11, %v3631_v11  ;;  %v4803_v6 = vpack.c.bf16 %v3633_v13, %v3633_v13 }
 0x6a5   :  { %v4805_v4 = vpack.c.bf16 %v3632_v59, %v3632_v59  ;;  %v4807_v34 = vpack.c.bf16 %v3634_v1, %v3634_v1  ;;  %3439 = vmatpush1.bf16.msra.mxu0 %v2857_v56  ;;  %3603 = vmatpush1.bf16.msra.mxu1 %v2859_v58 }
 0x6a6   :  { %3440 = vmatprep.subr.bf16.mxu0 %v2866_v36  ;;  %3604 = vmatprep.subr.bf16.mxu1 %v2868_v61 }
 0x6a9   :  { %3441 = vmatpush1.bf16.msra.mxu0 %v2865_v15  ;;  %3605 = vmatpush1.bf16.msra.mxu1 %v2867_v63 }
 0x6aa   :  { %3442 = vmatprep.subr.bf16.mxu0 %v2874_v16  ;;  %3606 = vmatprep.subr.bf16.mxu1 %v2876_v17 }
 0x6ad   :  { %3443 = vmatpush1.bf16.msra.mxu0 %v2873_v12  ;;  %3607 = vmatpush1.bf16.msra.mxu1 %v2875_v18 }
 0x6ae   :  { %3444 = vmatprep.subr.bf16.mxu0 %v2882_v2  ;;  %3608 = vmatprep.subr.bf16.mxu1 %v2884_v19 }
 0x6b1   :  { %3445 = vmatpush1.bf16.msra.mxu0 %v2881_v60  ;;  %3609 = vmatpush1.bf16.msra.mxu1 %v2883_v20 }
 0x6b2   :  { %3446 = vmatprep.subr.bf16.mxu0 %v2890_v21  ;;  %3610 = vmatprep.subr.bf16.mxu1 %v2892_v24 }
 0x6b5   :  { %3447 = vmatpush1.bf16.msra.mxu0 %v2889_v22  ;;  %3611 = vmatpush1.bf16.msra.mxu1 %v2891_v23 }
 0x6b6   :  { %3448 = vmatprep.subr.bf16.mxu0 %v2898_v0  ;;  %3612 = vmatprep.subr.bf16.mxu1 %v2900_v25 }
 0x6b9   :  { %3449 = vmatpush1.bf16.msra.mxu0 %v2897_v26  ;;  %3613 = vmatpush1.bf16.msra.mxu1 %v2899_v7 }
 0x6ba   :  { %3450 = vmatprep.subr.bf16.mxu0 %v2906_v27  ;;  %3614 = vmatprep.subr.bf16.mxu1 %v2908_v28 }
 0x6bd   :  { %3451 = vmatpush1.bf16.msra.mxu0 %v2905_v29  ;;  %3615 = vmatpush1.bf16.msra.mxu1 %v2907_v30 }
 0x6be   :  { %3452 = vmatprep.subr.bf16.mxu0 %v2914_v14  ;;  %3616 = vmatprep.subr.bf16.mxu1 %v2916_v33 }
 0x6c1   :  { %3453 = vmatpush1.bf16.msra.mxu0 %v2913_v41  ;;  %3617 = vmatpush1.bf16.msra.mxu1 %v2915_v57 }
 0x6c2   :  { %3454 = vmatprep.subr.bf16.mxu0 %v2922_v42  ;;  %3618 = vmatprep.subr.bf16.mxu1 %v2924_v43 }
 0x6c5   :  { %3455 = vmatpush1.bf16.msra.mxu0 %v2921_v44  ;;  %3619 = vmatpush1.bf16.msra.mxu1 %v2923_v45 }
 0x6c6   :  { %3456 = vmatprep.subr.bf16.mxu0 %v2930_v35  ;;  %3620 = vmatprep.subr.bf16.mxu1 %v2932_v46 }
 0x6c9   :  { %3457 = vmatpush1.bf16.msra.mxu0 %v2929_v47  ;;  %3621 = vmatpush1.bf16.msra.mxu1 %v2931_v48 }
 0x6cc   :  { %3459 = vmatmul.mubr.bf16.vlgmr.msra.gmra.mrb[20].mxu0 %v4755_v9  ;;  %3623 = vmatmul.mubr.bf16.vlgmr.msra.gmra.mrb[20].mxu1 %v4755_v9 }
 0x79f   :  { %v3460_v3 = vpop.f32.mrb[20].mxu0  ;;  %v3624_v10 = vpop.f32.mrb[20].mxu1 }
 0x7a0   :  { %v4161_v52 = vadd.f32 %v3460_v3, %v2954_v49  ;;  %v4163_v53 = vadd.f32 %v3624_v10, %v2962_v50  ;;  %v3462_v54 = vpop.f32.mrb[21].mxu0  ;;  %v3626_v32 = vpop.f32.mrb[21].mxu1 }
 0x7a1   :  { %v4162_v11 = vadd.f32 %v3462_v54, %v2958_v8  ;;  %v4164_v9 = vadd.f32 %v3626_v32, %v2966_v51  ;;  %v3464_v13 = vpop.f32.mrb[22].mxu0  ;;  %v3628_v55 = vpop.f32.mrb[22].mxu1 }
 0x7a2   :  { %v3635_v37 = vmax.f32 %v4161_v52, 0.0  ;;  %v3637_v62 = vmax.f32 %v4163_v53, 0.0  ;;  %v3465_v56 = vpop.f32.mrb[23].mxu0  ;;  %v3629_v38 = vpop.f32.mrb[23].mxu1 }
 0x7a3   :  { %v3636_v58 = vmax.f32 %v4162_v11, 0.0  ;;  %v3638_v59 = vmax.f32 %v4164_v9, 0.0 }
 0x7a4   :  { %v4819_v39 = vpack.c.bf16 %v3635_v37, %v3635_v37  ;;  %v4821_v1 = vpack.c.bf16 %v3637_v62, %v3637_v62 }
 0x7a5   :  { %v4823_v40 = vpack.c.bf16 %v3636_v58, %v3636_v58  ;;  %v4825_v31 = vpack.c.bf16 %v3638_v59, %v3638_v59 }
 0x7a6   :  { %4472 = dma.done.wait [#allocation5 + $0x2], 8192 }
 0x7a7   :  { %4473 = vsyncadd [#allocation5 + $0x2], 4294959104  ;;  %3758 = vmatprep.mubr.bf16.mxu0 %v4805_v4  ;;  %3798 = vmatprep.mubr.bf16.mxu1 %v4807_v34  ;;  %v3663_v36 = vld [vmem:[#allocation4 + $0x40] sm:$0xff]  ;;  %v3664_v16 = vld [vmem:[#allocation4 + $0x48] sm:$0xff]  ;;  %s4498_s7 = smov [#allocation17]  }
 0x7a8   :  { %v3679_v61 = vld [vmem:[#allocation4 + $0xc0] sm:$0xff]  ;;  %4061 = vmatprep.subr.bf16.mxu0 %v3663_v36  ;;  %v3680_v17 = vld [vmem:[#allocation4 + $0xc8] sm:$0xff]  ;;  %v3665_v2 = vld [vmem:[#allocation4 + $0x50] sm:$0xff]  ;;  %s3893_s17 = sshll.u32 %s4498_s7, 4  ;;  %s3894_s17 = int_to_ptr.vmem [resolvable:$true] %s3893_s17 }
 0x7a9   :  { %v3655_v15 = vld [vmem:[#allocation4] sm:$0xff]  ;;  %4083 = vmatprep.subr.bf16.mxu1 %v3679_v61  ;;  %v3656_v12 = vld [vmem:[#allocation4 + $0x8] sm:$0xff]  ;;  %v3681_v19 = vld [vmem:[#allocation4 + $0xd0] sm:$0xff]  ;;  %s4438_s8 = scalar_lea.vmem %s3894_s17, 128  ;;  %p4443_p1 = scmp.lt.s32.totalorder %s3894_s17, %s3894_s17 }
 0x7aa   :  { %v3671_v63 = vld [vmem:[#allocation4 + $0x80] sm:$0xff]  ;;  %4062 = vmatpush3.bf16.msra.mxu0 %v3655_v15  ;;  %v3672_v18 = vld [vmem:[#allocation4 + $0x88] sm:$0xff]  ;;  %v3657_v4 = vld [vmem:[#allocation4 + $0x10] sm:$0xff]  ;;  %p4439_p0 = scmp.ne.s32.totalorder %s3894_s17, %s4438_s8  ;;  %p4444_p2 = scmp.lt.s32.totalorder %s4438_s8, %s4438_s8 }
 0x7ab   :  { %4084 = vmatpush3.bf16.msra.mxu1 %v3671_v63  ;;  %4063 = vmatprep.subr.bf16.mxu0 %v3664_v16  ;;  %v3673_v34 = vld [vmem:[#allocation4 + $0x90] sm:$0xff]  ;;  %v3666_v60 = vld [vmem:[#allocation4 + $0x58] sm:$0xff]  ;;  %v3667_v22 = vld [vmem:[#allocation4 + $0x60] sm:$0xff] }
 0x7ac   :  { %4085 = vmatprep.subr.bf16.mxu1 %v3680_v17  ;;  %v3682_v20 = vld [vmem:[#allocation4 + $0xd8] sm:$0xff]  ;;  %v3683_v23 = vld [vmem:[#allocation4 + $0xe0] sm:$0xff]  ;;  %v3668_v26 = vld [vmem:[#allocation4 + $0x68] sm:$0xff]  ;;  %p4445_p3 = por %p4444_p2, %p4443_p1 }
 0x7ad   :  { %v3658_v21 = vld [vmem:[#allocation4 + $0x18] sm:$0xff]  ;;  %v3659_v0 = vld [vmem:[#allocation4 + $0x20] sm:$0xff]  ;;  %v3684_v7 = vld [vmem:[#allocation4 + $0xe8] sm:$0xff] }
 0x7ae   :  { %4064 = vmatpush3.bf16.msra.mxu0 %v3656_v12  ;;  %v3674_v24 = vld [vmem:[#allocation4 + $0x98] sm:$0xff]  ;;  %v3675_v25 = vld [vmem:[#allocation4 + $0xa0] sm:$0xff]  ;;  %v3660_v27 = vld [vmem:[#allocation4 + $0x28] sm:$0xff]  ;;  %p4446_p4 = pnand %p4445_p3, %p4439_p0 }
 0x7af   :  { %4086 = vmatpush3.bf16.msra.mxu1 %v3672_v18  ;;  %4065 = vmatprep.subr.bf16.mxu0 %v3665_v2  ;;  %v3676_v28 = vld [vmem:[#allocation4 + $0xa8] sm:$0xff]  ;;  %v3669_v29 = vld [vmem:[#allocation4 + $0x70] sm:$0xff]  ;;  %v3670_v41 = vld [vmem:[#allocation4 + $0x78] sm:$0xff] }
 0x7b0   :  { %4087 = vmatprep.subr.bf16.mxu1 %v3681_v19  ;;  %v3685_v30 = vld [vmem:[#allocation4 + $0xf0] sm:$0xff]  ;;  %v3686_v57 = vld [vmem:[#allocation4 + $0xf8] sm:$0xff]  ;;  %v3695_v44 = vld [vmem:[#allocation4 + $0x140] sm:$0xff] }
 0x7b1   :  { %v3661_v14 = vld [vmem:[#allocation4 + $0x30] sm:$0xff]  ;;  %v3662_v42 = vld [vmem:[#allocation4 + $0x38] sm:$0xff]  ;;  %v3711_v45 = vld [vmem:[#allocation4 + $0x1c0] sm:$0xff] }
 0x7b2   :  { %4066 = vmatpush3.bf16.msra.mxu0 %v3657_v4  ;;  %v3677_v33 = vld [vmem:[#allocation4 + $0xb0] sm:$0xff]  ;;  %v3678_v43 = vld [vmem:[#allocation4 + $0xb8] sm:$0xff]  ;;  %v3687_v35 = vld [vmem:[#allocation4 + $0x100] sm:$0xff] }
 0x7b3   :  { %4088 = vmatpush3.bf16.msra.mxu1 %v3673_v34  ;;  %4067 = vmatprep.subr.bf16.mxu0 %v3666_v60  ;;  %v3703_v46 = vld [vmem:[#allocation4 + $0x180] sm:$0xff]  ;;  %v3696_v47 = vld [vmem:[#allocation4 + $0x148] sm:$0xff]  ;;  %v3697_v8 = vld [vmem:[#allocation4 + $0x150] sm:$0xff] }
 0x7b4   :  { %4089 = vmatprep.subr.bf16.mxu1 %v3682_v20  ;;  %v3712_v48 = vld [vmem:[#allocation4 + $0x1c8] sm:$0xff]  ;;  %v3713_v51 = vld [vmem:[#allocation4 + $0x1d0] sm:$0xff]  ;;  %v3698_v10 = vld [vmem:[#allocation4 + $0x158] sm:$0xff] }
 0x7b5   :  { %v3688_v49 = vld [vmem:[#allocation4 + $0x108] sm:$0xff]  ;;  %v3689_v3 = vld [vmem:[#allocation4 + $0x110] sm:$0xff]  ;;  %v3690_v52 = vld [vmem:[#allocation4 + $0x118] sm:$0xff] }
 0x7b6   :  { %4068 = vmatpush3.bf16.msra.mxu0 %v3658_v21  ;;  %v3704_v50 = vld [vmem:[#allocation4 + $0x188] sm:$0xff]  ;;  %v3706_v53 = vld [vmem:[#allocation4 + $0x198] sm:$0xff]  ;;  %v3699_v54 = vld [vmem:[#allocation4 + $0x160] sm:$0xff] }
 0x7b7   :  { %4090 = vmatpush3.bf16.msra.mxu1 %v3674_v24  ;;  %4069 = vmatprep.subr.bf16.mxu0 %v3667_v22  ;;  %v3715_v32 = vld [vmem:[#allocation4 + $0x1e0] sm:$0xff]  ;;  %v3700_v13 = vld [vmem:[#allocation4 + $0x168] sm:$0xff]  ;;  %v3701_v56 = vld [vmem:[#allocation4 + $0x170] sm:$0xff] }
 0x7b8   :  { %4091 = vmatprep.subr.bf16.mxu1 %v3683_v23  ;;  %v3691_v11 = vld [vmem:[#allocation4 + $0x120] sm:$0xff]  ;;  %v3716_v55 = vld [vmem:[#allocation4 + $0x1e8] sm:$0xff]  ;;  %v3717_v38 = vld [vmem:[#allocation4 + $0x1f0] sm:$0xff] }
 0x7b9   :  { %v3707_v9 = vld [vmem:[#allocation4 + $0x1a0] sm:$0xff]  ;;  %v3692_v37 = vld [vmem:[#allocation4 + $0x128] sm:$0xff]  ;;  %v3693_v58 = vld [vmem:[#allocation4 + $0x130] sm:$0xff] }
 0x7ba   :  { %4070 = vmatpush3.bf16.msra.mxu0 %v3659_v0  ;;  %v3708_v62 = vld [vmem:[#allocation4 + $0x1a8] sm:$0xff]  ;;  %v3709_v59 = vld [vmem:[#allocation4 + $0x1b0] sm:$0xff]  ;;  %v3694_v36 = vld [vmem:[#allocation4 + $0x138] sm:$0xff] }
 0x7bb   :  { %4092 = vmatpush3.bf16.msra.mxu1 %v3675_v25  ;;  %4071 = vmatprep.subr.bf16.mxu0 %v3668_v26  ;;  %v3710_v61 = vld [vmem:[#allocation4 + $0x1b8] sm:$0xff]  ;;  %v4057_v16 = vld [vmem:[#allocation15] ss:$0 sm:$0xff] }
 0x7bc   :  { %4093 = vmatprep.subr.bf16.mxu1 %v3684_v7 }
 0x7be   :  { %4072 = vmatpush3.bf16.msra.mxu0 %v3660_v27 }
 0x7bf   :  { %4094 = vmatpush3.bf16.msra.mxu1 %v3676_v28  ;;  %4073 = vmatprep.subr.bf16.mxu0 %v3669_v29 }
 0x7c0   :  { %4095 = vmatprep.subr.bf16.mxu1 %v3685_v30 }
 0x7c2   :  { %4074 = vmatpush3.bf16.msra.mxu0 %v3661_v14 }
 0x7c3   :  { %4096 = vmatpush3.bf16.msra.mxu1 %v3677_v33  ;;  %4075 = vmatprep.subr.bf16.mxu0 %v3670_v41 }
 0x7c4   :  { %4097 = vmatprep.subr.bf16.mxu1 %v3686_v57 }
 0x7c6   :  { %4076 = vmatpush3.bf16.msra.mxu0 %v3662_v42 }
 0x7c7   :  { %4098 = vmatpush3.bf16.msra.mxu1 %v3678_v43  ;;  %4105 = vmatprep.subr.bf16.mxu0 %v3695_v44 }
 0x7c8   :  { %4127 = vmatprep.subr.bf16.mxu1 %v3711_v45 }
 0x7c9   :  { %3759 = vmatmul.mubr.bf16.vlgmr.msra.gmra.mrb[24].mxu0 %v4801_v5  ;;  %v3705_v5 = vld [vmem:[#allocation4 + $0x190] sm:$0xff] }
 0x7ca   :  { %3799 = vmatmul.mubr.bf16.vlgmr.msra.gmra.mrb[24].mxu1 %v4803_v6  ;;  %4106 = vmatpush3.bf16.msra.mxu0 %v3687_v35  ;;  %v3714_v6 = vld [vmem:[#allocation4 + $0x1d8] sm:$0xff] }
 0x7cb   :  { %4128 = vmatpush3.bf16.msra.mxu1 %v3703_v46  ;;  %4107 = vmatprep.subr.bf16.mxu0 %v3696_v47 }
 0x7cc   :  { %4129 = vmatprep.subr.bf16.mxu1 %v3712_v48  ;;  %3838 = vmatprep.mubr.bf16.mxu0 %v4823_v40  ;;  %v3702_v40 = vld [vmem:[#allocation4 + $0x178] sm:$0xff] }
 0x7cd   :  { %3878 = vmatprep.mubr.bf16.mxu1 %v4825_v31  ;;  %v3718_v31 = vld [vmem:[#allocation4 + $0x1f8] sm:$0xff] }
 0x7ce   :  { %4108 = vmatpush3.bf16.msra.mxu0 %v3688_v49 }
 0x7cf   :  { %4130 = vmatpush3.bf16.msra.mxu1 %v3704_v50  ;;  %4109 = vmatprep.subr.bf16.mxu0 %v3697_v8 }
 0x7d0   :  { %4131 = vmatprep.subr.bf16.mxu1 %v3713_v51 }
 0x7d2   :  { %4110 = vmatpush3.bf16.msra.mxu0 %v3689_v3 }
 0x7d3   :  { %4132 = vmatpush3.bf16.msra.mxu1 %v3705_v5  ;;  %4111 = vmatprep.subr.bf16.mxu0 %v3698_v10 }
 0x7d4   :  { %4133 = vmatprep.subr.bf16.mxu1 %v3714_v6 }
 0x7d6   :  { %4112 = vmatpush3.bf16.msra.mxu0 %v3690_v52 }
 0x7d7   :  { %4134 = vmatpush3.bf16.msra.mxu1 %v3706_v53  ;;  %4113 = vmatprep.subr.bf16.mxu0 %v3699_v54 }
 0x7d8   :  { %4135 = vmatprep.subr.bf16.mxu1 %v3715_v32 }
 0x7da   :  { %4114 = vmatpush3.bf16.msra.mxu0 %v3691_v11 }
 0x7db   :  { %4136 = vmatpush3.bf16.msra.mxu1 %v3707_v9  ;;  %4115 = vmatprep.subr.bf16.mxu0 %v3700_v13 }
 0x7dc   :  { %4137 = vmatprep.subr.bf16.mxu1 %v3716_v55 }
 0x7de   :  { %4116 = vmatpush3.bf16.msra.mxu0 %v3692_v37 }
 0x7df   :  { %4138 = vmatpush3.bf16.msra.mxu1 %v3708_v62  ;;  %4117 = vmatprep.subr.bf16.mxu0 %v3701_v56 }
 0x7e0   :  { %4139 = vmatprep.subr.bf16.mxu1 %v3717_v38 }
 0x7e2   :  { %4118 = vmatpush3.bf16.msra.mxu0 %v3693_v58 }
 0x7e3   :  { %4140 = vmatpush3.bf16.msra.mxu1 %v3709_v59  ;;  %4119 = vmatprep.subr.bf16.mxu0 %v3702_v40 }
 0x7e4   :  { %4141 = vmatprep.subr.bf16.mxu1 %v3718_v31 }
 0x7e6   :  { %4120 = vmatpush3.bf16.msra.mxu0 %v3694_v36 }
 0x7e7   :  { %4142 = vmatpush3.bf16.msra.mxu1 %v3710_v61 }
 0x7e9   :  { %3839 = vmatmul.mubr.bf16.vlgmr.msra.gmra.mrb[28].mxu0 %v4819_v39 }
 0x7ea   :  { %3879 = vmatmul.mubr.bf16.vlgmr.msra.gmra.mrb[28].mxu1 %v4821_v1 }
 0x89c   :  { %v4077_v15 = vpop.f32.mrb[24].mxu0 }
 0x89d   :  { %v4099_v63 = vpop.f32.mrb[24].mxu1  ;;  %v4078_v17 = vpop.f32.mrb[25].mxu0 }
 0x89e   :  { %v4100_v12 = vpop.f32.mrb[25].mxu1  ;;  %v4079_v18 = vadd.f32 %v4078_v17, %v4077_v15  ;;  %v4080_v19 = vpop.f32.mrb[26].mxu0 }
 0x89f   :  { %v4101_v2 = vadd.f32 %v4100_v12, %v4099_v63  ;;  %v4102_v4 = vpop.f32.mrb[26].mxu1  ;;  %v4081_v34 = vpop.f32.mrb[27].mxu0 }
 0x8a0   :  { %v4103_v60 = vpop.f32.mrb[27].mxu1  ;;  %v3761_v20 = vadd.f32 %v4079_v18, %v4057_v16 }
 0x8a2   :  { %v3801_v21 = vadd.f32 %v4101_v2, %v3761_v20 }
 0x8bc   :  { %v4121_v24 = vpop.f32.mrb[28].mxu0 }
 0x8bd   :  { %v4143_v22 = vpop.f32.mrb[28].mxu1  ;;  %v4122_v23 = vpop.f32.mrb[29].mxu0 }
 0x8be   :  { %v4144_v0 = vpop.f32.mrb[29].mxu1  ;;  %v4123_v39 = vadd.f32 %v4122_v23, %v4121_v24  ;;  %v4124_v1 = vpop.f32.mrb[30].mxu0 }
 0x8bf   :  { %v4145_v25 = vadd.f32 %v4144_v0, %v4143_v22  ;;  %v4146_v26 = vpop.f32.mrb[30].mxu1  ;;  %v4125_v7 = vpop.f32.mrb[31].mxu0 }
 0x8c0   :  { %v4147_v27 = vpop.f32.mrb[31].mxu1  ;;  %v3841_v28 = vadd.f32 %v4123_v39, %v3801_v21 }
 0x8c2   :  { %v3881_v29 = vadd.f32 %v4145_v25, %v3841_v28 }
 0x8c4   :  { %3886 = vst [vmem:[#allocation17] sm:$0xff] %v3881_v29 }
 0x8c5   :  { %4449 = shalt.err (!%p4446_p4)
}
 0x8c6   :  { %s4450_s20 = scalar_lea.hbm %s4856_s9, 128 }
 0x8c7   :  { %p4451_p5 = scmp.ne.s32.totalorder %s4856_s9, %s4450_s20  ;;  %p4454_p6 = scmp.lt.u32.totalorder %s4450_s20, %s4856_s9 }
 0x8c9   :  { %p4456_p7 = pnand %p4454_p6, %p4451_p5 }
 0x8cb   :  { %4459 = shalt.err (!%p4456_p7)
}
 0x8cc   :  { %3896 = dma.vmem_to_hbm [thread:$0]  %s3894_s17, 128, %s4856_s9, [#allocation8]  }
 0x8cd   :  { %4474 = dma.done.wait [#allocation8], 128  }
 0x8ce   :  { %4475 = vsyncadd [#allocation8], 4294967168 }
 0x8cf   :  { %3900 = vsyncpa [#allocation7], 1 }
 0x8d0   :  { %3901 = vsyncpa [#allocation10], 1 }
 0x8d1   :  { %3902 = vsyncpa [#allocation13], 1 }
 0x8d2   :  { %3903 = vsyncpa [#allocation16], 1 }
 0x8d3   :  { %3904 = vsyncpa [#allocation8], 1 }
 0x8d4   :  { %3905 = vsyncmov [#allocation5] }
 0x8d7   :  { %s3906_s25 = vpop.sfrf %3905 }
 0x8d8   :  { %p4058_p8 = scmp.ne.s32.totalorder %s3906_s25, 0 }
 0x8da   :  { %3910 = shalt.err (%p4058_p8)  }
 0x8db   :  { %3912 = vsyncmov [#allocation5 + $0x1] }
 0x8de   :  { %s3913_s27 = vpop.sfrf %3912 }
 0x8df   :  { %p4059_p9 = scmp.ne.s32.totalorder %s3913_s27, 0 }
 0x8e1   :  { %3917 = shalt.err (%p4059_p9)  }
 0x8e2   :  { %3919 = vsyncmov [#allocation5 + $0x2] }
 0x8e5   :  { %s3920_s29 = vpop.sfrf %3919 }
 0x8e6   :  { %p4060_p10 = scmp.ne.s32.totalorder %s3920_s29, 0 }
 0x8e8   :  { %3924 = shalt.err (%p4060_p10)  }

</bundles_post_ra>
